<compile_context>
chip_gen: v7x
topology: tpu7x:2x2x1
jax: 0.10.0
libtpu: 0.0.40
codegen_flags: <defaults>
</compile_context>

<pallas_src>
import jax
import jax.numpy as jnp
from jax.experimental import pallas as pl
from jax.experimental.pallas import tpu as pltpu


# ----------------------------------------------------------------------------
# Fused whole-network kernel (one image per grid step)
# ----------------------------------------------------------------------------
def _fused_unet_kernel(x_ref, w1_ref, b1_ref, w2_ref, b2_ref, wd_ref, bd_ref,
                       wht_ref, bh_ref, o_ref):
    """Entire forward pass for one image, entirely in VMEM.

    x_ref:   (1, H, W, 3) f32 input image (NHWC)
    w1_ref:  (9*3,  c1) bf16     b1_ref: (1, c1) f32
    w2_ref:  (9*c1, c2) bf16     b2_ref: (1, c2) f32
    wd_ref:  (9*(c2+c1), c1) bf16   bd_ref: (1, c1) f32   (decoder, [up | skip])
    wht_ref: (nc, c1) f32        bh_ref: (nc, 1) f32      (1x1 head, pre-transposed)
    o_ref:   (1, nc, H*W) f32 logits, channel-major (lane-dense stores)
    """
    f32, bf16 = jnp.float32, jnp.bfloat16

    def pad1(a):
        """Zero-pad H and W by 1 on an (H, W, C) VMEM value (no HBM round trip)."""
        h, w, c = a.shape
        zr = jnp.zeros((1, w, c), a.dtype)
        a = jnp.concatenate([zr, a, zr], axis=0)
        zc = jnp.zeros((h + 2, 1, c), a.dtype)
        return jnp.concatenate([zc, a, zc], axis=1)

    def conv3x3(a, w_ref_, b_ref_):
        """'same' 3x3 conv as ONE MXU matmul: (H*W, 9*Cin) @ (9*Cin, Cout) + bias."""
        h, w, _ = a.shape
        ap = pad1(a).astype(bf16)                            # bf16 MXU feed
        cols = [ap[dy:dy + h, dx:dx + w, :]
                for dy in range(3) for dx in range(3)]       # tap-major, channel-minor
        patch = jnp.concatenate(cols, axis=-1).reshape(h * w, -1)
        y = jnp.dot(patch, w_ref_[...], preferred_element_type=f32) + b_ref_[...]
        return y.reshape(h, w, -1)                           # (H, W, Cout) f32

    def maxpool2(a):
        """2x2 max-pool via static slices + pairwise max (Mosaic-friendly)."""
        h, w, _ = a.shape
        cols = [jnp.maximum(a[:, 2 * i:2 * i + 1, :], a[:, 2 * i + 1:2 * i + 2, :])
                for i in range(w // 2)]
        a = jnp.concatenate(cols, axis=1)                    # (H, W/2, C)
        rows = [jnp.maximum(a[2 * i:2 * i + 1], a[2 * i + 1:2 * i + 2])
                for i in range(h // 2)]
        return jnp.concatenate(rows, axis=0)                 # (H/2, W/2, C)

    def upsample2(a):
        """2x nearest-neighbour upsample via static slice duplication."""
        h, w, _ = a.shape
        cols = []
        for i in range(w):
            s = a[:, i:i + 1, :]
            cols += [s, s]
        a = jnp.concatenate(cols, axis=1)                    # (H, 2W, C)
        rows = []
        for i in range(h):
            s = a[i:i + 1]
            rows += [s, s]
        return jnp.concatenate(rows, axis=0)                 # (2H, 2W, C)

    x = x_ref[0]                                             # (H, W, 3) f32
    H, W, _ = x.shape

    enc1 = jnp.maximum(conv3x3(x, w1_ref, b1_ref), 0.0)      # (H, W, c1)
    p1 = maxpool2(enc1)                                      # (H/2, W/2, c1)
    enc2 = jnp.maximum(conv3x3(p1, w2_ref, b2_ref), 0.0)     # (H/2, W/2, c2)
    up = upsample2(enc2)                                     # (H, W, c2), never in HBM

    # Decoder conv on concat([up, enc1]): folded into one K = 9*(c2+c1) matmul.
    upp = pad1(up).astype(bf16)
    e1p = pad1(enc1).astype(bf16)
    cols = []
    for dy in range(3):
        for dx in range(3):
            cols.append(upp[dy:dy + H, dx:dx + W, :])        # c2 lanes
            cols.append(e1p[dy:dy + H, dx:dx + W, :])        # c1 lanes
    patch = jnp.concatenate(cols, axis=-1).reshape(H * W, -1)   # (H*W, 9*(c2+c1))
    dec = jnp.dot(patch, wd_ref[...], preferred_element_type=f32) + bd_ref[...]
    dec = jnp.maximum(dec, 0.0)                              # (H*W, c1) f32

    # 1x1 head in f32 (tiny K/N; no bf16 downcast -- v5e-friendly).  Computed
    # transposed so the HBM store is lane-dense: (nc, H*W), last dim = H*W.
    logits_t = jax.lax.dot_general(
        wht_ref[...], dec,
        dimension_numbers=(((1,), (1,)), ((), ())),
        preferred_element_type=f32) + bh_ref[...]            # (nc, H*W)
    o_ref[0] = logits_t


# ----------------------------------------------------------------------------
# Wrapper
# ----------------------------------------------------------------------------
def _prep_weights(params):
    """Reshape / cast parameters to the kernel's matmul-ready layouts."""
    bf16, f32 = jnp.bfloat16, jnp.float32
    w1 = params["enc1_w"].reshape(-1, params["enc1_w"].shape[-1]).astype(bf16)   # (27, c1)
    w2 = params["enc2_w"].reshape(-1, params["enc2_w"].shape[-1]).astype(bf16)   # (9*c1, c2)
    wd = jnp.concatenate([params["dec_up_w"], params["dec_skip_w"]], axis=1)     # (9, c2+c1, c1)
    wd = wd.reshape(-1, wd.shape[-1]).astype(bf16)                               # (9*(c2+c1), c1)
    b1 = params["enc1_b"].reshape(1, -1).astype(f32)
    b2 = params["enc2_b"].reshape(1, -1).astype(f32)
    bd = params["dec_b"].reshape(1, -1).astype(f32)
    wht = params["head_w"].T.astype(f32)                                         # (nc, c1)
    bh = params["head_b"].reshape(-1, 1).astype(f32)                             # (nc, 1)
    return w1, b1, w2, b2, wd, bd, wht, bh


def segmentation_model_forward(params, images_nchw):
    """images_nchw: (N, 3, H, W) float32 -> logits (N, num_classes, H, W) float32."""
    N, Cin, H, W = images_nchw.shape
    assert H % 2 == 0 and W % 2 == 0, "pool/upsample require even spatial dims"
    # TODO(synk): fold the NCHW->NHWC transpose into the kernel's input DMA for
    # large images; at toy sizes this is a negligible XLA copy.
    x = jnp.transpose(images_nchw, (0, 2, 3, 1)).astype(jnp.float32)   # (N, H, W, 3)

    w1, b1, w2, b2, wd, bd, wht, bh = _prep_weights(params)
    nc = wht.shape[0]

    # TODO(synk): for large images, tile spatial rows with a 2-row halo (also
    # keeps >=2 parallel grid steps on v7x when N == 1) and re-derive the tile
    # for v7x's 64 MiB VMEM; at these sizes one whole image per step is ~1-2 MiB.
    out = pl.pallas_call(
        _fused_unet_kernel,
        out_shape=jax.ShapeDtypeStruct((N, nc, H * W), jnp.float32),
        grid=(N,),
        in_specs=[
            pl.BlockSpec((1, H, W, Cin), lambda n: (n, 0, 0, 0)),
            pl.BlockSpec(w1.shape, lambda n: (0, 0)),
            pl.BlockSpec(b1.shape, lambda n: (0, 0)),
            pl.BlockSpec(w2.shape, lambda n: (0, 0)),
            pl.BlockSpec(b2.shape, lambda n: (0, 0)),
            pl.BlockSpec(wd.shape, lambda n: (0, 0)),
            pl.BlockSpec(bd.shape, lambda n: (0, 0)),
            pl.BlockSpec(wht.shape, lambda n: (0, 0)),
            pl.BlockSpec(bh.shape, lambda n: (0, 0)),
        ],
        out_specs=pl.BlockSpec((1, nc, H * W), lambda n: (n, 0, 0)),
        compiler_params=pltpu.CompilerParams(dimension_semantics=("parallel",)),
    )(x, w1, b1, w2, b2, wd, bd, wht, bh)

    # Channel-major kernel output reshapes straight to NCHW (no transpose needed).
    return out.reshape(N, nc, H, W)


# ----------------------------------------------------------------------------
# Parameters (fixed mini U-Net stand-in for the smp backbone)
# ----------------------------------------------------------------------------
def init_params(key, in_ch=3, c1=16, c2=32, num_classes=4):
    ks = jax.random.split(key, 5)

    def conv3_w(k, cin, cout):
        fan_in = 9 * cin
        return jax.random.normal(k, (9, cin, cout), jnp.float32) * jnp.sqrt(2.0 / fan_in)

    def conv1_w(k, cin, cout):
        return jax.random.normal(k, (cin, cout), jnp.float32) * jnp.sqrt(2.0 / cin)

    return {
        "enc1_w": conv3_w(ks[0], in_ch, c1), "enc1_b": jnp.zeros((c1,), jnp.float32),
        "enc2_w": conv3_w(ks[1], c1, c2),    "enc2_b": jnp.zeros((c2,), jnp.float32),
        # decoder weight split by input-channel group: [up(enc2) | enc1] concat
        "dec_up_w":   conv3_w(ks[2], c2, c1),
        "dec_skip_w": conv3_w(ks[3], c1, c1),
        "dec_b": jnp.zeros((c1,), jnp.float32),
        "head_w": conv1_w(ks[4], c1, num_classes),
        "head_b": jnp.zeros((num_classes,), jnp.float32),
    }


if __name__ == "__main__":
    key = jax.random.PRNGKey(0)
    pkey, xkey = jax.random.split(key)

    num_classes = 4
    params = init_params(pkey, in_ch=3, c1=16, c2=32, num_classes=num_classes)
    images = jax.random.normal(xkey, (2, 3, 16, 16), jnp.float32)   # NCHW like PyTorch

    fwd = jax.jit(segmentation_model_forward)
    out = jax.block_until_ready(fwd(params, images))

    assert out.shape == (2, num_classes, 16, 16), out.shape
    assert out.dtype == jnp.float32
    assert bool(jnp.all(jnp.isfinite(out)))
    print("KERNEL_OK")
</pallas_src>

<mosaic_0001>
module attributes {stable_mosaic.version = 11 : i64} {
  func.func @_fused_unet_kernel(%arg0: i32, %arg1: memref<1x16x16x3xf32, #tpu.memory_space<vmem>>, %arg2: memref<27x16xbf16, #tpu.memory_space<vmem>>, %arg3: memref<1x16xf32, #tpu.memory_space<vmem>>, %arg4: memref<144x32xbf16, #tpu.memory_space<vmem>>, %arg5: memref<1x32xf32, #tpu.memory_space<vmem>>, %arg6: memref<432x16xbf16, #tpu.memory_space<vmem>>, %arg7: memref<1x16xf32, #tpu.memory_space<vmem>>, %arg8: memref<4x16xf32, #tpu.memory_space<vmem>>, %arg9: memref<4x1xf32, #tpu.memory_space<vmem>>, %arg10: memref<1x4x256xf32, #tpu.memory_space<vmem>>) attributes {dimension_semantics = [#tpu.dimension_semantics<parallel>], iteration_bounds = array<i64: 2>, scalar_prefetch = 0 : i64, scratch_operands = 0 : i64, tpu.core_type = #tpu.core_type<tc>, window_params = [{transform_indices = @transform_0, window_bounds = array<i64: 1, 16, 16, 3>}, {pipeline_mode = #tpu.pipeline_mode<synchronous>, transform_indices = @transform_1, window_bounds = array<i64: 27, 16>}, {pipeline_mode = #tpu.pipeline_mode<synchronous>, transform_indices = @transform_2, window_bounds = array<i64: 1, 16>}, {pipeline_mode = #tpu.pipeline_mode<synchronous>, transform_indices = @transform_3, window_bounds = array<i64: 144, 32>}, {pipeline_mode = #tpu.pipeline_mode<synchronous>, transform_indices = @transform_4, window_bounds = array<i64: 1, 32>}, {pipeline_mode = #tpu.pipeline_mode<synchronous>, transform_indices = @transform_5, window_bounds = array<i64: 432, 16>}, {pipeline_mode = #tpu.pipeline_mode<synchronous>, transform_indices = @transform_6, window_bounds = array<i64: 1, 16>}, {pipeline_mode = #tpu.pipeline_mode<synchronous>, transform_indices = @transform_7, window_bounds = array<i64: 4, 16>}, {pipeline_mode = #tpu.pipeline_mode<synchronous>, transform_indices = @transform_8, window_bounds = array<i64: 4, 1>}, {transform_indices = @transform_9, window_bounds = array<i64: 1, 4, 256>}]} {
    %c0 = arith.constant 0 : index
    %c0_0 = arith.constant 0 : index
    %c0_1 = arith.constant 0 : index
    %c0_2 = arith.constant 0 : index
    %0 = vector.load %arg1[%c0, %c0_0, %c0_1, %c0_2] : memref<1x16x16x3xf32, #tpu.memory_space<vmem>>, vector<1x16x16x3xf32>
    %1 = vector.shape_cast %0 : vector<1x16x16x3xf32> to vector<16x16x3xf32>
    %cst = arith.constant 0.000000e+00 : f32
    %2 = vector.broadcast %cst : f32 to vector<1x16x3xf32>
    %3 = tpu.concatenate %2, %1, %2 in 0 : vector<1x16x3xf32>, vector<16x16x3xf32>, vector<1x16x3xf32> -> vector<18x16x3xf32>
    %cst_3 = arith.constant 0.000000e+00 : f32
    %4 = vector.broadcast %cst_3 : f32 to vector<18x1x3xf32>
    %5 = tpu.concatenate %4, %3, %4 in 1 : vector<18x1x3xf32>, vector<18x16x3xf32>, vector<18x1x3xf32> -> vector<18x18x3xf32>
    %6 = arith.truncf %5 : vector<18x18x3xf32> to vector<18x18x3xbf16>
    %7 = vector.extract_strided_slice %6 {offsets = [0, 0, 0], sizes = [16, 16, 3], strides = [1, 1, 1]} : vector<18x18x3xbf16> to vector<16x16x3xbf16>
    %8 = vector.extract_strided_slice %6 {offsets = [0, 1, 0], sizes = [16, 16, 3], strides = [1, 1, 1]} : vector<18x18x3xbf16> to vector<16x16x3xbf16>
    %9 = vector.extract_strided_slice %6 {offsets = [0, 2, 0], sizes = [16, 16, 3], strides = [1, 1, 1]} : vector<18x18x3xbf16> to vector<16x16x3xbf16>
    %10 = vector.extract_strided_slice %6 {offsets = [1, 0, 0], sizes = [16, 16, 3], strides = [1, 1, 1]} : vector<18x18x3xbf16> to vector<16x16x3xbf16>
    %11 = vector.extract_strided_slice %6 {offsets = [1, 1, 0], sizes = [16, 16, 3], strides = [1, 1, 1]} : vector<18x18x3xbf16> to vector<16x16x3xbf16>
    %12 = vector.extract_strided_slice %6 {offsets = [1, 2, 0], sizes = [16, 16, 3], strides = [1, 1, 1]} : vector<18x18x3xbf16> to vector<16x16x3xbf16>
    %13 = vector.extract_strided_slice %6 {offsets = [2, 0, 0], sizes = [16, 16, 3], strides = [1, 1, 1]} : vector<18x18x3xbf16> to vector<16x16x3xbf16>
    %14 = vector.extract_strided_slice %6 {offsets = [2, 1, 0], sizes = [16, 16, 3], strides = [1, 1, 1]} : vector<18x18x3xbf16> to vector<16x16x3xbf16>
    %15 = vector.extract_strided_slice %6 {offsets = [2, 2, 0], sizes = [16, 16, 3], strides = [1, 1, 1]} : vector<18x18x3xbf16> to vector<16x16x3xbf16>
    %16 = tpu.concatenate %7, %8, %9, %10, %11, %12, %13, %14, %15 in 2 : vector<16x16x3xbf16>, vector<16x16x3xbf16>, vector<16x16x3xbf16>, vector<16x16x3xbf16>, vector<16x16x3xbf16>, vector<16x16x3xbf16>, vector<16x16x3xbf16>, vector<16x16x3xbf16>, vector<16x16x3xbf16> -> vector<16x16x27xbf16>
    %17 = vector.shape_cast %16 : vector<16x16x27xbf16> to vector<256x27xbf16>
    %c0_4 = arith.constant 0 : index
    %c0_5 = arith.constant 0 : index
    %18 = vector.load %arg2[%c0_4, %c0_5] : memref<27x16xbf16, #tpu.memory_space<vmem>>, vector<27x16xbf16>
    %cst_6 = arith.constant dense<0.000000e+00> : vector<256x16xf32>
    %19 = tpu.matmul %17, %18, %cst_6 {dimension_numbers = #tpu.dot_dimension_numbers<[1], [0], [0], [1], [0, 0, 1, 1], [], []>} : vector<256x27xbf16>, vector<27x16xbf16>, vector<256x16xf32> -> vector<256x16xf32>
    %c0_7 = arith.constant 0 : index
    %c0_8 = arith.constant 0 : index
    %20 = vector.load %arg3[%c0_7, %c0_8] : memref<1x16xf32, #tpu.memory_space<vmem>>, vector<1x16xf32>
    %21 = vector.broadcast %20 : vector<1x16xf32> to vector<256x16xf32>
    %22 = arith.addf %19, %21 : vector<256x16xf32>
    %23 = vector.shape_cast %22 : vector<256x16xf32> to vector<16x16x16xf32>
    %cst_9 = arith.constant 0.000000e+00 : f32
    %24 = vector.broadcast %cst_9 : f32 to vector<16x16x16xf32>
    %25 = arith.maximumf %23, %24 : vector<16x16x16xf32>
    %26 = vector.extract_strided_slice %25 {offsets = [0, 0, 0], sizes = [16, 1, 16], strides = [1, 1, 1]} : vector<16x16x16xf32> to vector<16x1x16xf32>
    %27 = vector.extract_strided_slice %25 {offsets = [0, 1, 0], sizes = [16, 1, 16], strides = [1, 1, 1]} : vector<16x16x16xf32> to vector<16x1x16xf32>
    %28 = arith.maximumf %26, %27 : vector<16x1x16xf32>
    %29 = vector.extract_strided_slice %25 {offsets = [0, 2, 0], sizes = [16, 1, 16], strides = [1, 1, 1]} : vector<16x16x16xf32> to vector<16x1x16xf32>
    %30 = vector.extract_strided_slice %25 {offsets = [0, 3, 0], sizes = [16, 1, 16], strides = [1, 1, 1]} : vector<16x16x16xf32> to vector<16x1x16xf32>
    %31 = arith.maximumf %29, %30 : vector<16x1x16xf32>
    %32 = vector.extract_strided_slice %25 {offsets = [0, 4, 0], sizes = [16, 1, 16], strides = [1, 1, 1]} : vector<16x16x16xf32> to vector<16x1x16xf32>
    %33 = vector.extract_strided_slice %25 {offsets = [0, 5, 0], sizes = [16, 1, 16], strides = [1, 1, 1]} : vector<16x16x16xf32> to vector<16x1x16xf32>
    %34 = arith.maximumf %32, %33 : vector<16x1x16xf32>
    %35 = vector.extract_strided_slice %25 {offsets = [0, 6, 0], sizes = [16, 1, 16], strides = [1, 1, 1]} : vector<16x16x16xf32> to vector<16x1x16xf32>
    %36 = vector.extract_strided_slice %25 {offsets = [0, 7, 0], sizes = [16, 1, 16], strides = [1, 1, 1]} : vector<16x16x16xf32> to vector<16x1x16xf32>
    %37 = arith.maximumf %35, %36 : vector<16x1x16xf32>
    %38 = vector.extract_strided_slice %25 {offsets = [0, 8, 0], sizes = [16, 1, 16], strides = [1, 1, 1]} : vector<16x16x16xf32> to vector<16x1x16xf32>
    %39 = vector.extract_strided_slice %25 {offsets = [0, 9, 0], sizes = [16, 1, 16], strides = [1, 1, 1]} : vector<16x16x16xf32> to vector<16x1x16xf32>
    %40 = arith.maximumf %38, %39 : vector<16x1x16xf32>
    %41 = vector.extract_strided_slice %25 {offsets = [0, 10, 0], sizes = [16, 1, 16], strides = [1, 1, 1]} : vector<16x16x16xf32> to vector<16x1x16xf32>
    %42 = vector.extract_strided_slice %25 {offsets = [0, 11, 0], sizes = [16, 1, 16], strides = [1, 1, 1]} : vector<16x16x16xf32> to vector<16x1x16xf32>
    %43 = arith.maximumf %41, %42 : vector<16x1x16xf32>
    %44 = vector.extract_strided_slice %25 {offsets = [0, 12, 0], sizes = [16, 1, 16], strides = [1, 1, 1]} : vector<16x16x16xf32> to vector<16x1x16xf32>
    %45 = vector.extract_strided_slice %25 {offsets = [0, 13, 0], sizes = [16, 1, 16], strides = [1, 1, 1]} : vector<16x16x16xf32> to vector<16x1x16xf32>
    %46 = arith.maximumf %44, %45 : vector<16x1x16xf32>
    %47 = vector.extract_strided_slice %25 {offsets = [0, 14, 0], sizes = [16, 1, 16], strides = [1, 1, 1]} : vector<16x16x16xf32> to vector<16x1x16xf32>
    %48 = vector.extract_strided_slice %25 {offsets = [0, 15, 0], sizes = [16, 1, 16], strides = [1, 1, 1]} : vector<16x16x16xf32> to vector<16x1x16xf32>
    %49 = arith.maximumf %47, %48 : vector<16x1x16xf32>
    %50 = tpu.concatenate %28, %31, %34, %37, %40, %43, %46, %49 in 1 : vector<16x1x16xf32>, vector<16x1x16xf32>, vector<16x1x16xf32>, vector<16x1x16xf32>, vector<16x1x16xf32>, vector<16x1x16xf32>, vector<16x1x16xf32>, vector<16x1x16xf32> -> vector<16x8x16xf32>
    %51 = vector.extract_strided_slice %50 {offsets = [0, 0, 0], sizes = [1, 8, 16], strides = [1, 1, 1]} : vector<16x8x16xf32> to vector<1x8x16xf32>
    %52 = vector.extract_strided_slice %50 {offsets = [1, 0, 0], sizes = [1, 8, 16], strides = [1, 1, 1]} : vector<16x8x16xf32> to vector<1x8x16xf32>
    %53 = arith.maximumf %51, %52 : vector<1x8x16xf32>
    %54 = vector.extract_strided_slice %50 {offsets = [2, 0, 0], sizes = [1, 8, 16], strides = [1, 1, 1]} : vector<16x8x16xf32> to vector<1x8x16xf32>
    %55 = vector.extract_strided_slice %50 {offsets = [3, 0, 0], sizes = [1, 8, 16], strides = [1, 1, 1]} : vector<16x8x16xf32> to vector<1x8x16xf32>
    %56 = arith.maximumf %54, %55 : vector<1x8x16xf32>
    %57 = vector.extract_strided_slice %50 {offsets = [4, 0, 0], sizes = [1, 8, 16], strides = [1, 1, 1]} : vector<16x8x16xf32> to vector<1x8x16xf32>
    %58 = vector.extract_strided_slice %50 {offsets = [5, 0, 0], sizes = [1, 8, 16], strides = [1, 1, 1]} : vector<16x8x16xf32> to vector<1x8x16xf32>
    %59 = arith.maximumf %57, %58 : vector<1x8x16xf32>
    %60 = vector.extract_strided_slice %50 {offsets = [6, 0, 0], sizes = [1, 8, 16], strides = [1, 1, 1]} : vector<16x8x16xf32> to vector<1x8x16xf32>
    %61 = vector.extract_strided_slice %50 {offsets = [7, 0, 0], sizes = [1, 8, 16], strides = [1, 1, 1]} : vector<16x8x16xf32> to vector<1x8x16xf32>
    %62 = arith.maximumf %60, %61 : vector<1x8x16xf32>
    %63 = vector.extract_strided_slice %50 {offsets = [8, 0, 0], sizes = [1, 8, 16], strides = [1, 1, 1]} : vector<16x8x16xf32> to vector<1x8x16xf32>
    %64 = vector.extract_strided_slice %50 {offsets = [9, 0, 0], sizes = [1, 8, 16], strides = [1, 1, 1]} : vector<16x8x16xf32> to vector<1x8x16xf32>
    %65 = arith.maximumf %63, %64 : vector<1x8x16xf32>
    %66 = vector.extract_strided_slice %50 {offsets = [10, 0, 0], sizes = [1, 8, 16], strides = [1, 1, 1]} : vector<16x8x16xf32> to vector<1x8x16xf32>
    %67 = vector.extract_strided_slice %50 {offsets = [11, 0, 0], sizes = [1, 8, 16], strides = [1, 1, 1]} : vector<16x8x16xf32> to vector<1x8x16xf32>
    %68 = arith.maximumf %66, %67 : vector<1x8x16xf32>
    %69 = vector.extract_strided_slice %50 {offsets = [12, 0, 0], sizes = [1, 8, 16], strides = [1, 1, 1]} : vector<16x8x16xf32> to vector<1x8x16xf32>
    %70 = vector.extract_strided_slice %50 {offsets = [13, 0, 0], sizes = [1, 8, 16], strides = [1, 1, 1]} : vector<16x8x16xf32> to vector<1x8x16xf32>
    %71 = arith.maximumf %69, %70 : vector<1x8x16xf32>
    %72 = vector.extract_strided_slice %50 {offsets = [14, 0, 0], sizes = [1, 8, 16], strides = [1, 1, 1]} : vector<16x8x16xf32> to vector<1x8x16xf32>
    %73 = vector.extract_strided_slice %50 {offsets = [15, 0, 0], sizes = [1, 8, 16], strides = [1, 1, 1]} : vector<16x8x16xf32> to vector<1x8x16xf32>
    %74 = arith.maximumf %72, %73 : vector<1x8x16xf32>
    %75 = tpu.concatenate %53, %56, %59, %62, %65, %68, %71, %74 in 0 : vector<1x8x16xf32>, vector<1x8x16xf32>, vector<1x8x16xf32>, vector<1x8x16xf32>, vector<1x8x16xf32>, vector<1x8x16xf32>, vector<1x8x16xf32>, vector<1x8x16xf32> -> vector<8x8x16xf32>
    %cst_10 = arith.constant 0.000000e+00 : f32
    %76 = vector.broadcast %cst_10 : f32 to vector<1x8x16xf32>
    %77 = tpu.concatenate %76, %75, %76 in 0 : vector<1x8x16xf32>, vector<8x8x16xf32>, vector<1x8x16xf32> -> vector<10x8x16xf32>
    %cst_11 = arith.constant 0.000000e+00 : f32
    %78 = vector.broadcast %cst_11 : f32 to vector<10x1x16xf32>
    %79 = tpu.concatenate %78, %77, %78 in 1 : vector<10x1x16xf32>, vector<10x8x16xf32>, vector<10x1x16xf32> -> vector<10x10x16xf32>
    %80 = arith.truncf %79 : vector<10x10x16xf32> to vector<10x10x16xbf16>
    %81 = vector.extract_strided_slice %80 {offsets = [0, 0, 0], sizes = [8, 8, 16], strides = [1, 1, 1]} : vector<10x10x16xbf16> to vector<8x8x16xbf16>
    %82 = vector.extract_strided_slice %80 {offsets = [0, 1, 0], sizes = [8, 8, 16], strides = [1, 1, 1]} : vector<10x10x16xbf16> to vector<8x8x16xbf16>
    %83 = vector.extract_strided_slice %80 {offsets = [0, 2, 0], sizes = [8, 8, 16], strides = [1, 1, 1]} : vector<10x10x16xbf16> to vector<8x8x16xbf16>
    %84 = vector.extract_strided_slice %80 {offsets = [1, 0, 0], sizes = [8, 8, 16], strides = [1, 1, 1]} : vector<10x10x16xbf16> to vector<8x8x16xbf16>
    %85 = vector.extract_strided_slice %80 {offsets = [1, 1, 0], sizes = [8, 8, 16], strides = [1, 1, 1]} : vector<10x10x16xbf16> to vector<8x8x16xbf16>
    %86 = vector.extract_strided_slice %80 {offsets = [1, 2, 0], sizes = [8, 8, 16], strides = [1, 1, 1]} : vector<10x10x16xbf16> to vector<8x8x16xbf16>
    %87 = vector.extract_strided_slice %80 {offsets = [2, 0, 0], sizes = [8, 8, 16], strides = [1, 1, 1]} : vector<10x10x16xbf16> to vector<8x8x16xbf16>
    %88 = vector.extract_strided_slice %80 {offsets = [2, 1, 0], sizes = [8, 8, 16], strides = [1, 1, 1]} : vector<10x10x16xbf16> to vector<8x8x16xbf16>
    %89 = vector.extract_strided_slice %80 {offsets = [2, 2, 0], sizes = [8, 8, 16], strides = [1, 1, 1]} : vector<10x10x16xbf16> to vector<8x8x16xbf16>
    %90 = tpu.concatenate %81, %82, %83, %84, %85, %86, %87, %88, %89 in 2 : vector<8x8x16xbf16>, vector<8x8x16xbf16>, vector<8x8x16xbf16>, vector<8x8x16xbf16>, vector<8x8x16xbf16>, vector<8x8x16xbf16>, vector<8x8x16xbf16>, vector<8x8x16xbf16>, vector<8x8x16xbf16> -> vector<8x8x144xbf16>
    %91 = vector.shape_cast %90 : vector<8x8x144xbf16> to vector<64x144xbf16>
    %c0_12 = arith.constant 0 : index
    %c0_13 = arith.constant 0 : index
    %92 = vector.load %arg4[%c0_12, %c0_13] : memref<144x32xbf16, #tpu.memory_space<vmem>>, vector<144x32xbf16>
    %cst_14 = arith.constant dense<0.000000e+00> : vector<64x32xf32>
    %93 = tpu.matmul %91, %92, %cst_14 {dimension_numbers = #tpu.dot_dimension_numbers<[1], [0], [0], [1], [0, 0, 1, 1], [], []>} : vector<64x144xbf16>, vector<144x32xbf16>, vector<64x32xf32> -> vector<64x32xf32>
    %c0_15 = arith.constant 0 : index
    %c0_16 = arith.constant 0 : index
    %94 = vector.load %arg5[%c0_15, %c0_16] : memref<1x32xf32, #tpu.memory_space<vmem>>, vector<1x32xf32>
    %95 = vector.broadcast %94 : vector<1x32xf32> to vector<64x32xf32>
    %96 = arith.addf %93, %95 : vector<64x32xf32>
    %97 = vector.shape_cast %96 : vector<64x32xf32> to vector<8x8x32xf32>
    %cst_17 = arith.constant 0.000000e+00 : f32
    %98 = vector.broadcast %cst_17 : f32 to vector<8x8x32xf32>
    %99 = arith.maximumf %97, %98 : vector<8x8x32xf32>
    %100 = vector.extract_strided_slice %99 {offsets = [0, 0, 0], sizes = [8, 1, 32], strides = [1, 1, 1]} : vector<8x8x32xf32> to vector<8x1x32xf32>
    %101 = vector.extract_strided_slice %99 {offsets = [0, 1, 0], sizes = [8, 1, 32], strides = [1, 1, 1]} : vector<8x8x32xf32> to vector<8x1x32xf32>
    %102 = vector.extract_strided_slice %99 {offsets = [0, 2, 0], sizes = [8, 1, 32], strides = [1, 1, 1]} : vector<8x8x32xf32> to vector<8x1x32xf32>
    %103 = vector.extract_strided_slice %99 {offsets = [0, 3, 0], sizes = [8, 1, 32], strides = [1, 1, 1]} : vector<8x8x32xf32> to vector<8x1x32xf32>
    %104 = vector.extract_strided_slice %99 {offsets = [0, 4, 0], sizes = [8, 1, 32], strides = [1, 1, 1]} : vector<8x8x32xf32> to vector<8x1x32xf32>
    %105 = vector.extract_strided_slice %99 {offsets = [0, 5, 0], sizes = [8, 1, 32], strides = [1, 1, 1]} : vector<8x8x32xf32> to vector<8x1x32xf32>
    %106 = vector.extract_strided_slice %99 {offsets = [0, 6, 0], sizes = [8, 1, 32], strides = [1, 1, 1]} : vector<8x8x32xf32> to vector<8x1x32xf32>
    %107 = vector.extract_strided_slice %99 {offsets = [0, 7, 0], sizes = [8, 1, 32], strides = [1, 1, 1]} : vector<8x8x32xf32> to vector<8x1x32xf32>
    %108 = tpu.concatenate %100, %100, %101, %101, %102, %102, %103, %103, %104, %104, %105, %105, %106, %106, %107, %107 in 1 : vector<8x1x32xf32>, vector<8x1x32xf32>, vector<8x1x32xf32>, vector<8x1x32xf32>, vector<8x1x32xf32>, vector<8x1x32xf32>, vector<8x1x32xf32>, vector<8x1x32xf32>, vector<8x1x32xf32>, vector<8x1x32xf32>, vector<8x1x32xf32>, vector<8x1x32xf32>, vector<8x1x32xf32>, vector<8x1x32xf32>, vector<8x1x32xf32>, vector<8x1x32xf32> -> vector<8x16x32xf32>
    %109 = vector.extract_strided_slice %108 {offsets = [0, 0, 0], sizes = [1, 16, 32], strides = [1, 1, 1]} : vector<8x16x32xf32> to vector<1x16x32xf32>
    %110 = vector.extract_strided_slice %108 {offsets = [1, 0, 0], sizes = [1, 16, 32], strides = [1, 1, 1]} : vector<8x16x32xf32> to vector<1x16x32xf32>
    %111 = vector.extract_strided_slice %108 {offsets = [2, 0, 0], sizes = [1, 16, 32], strides = [1, 1, 1]} : vector<8x16x32xf32> to vector<1x16x32xf32>
    %112 = vector.extract_strided_slice %108 {offsets = [3, 0, 0], sizes = [1, 16, 32], strides = [1, 1, 1]} : vector<8x16x32xf32> to vector<1x16x32xf32>
    %113 = vector.extract_strided_slice %108 {offsets = [4, 0, 0], sizes = [1, 16, 32], strides = [1, 1, 1]} : vector<8x16x32xf32> to vector<1x16x32xf32>
    %114 = vector.extract_strided_slice %108 {offsets = [5, 0, 0], sizes = [1, 16, 32], strides = [1, 1, 1]} : vector<8x16x32xf32> to vector<1x16x32xf32>
    %115 = vector.extract_strided_slice %108 {offsets = [6, 0, 0], sizes = [1, 16, 32], strides = [1, 1, 1]} : vector<8x16x32xf32> to vector<1x16x32xf32>
    %116 = vector.extract_strided_slice %108 {offsets = [7, 0, 0], sizes = [1, 16, 32], strides = [1, 1, 1]} : vector<8x16x32xf32> to vector<1x16x32xf32>
    %117 = tpu.concatenate %109, %109, %110, %110, %111, %111, %112, %112, %113, %113, %114, %114, %115, %115, %116, %116 in 0 : vector<1x16x32xf32>, vector<1x16x32xf32>, vector<1x16x32xf32>, vector<1x16x32xf32>, vector<1x16x32xf32>, vector<1x16x32xf32>, vector<1x16x32xf32>, vector<1x16x32xf32>, vector<1x16x32xf32>, vector<1x16x32xf32>, vector<1x16x32xf32>, vector<1x16x32xf32>, vector<1x16x32xf32>, vector<1x16x32xf32>, vector<1x16x32xf32>, vector<1x16x32xf32> -> vector<16x16x32xf32>
    %cst_18 = arith.constant 0.000000e+00 : f32
    %118 = vector.broadcast %cst_18 : f32 to vector<1x16x32xf32>
    %119 = tpu.concatenate %118, %117, %118 in 0 : vector<1x16x32xf32>, vector<16x16x32xf32>, vector<1x16x32xf32> -> vector<18x16x32xf32>
    %cst_19 = arith.constant 0.000000e+00 : f32
    %120 = vector.broadcast %cst_19 : f32 to vector<18x1x32xf32>
    %121 = tpu.concatenate %120, %119, %120 in 1 : vector<18x1x32xf32>, vector<18x16x32xf32>, vector<18x1x32xf32> -> vector<18x18x32xf32>
    %122 = arith.truncf %121 : vector<18x18x32xf32> to vector<18x18x32xbf16>
    %cst_20 = arith.constant 0.000000e+00 : f32
    %123 = vector.broadcast %cst_20 : f32 to vector<1x16x16xf32>
    %124 = tpu.concatenate %123, %25, %123 in 0 : vector<1x16x16xf32>, vector<16x16x16xf32>, vector<1x16x16xf32> -> vector<18x16x16xf32>
    %cst_21 = arith.constant 0.000000e+00 : f32
    %125 = vector.broadcast %cst_21 : f32 to vector<18x1x16xf32>
    %126 = tpu.concatenate %125, %124, %125 in 1 : vector<18x1x16xf32>, vector<18x16x16xf32>, vector<18x1x16xf32> -> vector<18x18x16xf32>
    %127 = arith.truncf %126 : vector<18x18x16xf32> to vector<18x18x16xbf16>
    %128 = vector.extract_strided_slice %122 {offsets = [0, 0, 0], sizes = [16, 16, 32], strides = [1, 1, 1]} : vector<18x18x32xbf16> to vector<16x16x32xbf16>
    %129 = vector.extract_strided_slice %127 {offsets = [0, 0, 0], sizes = [16, 16, 16], strides = [1, 1, 1]} : vector<18x18x16xbf16> to vector<16x16x16xbf16>
    %130 = vector.extract_strided_slice %122 {offsets = [0, 1, 0], sizes = [16, 16, 32], strides = [1, 1, 1]} : vector<18x18x32xbf16> to vector<16x16x32xbf16>
    %131 = vector.extract_strided_slice %127 {offsets = [0, 1, 0], sizes = [16, 16, 16], strides = [1, 1, 1]} : vector<18x18x16xbf16> to vector<16x16x16xbf16>
    %132 = vector.extract_strided_slice %122 {offsets = [0, 2, 0], sizes = [16, 16, 32], strides = [1, 1, 1]} : vector<18x18x32xbf16> to vector<16x16x32xbf16>
    %133 = vector.extract_strided_slice %127 {offsets = [0, 2, 0], sizes = [16, 16, 16], strides = [1, 1, 1]} : vector<18x18x16xbf16> to vector<16x16x16xbf16>
    %134 = vector.extract_strided_slice %122 {offsets = [1, 0, 0], sizes = [16, 16, 32], strides = [1, 1, 1]} : vector<18x18x32xbf16> to vector<16x16x32xbf16>
    %135 = vector.extract_strided_slice %127 {offsets = [1, 0, 0], sizes = [16, 16, 16], strides = [1, 1, 1]} : vector<18x18x16xbf16> to vector<16x16x16xbf16>
    %136 = vector.extract_strided_slice %122 {offsets = [1, 1, 0], sizes = [16, 16, 32], strides = [1, 1, 1]} : vector<18x18x32xbf16> to vector<16x16x32xbf16>
    %137 = vector.extract_strided_slice %127 {offsets = [1, 1, 0], sizes = [16, 16, 16], strides = [1, 1, 1]} : vector<18x18x16xbf16> to vector<16x16x16xbf16>
    %138 = vector.extract_strided_slice %122 {offsets = [1, 2, 0], sizes = [16, 16, 32], strides = [1, 1, 1]} : vector<18x18x32xbf16> to vector<16x16x32xbf16>
    %139 = vector.extract_strided_slice %127 {offsets = [1, 2, 0], sizes = [16, 16, 16], strides = [1, 1, 1]} : vector<18x18x16xbf16> to vector<16x16x16xbf16>
    %140 = vector.extract_strided_slice %122 {offsets = [2, 0, 0], sizes = [16, 16, 32], strides = [1, 1, 1]} : vector<18x18x32xbf16> to vector<16x16x32xbf16>
    %141 = vector.extract_strided_slice %127 {offsets = [2, 0, 0], sizes = [16, 16, 16], strides = [1, 1, 1]} : vector<18x18x16xbf16> to vector<16x16x16xbf16>
    %142 = vector.extract_strided_slice %122 {offsets = [2, 1, 0], sizes = [16, 16, 32], strides = [1, 1, 1]} : vector<18x18x32xbf16> to vector<16x16x32xbf16>
    %143 = vector.extract_strided_slice %127 {offsets = [2, 1, 0], sizes = [16, 16, 16], strides = [1, 1, 1]} : vector<18x18x16xbf16> to vector<16x16x16xbf16>
    %144 = vector.extract_strided_slice %122 {offsets = [2, 2, 0], sizes = [16, 16, 32], strides = [1, 1, 1]} : vector<18x18x32xbf16> to vector<16x16x32xbf16>
    %145 = vector.extract_strided_slice %127 {offsets = [2, 2, 0], sizes = [16, 16, 16], strides = [1, 1, 1]} : vector<18x18x16xbf16> to vector<16x16x16xbf16>
    %146 = tpu.concatenate %128, %129, %130, %131, %132, %133, %134, %135, %136, %137, %138, %139, %140, %141, %142, %143 in 2 : vector<16x16x32xbf16>, vector<16x16x16xbf16>, vector<16x16x32xbf16>, vector<16x16x16xbf16>, vector<16x16x32xbf16>, vector<16x16x16xbf16>, vector<16x16x32xbf16>, vector<16x16x16xbf16>, vector<16x16x32xbf16>, vector<16x16x16xbf16>, vector<16x16x32xbf16>, vector<16x16x16xbf16>, vector<16x16x32xbf16>, vector<16x16x16xbf16>, vector<16x16x32xbf16>, vector<16x16x16xbf16> -> vector<16x16x384xbf16>
    %147 = tpu.concatenate %144, %145 in 2 : vector<16x16x32xbf16>, vector<16x16x16xbf16> -> vector<16x16x48xbf16>
    %148 = tpu.concatenate %146, %147 in 2 : vector<16x16x384xbf16>, vector<16x16x48xbf16> -> vector<16x16x432xbf16>
    %149 = vector.shape_cast %148 : vector<16x16x432xbf16> to vector<256x432xbf16>
    %c0_22 = arith.constant 0 : index
    %c0_23 = arith.constant 0 : index
    %150 = vector.load %arg6[%c0_22, %c0_23] : memref<432x16xbf16, #tpu.memory_space<vmem>>, vector<432x16xbf16>
    %cst_24 = arith.constant dense<0.000000e+00> : vector<256x16xf32>
    %151 = tpu.matmul %149, %150, %cst_24 {dimension_numbers = #tpu.dot_dimension_numbers<[1], [0], [0], [1], [0, 0, 1, 1], [], []>} : vector<256x432xbf16>, vector<432x16xbf16>, vector<256x16xf32> -> vector<256x16xf32>
    %c0_25 = arith.constant 0 : index
    %c0_26 = arith.constant 0 : index
    %152 = vector.load %arg7[%c0_25, %c0_26] : memref<1x16xf32, #tpu.memory_space<vmem>>, vector<1x16xf32>
    %153 = vector.broadcast %152 : vector<1x16xf32> to vector<256x16xf32>
    %154 = arith.addf %151, %153 : vector<256x16xf32>
    %cst_27 = arith.constant 0.000000e+00 : f32
    %155 = vector.broadcast %cst_27 : f32 to vector<256x16xf32>
    %156 = arith.maximumf %154, %155 : vector<256x16xf32>
    %c0_28 = arith.constant 0 : index
    %c0_29 = arith.constant 0 : index
    %157 = vector.load %arg8[%c0_28, %c0_29] : memref<4x16xf32, #tpu.memory_space<vmem>>, vector<4x16xf32>
    %cst_30 = arith.constant dense<0.000000e+00> : vector<4x256xf32>
    %158 = tpu.matmul %157, %156, %cst_30 {dimension_numbers = #tpu.dot_dimension_numbers<[1], [1], [0], [0], [0, 0, 1, 0], [], []>} : vector<4x16xf32>, vector<256x16xf32>, vector<4x256xf32> -> vector<4x256xf32>
    %c0_31 = arith.constant 0 : index
    %c0_32 = arith.constant 0 : index
    %159 = vector.load %arg9[%c0_31, %c0_32] : memref<4x1xf32, #tpu.memory_space<vmem>>, vector<4x1xf32>
    %160 = vector.broadcast %159 : vector<4x1xf32> to vector<4x256xf32>
    %161 = arith.addf %158, %160 : vector<4x256xf32>
    %c0_33 = arith.constant 0 : index
    %c0_34 = arith.constant 0 : index
    %c0_35 = arith.constant 0 : index
    %162 = vector.load %arg10[%c0_33, %c0_34, %c0_35] : memref<1x4x256xf32, #tpu.memory_space<vmem>>, vector<1x4x256xf32>
    %163 = vector.shape_cast %162 : vector<1x4x256xf32> to vector<4x256xf32>
    %164 = vector.shape_cast %161 : vector<4x256xf32> to vector<1x4x256xf32>
    tpu.vector_store %arg10[%c0_33, %c0_34, %c0_35], %164 {strides = array<i32>} : memref<1x4x256xf32, #tpu.memory_space<vmem>>, vector<1x4x256xf32>,
    return
  }
  func.func @transform_0(%arg0: i32) -> (i32, i32, i32, i32) {
    %c0_i32 = arith.constant 0 : i32
    %c0_i32_0 = arith.constant 0 : i32
    %c0_i32_1 = arith.constant 0 : i32
    %c0_i32_2 = arith.constant 0 : i32
    return %arg0, %c0_i32, %c0_i32_0, %c0_i32_1 : i32, i32, i32, i32
  }
  func.func @transform_1(%arg0: i32) -> (i32, i32) {
    %c0_i32 = arith.constant 0 : i32
    %c0_i32_0 = arith.constant 0 : i32
    %c0_i32_1 = arith.constant 0 : i32
    return %c0_i32, %c0_i32_0 : i32, i32
  }
  func.func @transform_2(%arg0: i32) -> (i32, i32) {
    %c0_i32 = arith.constant 0 : i32
    %c0_i32_0 = arith.constant 0 : i32
    %c0_i32_1 = arith.constant 0 : i32
    return %c0_i32, %c0_i32_0 : i32, i32
  }
  func.func @transform_3(%arg0: i32) -> (i32, i32) {
    %c0_i32 = arith.constant 0 : i32
    %c0_i32_0 = arith.constant 0 : i32
    %c0_i32_1 = arith.constant 0 : i32
    return %c0_i32, %c0_i32_0 : i32, i32
  }
  func.func @transform_4(%arg0: i32) -> (i32, i32) {
    %c0_i32 = arith.constant 0 : i32
    %c0_i32_0 = arith.constant 0 : i32
    %c0_i32_1 = arith.constant 0 : i32
    return %c0_i32, %c0_i32_0 : i32, i32
  }
  func.func @transform_5(%arg0: i32) -> (i32, i32) {
    %c0_i32 = arith.constant 0 : i32
    %c0_i32_0 = arith.constant 0 : i32
    %c0_i32_1 = arith.constant 0 : i32
    return %c0_i32, %c0_i32_0 : i32, i32
  }
  func.func @transform_6(%arg0: i32) -> (i32, i32) {
    %c0_i32 = arith.constant 0 : i32
    %c0_i32_0 = arith.constant 0 : i32
    %c0_i32_1 = arith.constant 0 : i32
    return %c0_i32, %c0_i32_0 : i32, i32
  }
  func.func @transform_7(%arg0: i32) -> (i32, i32) {
    %c0_i32 = arith.constant 0 : i32
    %c0_i32_0 = arith.constant 0 : i32
    %c0_i32_1 = arith.constant 0 : i32
    return %c0_i32, %c0_i32_0 : i32, i32
  }
  func.func @transform_8(%arg0: i32) -> (i32, i32) {
    %c0_i32 = arith.constant 0 : i32
    %c0_i32_0 = arith.constant 0 : i32
    %c0_i32_1 = arith.constant 0 : i32
    return %c0_i32, %c0_i32_0 : i32, i32
  }
  func.func @transform_9(%arg0: i32) -> (i32, i32, i32) {
    %c0_i32 = arith.constant 0 : i32
    %c0_i32_0 = arith.constant 0 : i32
    %c0_i32_1 = arith.constant 0 : i32
    return %arg0, %c0_i32, %c0_i32_0 : i32, i32, i32
  }
}

</mosaic_0001>

<bundles_post_ra>
// kernel: segmentation_model_forward.1
= control target key start
LH: loop header
LB: loop body
LE: loop exit
PB: predicated region body
PF: predicated region fallthrough
CT: control target
= control target key end

     0   :  { %s5930_s30 = smov 0   ;;  %s8907_s0 = inlined_call_operand.vmem [shape: f32[2,16,16,3], index: 0, kind: input, shape index: {}]   ;;  %s8908_s1 = inlined_call_operand.vmem [shape: bf16[27,16], index: 1, kind: input, shape index: {}]   ;;  %s8909_s2 = inlined_call_operand.vmem [shape: f32[1,16], index: 2, kind: input, shape index: {}]   ;;  %s8910_s3 = inlined_call_operand.vmem [shape: bf16[144,32], index: 3, kind: input, shape index: {}]   ;;  %s8911_s4 = inlined_call_operand.vmem [shape: f32[1,32], index: 4, kind: input, shape index: {}]   ;;  %s8912_s5 = inlined_call_operand.vmem [shape: bf16[432,16], index: 5, kind: input, shape index: {}]   ;;  %s8913_s6 = inlined_call_operand.vmem [shape: f32[1,16], index: 6, kind: input, shape index: {}]   ;;  %s8914_s7 = inlined_call_operand.vmem [shape: f32[4,16], index: 7, kind: input, shape index: {}]   ;;  %s8915_s8 = inlined_call_operand.vmem [shape: f32[4,1], index: 8, kind: input, shape index: {}]   ;;  %s8916_s9 = inlined_call_operand.vmem [shape: f32[2,4,256], index: 9, kind: output, shape index: {}]  }
   0x1 LB: > { %s5407_s10 = sadd.s32 4294967295, %s5860_s30   ;;  %p5411_p0 = scmp.ge.s32.totalorder %s5860_s30, 1  ;;  %s5860_s30 = sphi %s5930_s30, %s19_s30  }
   0x2   : > { %p287_p1 = scmp.lt.s32.totalorder %s5860_s30, 3 }
   0x4   : > { %p288_p2 = pnand %p5411_p0, %p287_p1 }
   0x6   : > { %291 = sbr.rel (%p288_p2) target bundleno = 1612 (0x64c), region = 56 }
   0xd   : > { %vm399_vm0 = vcmask 1040384   ;;  %p323_p3 = scmp.lt.s32.totalorder %s5407_s10, 1  ;;  %v5862_v0 = vmov 0.0   ;;  %vm825_vm1 = vcmask 1046528   ;;  %vm568_vm2 = vsmask.f32 7424 }
   0xe   : > { %v400_v1 = vrot.slane %v5862_v0, 7  ;;  %s5863_s15 = smov 6   ;;  %s5864_s16 = smov 9   ;;  %vm1434_vm3 = vcmask 1044480   ;;  %vm1435_vm4 = vcmask 1045504   ;;  %vm1115_vm5 = vcmask 23552  }
   0xf   : > { %s9245_s10 = smov (!%p323_p3, %s5407_s10), 1  ;;  %s5865_s17 = smov 3   ;;  %vm1148_vm6 = vcmask 48128   ;;  %vm1181_vm7 = vcmask 72704   ;;  %vm1214_vm8 = vcmask 97280   ;;  %vm1247_vm9 = vcmask 121856  }
  0x10   : > { %v500_v2 = vsel %vm399_vm0, 0.0, %v400_v1  ;;  %v517_v3 = vsel %vm399_vm0, %v400_v1, 0.0  ;;  %s5536_s11 = sshll.u32 %s9245_s10, 8  ;;  %s5866_s18 = smov 15   ;;  %vm1280_vm10 = vcmask 146432   ;;  %vm1346_vm11 = vcmask 195584  }
  0x11   : > { %v5942_v4 = vpack.c.bf16 %v400_v1, %v500_v2  ;;  %v5944_v5 = vpack.c.bf16 %v517_v3, %v517_v3  ;;  %v5946_v6 = vpack.c.bf16 %v517_v3, %v500_v2  ;;  %s5952_s14 = scalar_lea.vmem %s8907_s0, %s5536_s11  ;;  %s5867_s21 = smov 12   ;;  %vm1313_vm12 = vcmask 171008  }
  0x12   : > { %v334_v9 = vld [vmem:[%s5952_s14] sm:$0xff]  ;;  %v335_v10 = vld [vmem:[%s5952_s14 + $0x8] sm:$0xff]  ;;  %v336_v11 = vld [vmem:[%s5952_s14 + $0x10] sm:$0xff]  ;;  %s5868_s22 = smov 18   ;;  %s5869_s23 = smov 21   ;;  %vm1401_vm13 = vcmask 220160  }
  0x13   : > { %8973 = vst [vmem:[#allocation2_spill] sm:$0xff] %v5942_v4  ;;  %8974 = vst [vmem:[#allocation3_spill] sm:$0xff] %v5944_v5  ;;  %v826_v7 = vrot.slane %v5942_v4, 1  ;;  %v827_v8 = vrot.slane %v5944_v5, 1  ;;  %v570_v12 = vshrl.u32 %v5942_v4, 16  ;;  %v402_v13 = vrot.slane %v334_v9, 7 }
  0x14   : > { %v403_v14 = vrot.slane %v335_v10, 7  ;;  %v337_v15 = vld [vmem:[%s5952_s14 + $0x18] sm:$0xff]  ;;  %v405_v16 = vrot.slane %v336_v11, 7  ;;  %v572_v17 = vshll.u32 %v5942_v4, 16  ;;  %v338_v18 = vld [vmem:[%s5952_s14 + $0x20] sm:$0xff]  ;;  %v577_v21 = vshll.u32 %v5944_v5, 16 }
  0x15   : > { %v5964_v19 = vsel %vm825_vm1, %v826_v7, %v827_v8  ;;  %v406_v20 = vrot.slane %v337_v15, 7  ;;  %v408_v22 = vrot.slane %v338_v18, 7  ;;  %v501_v24 = vsel %vm399_vm0, 0.0, %v402_v13  ;;  %v339_v39 = vld [vmem:[%s5952_s14 + $0x28] sm:$0xff]  ;;  %v5814_v7 = vld [vmem:[%s8908_s1] sm:$0xff]   ;;  %v340_v8 = vld [vmem:[%s5952_s14 + $0x30] sm:$0xff] }
  0x16   : > { %8975 = vst [vmem:[#allocation4_spill] sm:$0xff] %v5964_v19  ;;  %874 = vrot.lane.b32.xlu1 %v5964_v19, %s5863_s15  ;;  %v404_v23 = vsel %vm399_vm0, %v402_v13, %v403_v14  ;;  %v502_v25 = vsel %vm399_vm0, 0.0, %v405_v16  ;;  %v574_v26 = vrot.slane %v572_v17, 1  ;;  %v579_v29 = vrot.slane %v577_v21, 1  ;;  %v341_v9 = vld [vmem:[%s5952_s14 + $0x38] sm:$0xff]  ;;  %5702 = vmatprep.subr.bf16.mxu0 %v5814_v7  ;;  %v343_v21 = vld [vmem:[%s5952_s14 + $0x48] sm:$0xff] }
  0x17   : > { %v5972_v27 = vpack.c.bf16 %v404_v23, %v501_v24  ;;  %v407_v28 = vsel %vm399_vm0, %v405_v16, %v406_v20  ;;  %v518_v30 = vsel %vm399_vm0, %v403_v14, 0.0  ;;  %v519_v34 = vsel %vm399_vm0, %v406_v20, 0.0  ;;  %5703 = vmatpush3.bf16.msra.mxu0 %v5814_v7  ;;  %v342_v20 = vld [vmem:[%s5952_s14 + $0x40] sm:$0xff]  ;;  %s5870_s24 = smov 24   ;;  %v347_v7 = vld [vmem:[%s5952_s14 + $0x68] sm:$0xff]  ;;  %s5872_s27 = smov 96  }
  0x18   : > { %v5976_v31 = vpack.c.bf16 %v407_v28, %v502_v25  ;;  %v575_v32 = vor.u32 %v574_v26, %v570_v12  ;;  %v537_v33 = vpack.c.bf16 %v518_v30, %v518_v30  ;;  %v539_v36 = vpack.c.bf16 %v519_v34, %v519_v34  ;;  %s5873_s28 = smov 16   ;;  %s5874_s29 = smov 112  }
  0x19   : > { %907 = vrot.lane.b32.xlu0 %v5972_v27, %s5864_s16  ;;  %v829_v35 = vrot.slane %v5972_v27, 1  ;;  %v582_v37 = vshrl.u32 %v5972_v27, 16  ;;  %v584_v38 = vshll.u32 %v5972_v27, 16  ;;  %v409_v51 = vrot.slane %v339_v39, 7  ;;  %s5875_s11 = smov 32   ;;  %s5876_s12 = smov 48  }
  0x1a   : > { %909 = vrot.lane.b32.xlu1 %v5976_v31, %s5864_s16  ;;  %v5988_v40 = vsel %vm568_vm2, %v575_v32, %v579_v29  ;;  %v830_v41 = vrot.slane %v537_v33, 1  ;;  %v832_v42 = vrot.slane %v5976_v31, 1  ;;  %v589_v43 = vshll.u32 %v537_v33, 16  ;;  %s5877_s13 = smov 80  }
  0x1b   : > { %8976 = vst [vmem:[#allocation5_spill] sm:$0xff] %v5988_v40  ;;  %v833_v44 = vrot.slane %v539_v36, 1  ;;  %v586_v45 = vrot.slane %v584_v38, 1  ;;  %v594_v46 = vshrl.u32 %v5976_v31, 16  ;;  %v596_v47 = vshll.u32 %v5976_v31, 16 }
  0x1c   : > { %v831_v48 = vsel %vm825_vm1, %v829_v35, %v830_v41  ;;  %v591_v49 = vrot.slane %v589_v43, 1  ;;  %v601_v50 = vshll.u32 %v539_v36, 16  ;;  %v503_v53 = vsel %vm399_vm0, 0.0, %v408_v22 }
  0x1d   : > { %761 = vrot.lane.b32.xlu0 %v5988_v40, %s5865_s17  ;;  %v598_v52 = vrot.slane %v596_v47, 1  ;;  %v587_v54 = vor.u32 %v586_v45, %v582_v37  ;;  %v410_v56 = vsel %vm399_vm0, %v408_v22, %v409_v51  ;;  %v520_v57 = vsel %vm399_vm0, %v409_v51, 0.0 }
  0x1e   : > { %876 = vrot.lane.b32.xlu1 %v831_v48, %s5863_s15  ;;  %v603_v55 = vrot.slane %v601_v50, 1  ;;  %v834_v58 = vsel %vm825_vm1, %v832_v42, %v833_v44  ;;  %v6001_v60 = vpack.c.bf16 %v410_v56, %v503_v53  ;;  %v541_v61 = vpack.c.bf16 %v520_v57, %v520_v57  ;;  %v5815_v42 = vld [vmem:[%s8908_s1 + $0x8] sm:$0x3f]   ;;  %v345_v56 = vld [vmem:[%s5952_s14 + $0x58] sm:$0xff] }
  0x1f   : > { %v599_v59 = vor.u32 %v598_v52, %v594_v46  ;;  %v592_v63 = vsel %vm568_vm2, %v587_v54, %v591_v49  ;;  %v411_v12 = vrot.slane %v340_v8, 7  ;;  %v412_v13 = vrot.slane %v341_v9, 7 }
  0x20   : > { %v608_v62 = vshll.u32 %v6001_v60, 16  ;;  %v606_v1 = vshrl.u32 %v6001_v60, 16  ;;  %v613_v3 = vshll.u32 %v541_v61, 16  ;;  %v835_v22 = vrot.slane %v6001_v60, 1 }
  0x21   : > { %987 = vrot.lane.b32.xlu0 %v831_v48, %s5866_s18  ;;  %v604_v0 = vsel %vm568_vm2, %v599_v59, %v603_v55  ;;  %v413_v15 = vsel %vm399_vm0, %v411_v12, %v412_v13  ;;  %v504_v16 = vsel %vm399_vm0, 0.0, %v411_v12  ;;  %v521_v18 = vsel %vm399_vm0, %v412_v13, 0.0  ;;  %v344_v55 = vld [vmem:[%s5952_s14 + $0x50] sm:$0xff] }
  0x22   : > { %989 = vrot.lane.b32.xlu1 %v834_v58, %s5866_s18  ;;  %v610_v2 = vrot.slane %v608_v62, 1  ;;  %v615_v11 = vrot.slane %v613_v3, 1  ;;  %v6025_v17 = vpack.c.bf16 %v413_v15, %v504_v16  ;;  %v836_v23 = vrot.slane %v541_v61, 1  ;;  %v346_v3 = vld [vmem:[%s5952_s14 + $0x60] sm:$0xff] }
  0x23   : > { %v543_v24 = vpack.c.bf16 %v521_v18, %v521_v18  ;;  %v414_v26 = vrot.slane %v342_v20, 7  ;;  %v415_v28 = vrot.slane %v343_v21, 7  ;;  %v5871_v47 = vmov 65535  }
  0x24   : > { %v611_v10 = vor.u32 %v610_v2, %v606_v1  ;;  %v620_v25 = vshll.u32 %v6025_v17, 16  ;;  %v837_v29 = vsel %vm825_vm1, %v835_v22, %v836_v23  ;;  %v618_v30 = vshrl.u32 %v6025_v17, 16 }
  0x25   : > { %763 = vrot.lane.b32.xlu0 %v592_v63, %s5865_s17  ;;  %v625_v33 = vshll.u32 %v543_v24, 16  ;;  %v505_v34 = vsel %vm399_vm0, 0.0, %v414_v26  ;;  %v416_v35 = vsel %vm399_vm0, %v414_v26, %v415_v28  ;;  %v522_v39 = vsel %vm399_vm0, %v415_v28, 0.0 }
  0x26   : > { %953 = vrot.lane.b32.xlu1 %v604_v0, %s5867_s21  ;;  %v616_v14 = vsel %vm568_vm2, %v611_v10, %v615_v11  ;;  %v622_v32 = vrot.slane %v620_v25, 1  ;;  %v6042_v38 = vpack.c.bf16 %v416_v35, %v505_v34  ;;  %v838_v41 = vrot.slane %v6025_v17, 1 }
  0x27   : > { %v627_v37 = vrot.slane %v625_v33, 1  ;;  %v839_v43 = vrot.slane %v543_v24, 1  ;;  %v545_v44 = vpack.c.bf16 %v522_v39, %v522_v39  ;;  %v1436_v48 = vsel %vm1434_vm3, 4294967295, %v5871_v47  ;;  %v349_v39 = vld [vmem:[%s5952_s14 + $0x78] sm:$0xff] }
  0x28   : > { %v623_v36 = vor.u32 %v622_v32, %v618_v30  ;;  %v632_v46 = vshll.u32 %v6042_v38, 16  ;;  %v630_v49 = vshrl.u32 %v6042_v38, 16  ;;  %v1437_v50 = vsel %vm1435_vm4, %v1436_v48, 0 }
  0x29   : > { %951 = vrot.lane.b32.xlu0 %v592_v63, %s5867_s21  ;;  %v840_v51 = vsel %vm825_vm1, %v838_v41, %v839_v43  ;;  %v637_v53 = vshll.u32 %v545_v44, 16  ;;  %v1439_v54 = vand.u32 %v5815_v42, %v1437_v50  ;;  %v417_v59 = vrot.slane %v344_v55, 7 }
  0x2a   : > { %1021 = vrot.lane.b32.xlu1 %v6001_v60, %s5868_s22  ;;  %v628_v45 = vsel %vm568_vm2, %v623_v36, %v627_v37  ;;  %v634_v52 = vrot.slane %v632_v46, 1  ;;  %v418_v61 = vrot.slane %v345_v56, 7  ;;  %v841_v8 = vrot.slane %v6042_v38, 1  ;;  %v348_v37 = vld [vmem:[%s5952_s14 + $0x70] sm:$0xff] }
  0x2b   : > { %5704 = vmatprep.subr.bf16.mxu0 %v1439_v54  ;;  %v842_v9 = vrot.slane %v545_v44, 1  ;;  %v420_v12 = vrot.slane %v346_v3, 7  ;;  %v421_v13 = vrot.slane %v347_v7, 7  ;;  %v423_v43 = vrot.slane %v348_v37, 7 }
  0x2c   : > { %5705 = vmatpush3.bf16.msra.mxu0 %v1439_v54  ;;  %v635_v57 = vor.u32 %v634_v52, %v630_v49  ;;  %v419_v63 = vsel %vm399_vm0, %v417_v59, %v418_v61  ;;  %v523_v2 = vsel %vm399_vm0, %v418_v61, 0.0  ;;  %v424_v44 = vrot.slane %v349_v39, 7  ;;  %v351_v54 = vld [vmem:[%s5952_s14 + $0x88] sm:$0xff] }
  0x2d   : > { %1019 = vrot.lane.b32.xlu0 %v5976_v31, %s5868_s22  ;;  %v547_v10 = vpack.c.bf16 %v523_v2, %v523_v2  ;;  %v422_v20 = vsel %vm399_vm0, %v420_v12, %v421_v13  ;;  %v507_v21 = vsel %vm399_vm0, 0.0, %v420_v12  ;;  %v524_v25 = vsel %vm399_vm0, %v421_v13, 0.0 }
  0x2e   : > { %1053 = vrot.lane.b32.xlu1 %v616_v14, %s5869_s23  ;;  %v6091_v24 = vpack.c.bf16 %v422_v20, %v507_v21  ;;  %v549_v30 = vpack.c.bf16 %v524_v25, %v524_v25  ;;  %v425_v48 = vsel %vm399_vm0, %v423_v43, %v424_v44  ;;  %v508_v49 = vsel %vm399_vm0, 0.0, %v423_v43  ;;  %v352_v20 = vld [vmem:[%s5952_s14 + $0x90] sm:$0xff]  ;;  %v353_v21 = vld [vmem:[%s5952_s14 + $0x98] sm:$0xff] }
  0x2f   : > { %v649_v18 = vshll.u32 %v547_v10, 16  ;;  %v525_v52 = vsel %vm399_vm0, %v424_v44, 0.0  ;;  %vm2034_vm14 = vcmask 1041408   ;;  %vm2051_vm15 = vcmask 1042432  }
  0x30   : > { %v656_v32 = vshll.u32 %v6091_v24, 16  ;;  %v654_v34 = vshrl.u32 %v6091_v24, 16  ;;  %v661_v36 = vshll.u32 %v549_v30, 16  ;;  %v847_v46 = vrot.slane %v6091_v24, 1 }
  0x31   : > { %1051 = vrot.lane.b32.xlu0 %v604_v0, %s5869_s23  ;;  %v651_v23 = vrot.slane %v649_v18, 1  ;;  %v848_v47 = vrot.slane %v549_v30, 1  ;;  %v551_v55 = vpack.c.bf16 %v525_v52, %v525_v52 }
  0x32   : > { %765 = vrot.lane.b32.xlu1 %v604_v0, %s5865_s17  ;;  %v506_v0 = vsel %vm399_vm0, 0.0, %v417_v59  ;;  %v658_v35 = vrot.slane %v656_v32, 1  ;;  %v663_v42 = vrot.slane %v661_v36, 1 }
  0x33   : > { %v6074_v1 = vpack.c.bf16 %v419_v63, %v506_v0  ;;  %v849_v50 = vsel %vm825_vm1, %v847_v46, %v848_v47 }
  0x34   : > { %v659_v41 = vor.u32 %v658_v35, %v654_v34 }
  0x35   : > { %1083 = vrot.lane.b32.xlu0 %v834_v58, %s5870_s24  ;;  %v644_v11 = vshll.u32 %v6074_v1, 16  ;;  %v642_v15 = vshrl.u32 %v6074_v1, 16  ;;  %v844_v26 = vrot.slane %v6074_v1, 1 }
  0x36   : > { %767 = vrot.lane.b32.xlu1 %v616_v14, %s5865_s17 }
  0x37   : > { %v646_v16 = vrot.slane %v644_v11, 1  ;;  %v851_v11 = vrot.slane %v551_v55, 1 }
  0x39   : > { %1085 = vrot.lane.b32.xlu0 %v837_v29, %s5870_s24  ;;  %v647_v22 = vor.u32 %v646_v16, %v642_v15 }
  0x3a   : > { %880 = vrot.lane.b32.xlu1 %v837_v29, %s5863_s15 }
  0x3b   : > { %v652_v28 = vsel %vm568_vm2, %v647_v22, %v651_v23 }
  0x3d   : > { %878 = vrot.lane.b32.xlu0 %v834_v58, %s5863_s15  ;;  %v639_v58 = vrot.slane %v637_v53, 1  ;;  %v350_v53 = vld [vmem:[%s5952_s14 + $0x80] sm:$0xff] }
  0x3e   : > { %913 = vrot.lane.b32.xlu1 %v6025_v17, %s5864_s16 }
  0x3f   : > { %v640_v62 = vsel %vm568_vm2, %v635_v57, %v639_v58  ;;  %v426_v57 = vrot.slane %v350_v53, 7  ;;  %v427_v58 = vrot.slane %v351_v54, 7 }
  0x41   : > { %911 = vrot.lane.b32.xlu0 %v6001_v60, %s5864_s16  ;;  %v428_v63 = vsel %vm399_vm0, %v426_v57, %v427_v58  ;;  %v509_v0 = vsel %vm399_vm0, 0.0, %v426_v57 }
  0x42   : > { %957 = vrot.lane.b32.xlu1 %v628_v45, %s5867_s21  ;;  %v6135_v7 = vpack.c.bf16 %v428_v63, %v509_v0 }
  0x44   : > { %v680_v13 = vshll.u32 %v6135_v7, 16  ;;  %v678_v15 = vshrl.u32 %v6135_v7, 16  ;;  %v853_v43 = vrot.slane %v6135_v7, 1 }
  0x45   : > { %955 = vrot.lane.b32.xlu0 %v616_v14, %s5867_s21  ;;  %v843_v14 = vsel %vm825_vm1, %v841_v8, %v842_v9  ;;  %v526_v8 = vsel %vm399_vm0, %v427_v58, 0.0 }
  0x46   : > { %993 = vrot.lane.b32.xlu1 %v840_v51, %s5866_s18  ;;  %v553_v12 = vpack.c.bf16 %v526_v8, %v526_v8  ;;  %v682_v16 = vrot.slane %v680_v13, 1 }
  0x48   : > { %v685_v18 = vshll.u32 %v553_v12, 16  ;;  %v683_v22 = vor.u32 %v682_v16, %v678_v15  ;;  %v854_v44 = vrot.slane %v553_v12, 1 }
  0x49   : > { %991 = vrot.lane.b32.xlu0 %v837_v29, %s5866_s18  ;;  %v845_v29 = vrot.slane %v547_v10, 1 }
  0x4a   : > { %1025 = vrot.lane.b32.xlu1 %v6042_v38, %s5868_s22  ;;  %v687_v23 = vrot.slane %v685_v18, 1  ;;  %v6178_v52 = vsel %vm825_vm1, %v853_v43, %v854_v44 }
  0x4b   : > { %v846_v33 = vsel %vm825_vm1, %v844_v26, %v845_v29  ;;  %v429_v26 = vrot.slane %v352_v20, 7 }
  0x4c   : > { %v6157_v30 = vsel %vm568_vm2, %v683_v22, %v687_v23 }
  0x4d   : > { %1023 = vrot.lane.b32.xlu0 %v6025_v17, %s5868_s22  ;;  %v510_v34 = vsel %vm399_vm0, 0.0, %v429_v26 }
  0x4e   : > { %1057 = vrot.lane.b32.xlu1 %v640_v62, %s5869_s23 }
  0x51   : > { %1055 = vrot.lane.b32.xlu0 %v628_v45, %s5869_s23 }
  0x52   : > { %769 = vrot.lane.b32.xlu1 %v628_v45, %s5865_s17  ;;  %v664_v45 = vsel %vm568_vm2, %v659_v41, %v663_v42  ;;  %v354_v41 = vld [vmem:[%s5952_s14 + $0xa0] sm:$0xff]  ;;  %v355_v42 = vld [vmem:[%s5952_s14 + $0xa8] sm:$0xff] }
  0x55   : > { %1087 = vrot.lane.b32.xlu0 %v840_v51, %s5870_s24 }
  0x56   : > { %771 = vrot.lane.b32.xlu1 %v640_v62, %s5865_s17 }
  0x59   : > { %1089 = vrot.lane.b32.xlu0 %v843_v14, %s5870_s24 }
  0x5a   : > { %884 = vrot.lane.b32.xlu1 %v843_v14, %s5863_s15 }
  0x5d   : > { %882 = vrot.lane.b32.xlu0 %v840_v51, %s5863_s15  ;;  %v6120_v51 = vpack.c.bf16 %v425_v48, %v508_v49  ;;  %v432_v49 = vrot.slane %v354_v41, 7 }
  0x5e   : > { %917 = vrot.lane.b32.xlu1 %v6074_v1, %s5864_s16 }
  0x5f   : > { %v668_v56 = vshll.u32 %v6120_v51, 16  ;;  %v666_v59 = vshrl.u32 %v6120_v51, 16  ;;  %v850_v9 = vrot.slane %v6120_v51, 1 }
  0x61   : > { %915 = vrot.lane.b32.xlu0 %v6042_v38, %s5864_s16  ;;  %v670_v61 = vrot.slane %v668_v56, 1 }
  0x62   : > { %961 = vrot.lane.b32.xlu1 %v652_v28, %s5867_s21 }
  0x63   : > { %v671_v2 = vor.u32 %v670_v61, %v666_v59  ;;  %v511_v59 = vsel %vm399_vm0, 0.0, %v432_v49 }
  0x65   : > { %959 = vrot.lane.b32.xlu0 %v640_v62, %s5867_s21  ;;  %v673_v62 = vshll.u32 %v551_v55, 16 }
  0x66   : > { %997 = vrot.lane.b32.xlu1 %v846_v33, %s5866_s18 }
  0x67   : > { %v675_v3 = vrot.slane %v673_v62, 1 }
  0x69   : > { %995 = vrot.lane.b32.xlu0 %v843_v14, %s5866_s18  ;;  %v676_v10 = vsel %vm568_vm2, %v671_v2, %v675_v3  ;;  %v852_v14 = vsel %vm825_vm1, %v850_v9, %v851_v11 }
  0x6a   : > { %1029 = vrot.lane.b32.xlu1 %v6091_v24, %s5868_s22 }
  0x6d   : > { %1027 = vrot.lane.b32.xlu0 %v6074_v1, %s5868_s22 }
  0x6e   : > { %1061 = vrot.lane.b32.xlu1 %v664_v45, %s5869_s23 }
  0x71   : > { %1059 = vrot.lane.b32.xlu0 %v652_v28, %s5869_s23 }
  0x72   : > { %1093 = vrot.lane.b32.xlu1 %v849_v50, %s5870_s24 }
  0x75   : > { %1091 = vrot.lane.b32.xlu0 %v846_v33, %s5870_s24 }
  0x76   : > { %775 = vrot.lane.b32.xlu1 %v664_v45, %s5865_s17 }
  0x79   : > { %773 = vrot.lane.b32.xlu0 %v652_v28, %s5865_s17  ;;  %v430_v28 = vrot.slane %v353_v21, 7 }
  0x7a   : > { %888 = vrot.lane.b32.xlu1 %v849_v50, %s5863_s15 }
  0x7b   : > { %v527_v37 = vsel %vm399_vm0, %v430_v28, 0.0 }
  0x7d   : > { %886 = vrot.lane.b32.xlu0 %v846_v33, %s5863_s15  ;;  %v431_v33 = vsel %vm399_vm0, %v429_v26, %v430_v28 }
  0x7e   : > { %921 = vrot.lane.b32.xlu1 %v6120_v51, %s5864_s16  ;;  %v6165_v36 = vpack.c.bf16 %v431_v33, %v510_v34 }
  0x80   : > { %v692_v47 = vshll.u32 %v6165_v36, 16  ;;  %v690_v55 = vshrl.u32 %v6165_v36, 16 }
  0x81   : > { %919 = vrot.lane.b32.xlu0 %v6091_v24, %s5864_s16 }
  0x82   : > { %965 = vrot.lane.b32.xlu1 %v676_v10, %s5867_s21  ;;  %v694_v56 = vrot.slane %v692_v47, 1 }
  0x84   : > { %v695_v2 = vor.u32 %v694_v56, %v690_v55 }
  0x85   : > { %963 = vrot.lane.b32.xlu0 %v664_v45, %s5867_s21  ;;  %v555_v45 = vpack.c.bf16 %v527_v37, %v527_v37  ;;  %v357_v37 = vld [vmem:[%s5952_s14 + $0xb8] sm:$0xff] }
  0x86   : > { %1001 = vrot.lane.b32.xlu1 %v852_v14, %s5866_s18 }
  0x87   : > { %v697_v53 = vshll.u32 %v555_v45, 16  ;;  %v857_v15 = vrot.slane %v555_v45, 1 }
  0x88   : > { %v875_v25 = vpop.permute.xlu1 %874 }
  0x89   : > { %999 = vrot.lane.b32.xlu0 %v849_v50, %s5866_s18  ;;  %v433_v50 = vrot.slane %v355_v42, 7  ;;  %v699_v61 = vrot.slane %v697_v53, 1 }
  0x8a   : > { %1033 = vrot.lane.b32.xlu1 %v6135_v7, %s5868_s22 }
  0x8b   : > { %v908_v29 = vpop.permute.xlu0 %907  ;;  %v434_v58 = vsel %vm399_vm0, %v432_v49, %v433_v50  ;;  %v528_v9 = vsel %vm399_vm0, %v433_v50, 0.0  ;;  %v6201_v13 = vsel %vm568_vm2, %v695_v2, %v699_v61  ;;  %v436_v49 = vrot.slane %v357_v37, 7 }
  0x8c   : > { %v910_v32 = vpop.permute.xlu1 %909  ;;  %v6191_v3 = vpack.c.bf16 %v434_v58, %v511_v59  ;;  %v557_v16 = vpack.c.bf16 %v528_v9, %v528_v9  ;;  %v359_v9 = vld [vmem:[%s5952_s14 + $0xc8] sm:$0xff] }
  0x8d   : > { %1031 = vrot.lane.b32.xlu0 %v6120_v51, %s5868_s22  ;;  %v529_v2 = vsel %vm399_vm0, %v436_v49, 0.0 }
  0x8e   : > { %1065 = vrot.lane.b32.xlu1 %v6157_v30, %s5869_s23  ;;  %v704_v18 = vshll.u32 %v6191_v3, 16  ;;  %v702_v26 = vshrl.u32 %v6191_v3, 16  ;;  %v859_v55 = vrot.slane %v6191_v3, 1  ;;  %v860_v56 = vrot.slane %v557_v16, 1 }
  0x8f   : > { %v762_v35 = vpop.permute.xlu0 %761 }
  0x90   : > { %v877_v39 = vpop.permute.xlu1 %876  ;;  %v1117_v62 = vsel %vm1115_vm5, %v5942_v4, %v762_v35  ;;  %v706_v28 = vrot.slane %v704_v18, 1  ;;  %v356_v35 = vld [vmem:[%s5952_s14 + $0xb0] sm:$0xff] }
  0x91   : > { %1063 = vrot.lane.b32.xlu0 %v676_v10, %s5869_s23  ;;  %v435_v47 = vrot.slane %v356_v35, 7 }
  0x92   : > { %777 = vrot.lane.b32.xlu1 %v676_v10, %s5865_s17  ;;  %v1150_v10 = vsel %vm1148_vm6, %v1117_v62, %v875_v25  ;;  %v707_v44 = vor.u32 %v706_v28, %v702_v26  ;;  %v6253_v62 = vsel %vm825_vm1, %v859_v55, %v860_v56 }
  0x93   : > { %v988_v46 = vpop.permute.xlu0 %987  ;;  %v1183_v21 = vsel %vm1181_vm7, %v1150_v10, %v908_v29  ;;  %v437_v58 = vsel %vm399_vm0, %v435_v47, %v436_v49  ;;  %v512_v59 = vsel %vm399_vm0, 0.0, %v435_v47 }
  0x94   : > { %v990_v48 = vpop.permute.xlu1 %989 }
  0x95   : > { %1095 = vrot.lane.b32.xlu0 %v852_v14, %s5870_s24 }
  0x96   : > { %779 = vrot.lane.b32.xlu1 %v6157_v30, %s5865_s17 }
  0x97   : > { %v764_v54 = vpop.permute.xlu0 %763 }
  0x98   : > { %v954_v57 = vpop.permute.xlu1 %953  ;;  %v1119_v63 = vsel %vm1115_vm5, %v5972_v27, %v764_v54  ;;  %v856_v27 = vrot.slane %v6165_v36, 1 }
  0x99   : > { %1097 = vrot.lane.b32.xlu0 %v6178_v52, %s5870_s24  ;;  %v1152_v11 = vsel %vm1148_vm6, %v1119_v63, %v877_v39  ;;  %v6255_v63 = vpack.c.bf16 %v437_v58, %v512_v59  ;;  %v360_v58 = vld [vmem:[%s5952_s14 + $0xd0] sm:$0xff]  ;;  %v361_v59 = vld [vmem:[%s5952_s14 + $0xd8] sm:$0xff] }
  0x9a   : > { %892 = vrot.lane.b32.xlu1 %v6178_v52, %s5863_s15  ;;  %v6212_v25 = vsel %vm825_vm1, %v856_v27, %v857_v15 }
  0x9b   : > { %v952_v0 = vpop.permute.xlu0 %951  ;;  %v716_v27 = vshll.u32 %v6255_v63, 16 }
  0x9c   : > { %v1022_v8 = vpop.permute.xlu1 %1021  ;;  %v1216_v22 = vsel %vm1214_vm8, %v1183_v21, %v952_v0 }
  0x9d   : > { %890 = vrot.lane.b32.xlu0 %v852_v14, %s5863_s15  ;;  %v1185_v14 = vsel %vm1181_vm7, %v1152_v11, %v910_v32  ;;  %v709_v32 = vshll.u32 %v557_v16, 16  ;;  %v1249_v34 = vsel %vm1247_vm9, %v1216_v22, %v988_v46  ;;  %v559_v11 = vpack.c.bf16 %v529_v2, %v529_v2 }
  0x9e   : > { %925 = vrot.lane.b32.xlu1 %v6165_v36, %s5864_s16  ;;  %v1218_v29 = vsel %vm1214_vm8, %v1185_v14, %v954_v57  ;;  %v439_v16 = vrot.slane %v359_v9, 7  ;;  %v718_v14 = vrot.slane %v716_v27, 1 }
  0x9f   : > { %v1020_v12 = vpop.permute.xlu0 %1019  ;;  %v1251_v41 = vsel %vm1247_vm9, %v1218_v29, %v990_v48  ;;  %v711_v45 = vrot.slane %v709_v32, 1  ;;  %v721_v21 = vshll.u32 %v559_v11, 16 }
  0xa0   : > { %v1054_v20 = vpop.permute.xlu1 %1053  ;;  %v1282_v39 = vsel %vm1280_vm10, %v1249_v34, %v1020_v12  ;;  %v1284_v50 = vsel %vm1280_vm10, %v1251_v41, %v1022_v8  ;;  %v358_v8 = vld [vmem:[%s5952_s14 + $0xc0] sm:$0xff]  ;;  %v530_v37 = vsel %vm399_vm0, %v439_v16, 0.0 }
  0xa1   : > { %923 = vrot.lane.b32.xlu0 %v6135_v7, %s5864_s16  ;;  %v1317_v48 = vsel %vm1313_vm12, %v1284_v50, %v1054_v20  ;;  %v6239_v54 = vsel %vm568_vm2, %v707_v44, %v711_v45  ;;  %v438_v15 = vrot.slane %v358_v8, 7  ;;  %v714_v20 = vshrl.u32 %v6255_v63, 16 }
  0xa2   : > { %969 = vrot.lane.b32.xlu1 %v6201_v13, %s5867_s21  ;;  %v723_v29 = vrot.slane %v721_v21, 1 }
  0xa3   : > { %v1052_v23 = vpop.permute.xlu0 %1051  ;;  %v513_v26 = vsel %vm399_vm0, 0.0, %v438_v15  ;;  %v719_v32 = vor.u32 %v718_v14, %v714_v20 }
  0xa4   : > { %v6216_v33 = vpop.permute.xlu1 %765  ;;  %v1315_v42 = vsel %vm1313_vm12, %v1282_v39, %v1052_v23  ;;  %v440_v23 = vsel %vm399_vm0, %v438_v15, %v439_v16  ;;  %v862_v39 = vrot.slane %v6255_v63, 1  ;;  %v441_v15 = vrot.slane %v360_v58, 7 }
  0xa5   : > { %967 = vrot.lane.b32.xlu0 %v6157_v30, %s5867_s21  ;;  %v6276_v34 = vpack.c.bf16 %v440_v23, %v513_v26  ;;  %v442_v16 = vrot.slane %v361_v59, 7 }
  0xa6   : > { %1005 = vrot.lane.b32.xlu1 %v6212_v25, %s5866_s18 }
  0xa7   : > { %v1084_v43 = vpop.permute.xlu0 %1083  ;;  %v728_v44 = vshll.u32 %v6276_v34, 16  ;;  %v726_v49 = vshrl.u32 %v6276_v34, 16 }
  0xa8   : > { %v6228_v46 = vpop.permute.xlu1 %767  ;;  %v1348_v30 = vsel %vm1346_vm11, %v1315_v42, %v1084_v43  ;;  %v724_v42 = vsel %vm568_vm2, %v719_v32, %v723_v29  ;;  %v6285_v43 = vpack.c.bf16 %v530_v37, %v530_v37  ;;  %v531_v32 = vsel %vm399_vm0, %v442_v16, 0.0  ;;  %v362_v29 = vld [vmem:[%s5952_s14 + $0xe0] sm:$0xff] }
  0xa9   : > { %1003 = vrot.lane.b32.xlu0 %v6178_v52, %s5866_s18  ;;  %5706 = vmatprep.mubr.msk.bf16.mxu0 %vm1401_vm13, %v1348_v30  ;;  %v1121_v30 = vsel %vm1115_vm5, %v5976_v31, %v6216_v33  ;;  %v1123_v50 = vsel %vm1115_vm5, %v6001_v60, %v6228_v46  ;;  %v730_v33 = vrot.slane %v728_v44, 1  ;;  %v865_v37 = vrot.slane %v6276_v34, 1 }
  0xaa   : > { %1037 = vrot.lane.b32.xlu1 %v6191_v3, %s5868_s22 }
  0xab   : > { %v1086_v53 = vpop.permute.xlu0 %1085  ;;  %v731_v9 = vor.u32 %v730_v33, %v726_v49 }
  0xac   : > { %v1350_v52 = vsel %vm1346_vm11, %v1317_v48, %v1086_v53  ;;  %v6243_v57 = vpop.permute.xlu1 %880  ;;  %v733_v53 = vshll.u32 %v6285_v43, 16 }
  0xad   : > { %1035 = vrot.lane.b32.xlu0 %v6165_v36, %s5868_s22  ;;  %5707 = vmatmul.mubr.msk.bf16.vlgmr.msra.gmra.mrb[0].mxu0 %vm1401_vm13, %v1350_v52  ;;  %v1156_v60 = vsel %vm1148_vm6, %v1123_v50, %v6243_v57 }
  0xae   : > { %1069 = vrot.lane.b32.xlu1 %v6239_v54, %s5869_s23 }
  0xaf   : > { %v879_v61 = vpop.permute.xlu0 %878 }
  0xb0   : > { %v914_v0 = vpop.permute.xlu1 %913 }
  0xb1   : > { %1067 = vrot.lane.b32.xlu0 %v6201_v13, %s5869_s23 }
  0xb2   : > { %1101 = vrot.lane.b32.xlu1 %v6253_v62, %s5870_s24 }
  0xb3   : > { %v912_v10 = vpop.permute.xlu0 %911 }
  0xb4   : > { %v958_v12 = vpop.permute.xlu1 %957 }
  0xb5   : > { %1099 = vrot.lane.b32.xlu0 %v6212_v25, %s5870_s24 }
  0xb6   : > { %783 = vrot.lane.b32.xlu1 %v6239_v54, %s5865_s17 }
  0xb7   : > { %v956_v18 = vpop.permute.xlu0 %955 }
  0xb8   : > { %v994_v22 = vpop.permute.xlu1 %993 }
  0xb9   : > { %781 = vrot.lane.b32.xlu0 %v6201_v13, %s5865_s17  ;;  %v863_v13 = vrot.slane %v559_v11, 1 }
  0xba   : > { %896 = vrot.lane.b32.xlu1 %v6253_v62, %s5863_s15 }
  0xbb   : > { %v992_v28 = vpop.permute.xlu0 %991  ;;  %v6296_v47 = vsel %vm825_vm1, %v862_v39, %v863_v13  ;;  %v866_v39 = vrot.slane %v6285_v43, 1 }
  0xbc   : > { %v1026_v35 = vpop.permute.xlu1 %1025 }
  0xbd   : > { %894 = vrot.lane.b32.xlu0 %v6212_v25, %s5863_s15  ;;  %v1154_v25 = vsel %vm1148_vm6, %v1121_v30, %v879_v61  ;;  %v1189_v61 = vsel %vm1181_vm7, %v1156_v60, %v914_v0  ;;  %v444_v30 = vrot.slane %v362_v29, 7  ;;  %v867_v49 = vsel %vm825_vm1, %v865_v37, %v866_v39  ;;  %v365_v29 = vld [vmem:[%s5952_s14 + $0xf8] sm:$0xff] }
  0xbe   : > { %929 = vrot.lane.b32.xlu1 %v6255_v63, %s5864_s16  ;;  %v1187_v48 = vsel %vm1181_vm7, %v1154_v25, %v912_v10  ;;  %v735_v10 = vrot.slane %v733_v53, 1  ;;  %v1222_v11 = vsel %vm1214_vm8, %v1189_v61, %v958_v12 }
  0xbf   : > { %v1024_v41 = vpop.permute.xlu0 %1023  ;;  %v1220_v55 = vsel %vm1214_vm8, %v1187_v48, %v956_v18  ;;  %v1255_v57 = vsel %vm1247_vm9, %v1222_v11, %v994_v22  ;;  %v514_v22 = vsel %vm399_vm0, 0.0, %v441_v15  ;;  %v515_v53 = vsel %vm399_vm0, 0.0, %v444_v30 }
  0xc0   : > { %v1058_v45 = vpop.permute.xlu1 %1057  ;;  %v1253_v52 = vsel %vm1247_vm9, %v1220_v55, %v992_v28  ;;  %v1288_v0 = vsel %vm1280_vm10, %v1255_v57, %v1026_v35  ;;  %v6330_v20 = vsel %vm568_vm2, %v731_v9, %v735_v10  ;;  %v363_v35 = vld [vmem:[%s5952_s14 + $0xe8] sm:$0xff] }
  0xc1   : > { %927 = vrot.lane.b32.xlu0 %v6191_v3, %s5864_s16  ;;  %v1286_v46 = vsel %vm1280_vm10, %v1253_v52, %v1024_v41  ;;  %v1321_v12 = vsel %vm1313_vm12, %v1288_v0, %v1058_v45  ;;  %v563_v41 = vpack.c.bf16 %v531_v32, %v531_v32  ;;  %v445_v25 = vrot.slane %v363_v35, 7  ;;  %v364_v32 = vld [vmem:[%s5952_s14 + $0xf0] sm:$0xff] }
  0xc2   : > { %973 = vrot.lane.b32.xlu1 %v724_v42, %s5867_s21 }
  0xc3   : > { %v1056_v31 = vpop.permute.xlu0 %1055  ;;  %v745_v43 = vshll.u32 %v563_v41, 16  ;;  %v446_v33 = vsel %vm399_vm0, %v444_v30, %v445_v25  ;;  %v447_v30 = vrot.slane %v364_v32, 7 }
  0xc4   : > { %v6305_v56 = vpop.permute.xlu1 %769  ;;  %v1319_v2 = vsel %vm1313_vm12, %v1286_v46, %v1056_v31  ;;  %v6360_v59 = vpack.c.bf16 %v446_v33, %v515_v53  ;;  %v532_v46 = vsel %vm399_vm0, %v445_v25, 0.0  ;;  %v448_v25 = vrot.slane %v365_v29, 7 }
  0xc5   : > { %971 = vrot.lane.b32.xlu0 %v6239_v54, %s5867_s21  ;;  %v747_v58 = vrot.slane %v745_v43, 1  ;;  %v565_v10 = vpack.c.bf16 %v532_v46, %v532_v46 }
  0xc6   : > { %1009 = vrot.lane.b32.xlu1 %v6296_v47, %s5866_s18  ;;  %v752_v11 = vshll.u32 %v6360_v59, 16  ;;  %v871_v43 = vrot.slane %v6360_v59, 1  ;;  %v449_v53 = vsel %vm399_vm0, %v447_v30, %v448_v25  ;;  %v533_v46 = vsel %vm399_vm0, %v448_v25, 0.0 }
  0xc7   : > { %v1088_v8 = vpop.permute.xlu0 %1087 }
  0xc8   : > { %v1352_v54 = vsel %vm1346_vm11, %v1319_v2, %v1088_v8  ;;  %v772_v27 = vpop.permute.xlu1 %771  ;;  %v869_v2 = vrot.slane %v563_v41, 1 }
  0xc9   : > { %1007 = vrot.lane.b32.xlu0 %v6253_v62, %s5866_s18  ;;  %5710 = vmatprep.mubr.msk.bf16.mxu0 %vm1401_vm13, %v1352_v54  ;;  %v443_v62 = vsel %vm399_vm0, %v441_v15, %v442_v16  ;;  %v1127_v54 = vsel %vm1115_vm5, %v6042_v38, %v772_v27  ;;  %v750_v38 = vshrl.u32 %v6360_v59, 16 }
  0xca   : > { %1041 = vrot.lane.b32.xlu1 %v6276_v34, %s5868_s22  ;;  %v6340_v26 = vpack.c.bf16 %v443_v62, %v514_v22 }
  0xcb   : > { %v1090_v18 = vpop.permute.xlu0 %1089 }
  0xcc   : > { %v1354_v14 = vsel %vm1346_vm11, %v1321_v12, %v1090_v18  ;;  %v885_v21 = vpop.permute.xlu1 %884  ;;  %v740_v44 = vshll.u32 %v6340_v26, 16  ;;  %v738_v50 = vshrl.u32 %v6340_v26, 16  ;;  %v868_v61 = vrot.slane %v6340_v26, 1 }
  0xcd   : > { %1039 = vrot.lane.b32.xlu0 %v6255_v63, %s5868_s22  ;;  %5711 = vmatmul.mubr.msk.bf16.gmra.mrb[4].mxu0 %vm1401_vm13, %v1354_v14  ;;  %v1160_v27 = vsel %vm1148_vm6, %v1127_v54, %v885_v21  ;;  %v757_v12 = vshll.u32 %v565_v10, 16 }
  0xce   : > { %1073 = vrot.lane.b32.xlu1 %v6330_v20, %s5869_s23  ;;  %v742_v48 = vrot.slane %v740_v44, 1  ;;  %v6383_v57 = vsel %vm825_vm1, %v868_v61, %v869_v2  ;;  %v567_v2 = vpack.c.bf16 %v533_v46, %v533_v46 }
  0xcf   : > { %v883_v23 = vpop.permute.xlu0 %882  ;;  %v759_v41 = vrot.slane %v757_v12, 1 }
  0xd0   : > { %v918_v28 = vpop.permute.xlu1 %917  ;;  %v743_v52 = vor.u32 %v742_v48, %v738_v50 }
  0xd1   : > { %1071 = vrot.lane.b32.xlu0 %v724_v42, %s5869_s23  ;;  %v1193_v18 = vsel %vm1181_vm7, %v1160_v27, %v918_v28 }
  0xd2   : > { %785 = vrot.lane.b32.xlu1 %v724_v42, %s5865_s17  ;;  %v6369_v9 = vsel %vm568_vm2, %v743_v52, %v747_v58 }
  0xd3   : > { %v916_v13 = vpop.permute.xlu0 %915 }
  0xd4   : > { %v962_v45 = vpop.permute.xlu1 %961 }
  0xd5   : > { %1103 = vrot.lane.b32.xlu0 %v6296_v47, %s5870_s24  ;;  %v1226_v22 = vsel %vm1214_vm8, %v1193_v18, %v962_v45 }
  0xd6   : > { %787 = vrot.lane.b32.xlu1 %v6330_v20, %s5865_s17 }
  0xd7   : > { %v960_v42 = vpop.permute.xlu0 %959 }
  0xd8   : > { %v998_v31 = vpop.permute.xlu1 %997 }
  0xd9   : > { %1105 = vrot.lane.b32.xlu0 %v867_v49, %s5870_s24  ;;  %v1259_v21 = vsel %vm1247_vm9, %v1226_v22, %v998_v31  ;;  %v872_v31 = vrot.slane %v565_v10, 1 }
  0xda   : > { %900 = vrot.lane.b32.xlu1 %v867_v49, %s5863_s15 }
  0xdb   : > { %v996_v55 = vpop.permute.xlu0 %995  ;;  %v873_v52 = vsel %vm825_vm1, %v871_v43, %v872_v31  ;;  %v2194_v43 = vshll.u32 %v5946_v6, 16 }
  0xdc   : > { %v1030_v60 = vpop.permute.xlu1 %1029 }
  0xdd   : > { %898 = vrot.lane.b32.xlu0 %v6296_v47, %s5863_s15  ;;  %v1125_v47 = vsel %vm1115_vm5, %v6025_v17, %v6305_v56  ;;  %v754_v56 = vrot.slane %v752_v11, 1  ;;  %v1292_v28 = vsel %vm1280_vm10, %v1259_v21, %v1030_v60 }
  0xde   : > { %933 = vrot.lane.b32.xlu1 %v6340_v26, %s5864_s16  ;;  %v1158_v16 = vsel %vm1148_vm6, %v1125_v47, %v883_v23  ;;  %v947_v47 = vshll.u32 %v567_v2, 16 }
  0xdf   : > { %v1028_v8 = vpop.permute.xlu0 %1027  ;;  %v1191_v0 = vsel %vm1181_vm7, %v1158_v16, %v916_v13  ;;  %v755_v13 = vor.u32 %v754_v56, %v750_v38 }
  0xe0   : > { %v1062_v15 = vpop.permute.xlu1 %1061  ;;  %v1224_v14 = vsel %vm1214_vm8, %v1191_v0, %v960_v42  ;;  %v949_v0 = vrot.slane %v947_v47, 1 }
  0xe1   : > { %931 = vrot.lane.b32.xlu0 %v6276_v34, %s5864_s16  ;;  %v1257_v23 = vsel %vm1247_vm9, %v1224_v14, %v996_v55  ;;  %v1325_v44 = vsel %vm1313_vm12, %v1292_v28, %v1062_v15  ;;  %v760_v48 = vsel %vm568_vm2, %v755_v13, %v759_v41  ;;  %v516_v55 = vsel %vm399_vm0, 0.0, %v447_v30 }
  0xe2   : > { %977 = vrot.lane.b32.xlu1 %v6369_v9, %s5867_s21  ;;  %v1290_v35 = vsel %vm1280_vm10, %v1257_v23, %v1028_v8  ;;  %v566_v58 = vpack.c.bf16 %v449_v53, %v516_v55  ;;  %v985_v14 = vrot.slane %v567_v2, 1  ;;  %v2192_v53 = vshrl.u32 %v5946_v6, 16 }
  0xe3   : > { %v1060_v17 = vpop.permute.xlu0 %1059  ;;  %v2196_v55 = vrot.slane %v2194_v43, 1 }
  0xe4   : > { %v1094_v62 = vpop.permute.xlu1 %1093  ;;  %v1323_v37 = vsel %vm1313_vm12, %v1290_v35, %v1060_v17  ;;  %v942_v8 = vshll.u32 %v566_v58, 16  ;;  %v940_v54 = vshrl.u32 %v566_v58, 16  ;;  %v984_v18 = vrot.slane %v566_v58, 1 }
  0xe5   : > { %975 = vrot.lane.b32.xlu0 %v6330_v20, %s5867_s21  ;;  %v1358_v42 = vsel %vm1346_vm11, %v1325_v44, %v1094_v62 }
  0xe6   : > { %1013 = vrot.lane.b32.xlu1 %v6383_v57, %s5866_s18  ;;  %v944_v15 = vrot.slane %v942_v8, 1  ;;  %v986_v29 = vsel %vm825_vm1, %v984_v18, %v985_v14 }
  0xe7   : > { %v1092_v39 = vpop.permute.xlu0 %1091 }
  0xe8   : > { %v1356_v20 = vsel %vm1346_vm11, %v1323_v37, %v1092_v39  ;;  %v776_v45 = vpop.permute.xlu1 %775  ;;  %v945_v27 = vor.u32 %v944_v15, %v940_v54 }
  0xe9   : > { %1011 = vrot.lane.b32.xlu0 %v867_v49, %s5866_s18  ;;  %5714 = vmatprep.mubr.msk.bf16.mxu0 %vm1401_vm13, %v1356_v20 }
  0xea   : > { %1045 = vrot.lane.b32.xlu1 %v6360_v59, %s5868_s22  ;;  %5715 = vmatmul.mubr.msk.bf16.gmra.mrb[8].mxu0 %vm1401_vm13, %v1358_v42  ;;  %v950_v12 = vsel %vm568_vm2, %v945_v27, %v949_v0 }
  0xeb   : > { %v774_v50 = vpop.permute.xlu0 %773 }
  0xec   : > { %v889_v33 = vpop.permute.xlu1 %888 }
  0xed   : > { %1043 = vrot.lane.b32.xlu0 %v6340_v26, %s5868_s22 }
  0xee   : > { %1077 = vrot.lane.b32.xlu1 %v760_v48, %s5869_s23 }
  0xef   : > { %v887_v49 = vpop.permute.xlu0 %886 }
  0xf0   : > { %v922_v60 = vpop.permute.xlu1 %921 }
  0xf1   : > { %1075 = vrot.lane.b32.xlu0 %v6369_v9, %s5869_s23 }
  0xf2   : > { %1109 = vrot.lane.b32.xlu1 %v873_v52, %s5870_s24 }
  0xf3   : > { %v920_v61 = vpop.permute.xlu0 %919 }
  0xf4   : > { %v966_v10 = vpop.permute.xlu1 %965 }
  0xf5   : > { %1107 = vrot.lane.b32.xlu0 %v6383_v57, %s5870_s24 }
  0xf6   : > { %791 = vrot.lane.b32.xlu1 %v760_v48, %s5865_s17 }
  0xf7   : > { %v964_v11 = vpop.permute.xlu0 %963 }
  0xf8   : > { %v1002_v16 = vpop.permute.xlu1 %1001 }
  0xf9   : > { %789 = vrot.lane.b32.xlu0 %v6369_v9, %s5865_s17  ;;  %v1129_v9 = vsel %vm1115_vm5, %v6074_v1, %v774_v50 }
  0xfa   : > { %904 = vrot.lane.b32.xlu1 %v873_v52, %s5863_s15  ;;  %v1162_v22 = vsel %vm1148_vm6, %v1129_v9, %v887_v49 }
  0xfb   : > { %v1000_v38 = vpop.permute.xlu0 %999  ;;  %v1195_v23 = vsel %vm1181_vm7, %v1162_v22, %v920_v61  ;;  %v8919_v61 = vrot.slane %v5946_v6, 1 }
  0xfc   : > { %v1034_v17 = vpop.permute.xlu1 %1033  ;;  %v1228_v21 = vsel %vm1214_vm8, %v1195_v23, %v964_v11 }
  0xfd   : > { %902 = vrot.lane.b32.xlu0 %v6383_v57, %s5863_s15  ;;  %v1131_v57 = vsel %vm1115_vm5, %v6091_v24, %v776_v45  ;;  %v1261_v1 = vsel %vm1247_vm9, %v1228_v21, %v1000_v38 }
  0xfe   : > { %937 = vrot.lane.b32.xlu1 %v566_v58, %s5864_s16  ;;  %v1164_v28 = vsel %vm1148_vm6, %v1131_v57, %v889_v33 }
  0xff   : > { %v1032_v56 = vpop.permute.xlu0 %1031  ;;  %v1197_v24 = vsel %vm1181_vm7, %v1164_v28, %v922_v60 }
 0x100   : > { %v1066_v62 = vpop.permute.xlu1 %1065  ;;  %v1294_v37 = vsel %vm1280_vm10, %v1261_v1, %v1032_v56  ;;  %v1230_v41 = vsel %vm1214_vm8, %v1197_v24, %v966_v10 }
 0x101   : > { %935 = vrot.lane.b32.xlu0 %v6360_v59, %s5864_s16  ;;  %v1263_v45 = vsel %vm1247_vm9, %v1230_v41, %v1002_v16  ;;  %s5878_s16 = smov 64  }
 0x102   : > { %981 = vrot.lane.b32.xlu1 %v950_v12, %s5867_s21  ;;  %v1296_v30 = vsel %vm1280_vm10, %v1263_v45, %v1034_v17 }
 0x103   : > { %v1064_v32 = vpop.permute.xlu0 %1063  ;;  %v1329_v25 = vsel %vm1313_vm12, %v1296_v30, %v1066_v62 }
 0x104   : > { %v778_v35 = vpop.permute.xlu1 %777  ;;  %v1327_v39 = vsel %vm1313_vm12, %v1294_v37, %v1064_v32 }
 0x105   : > { %979 = vrot.lane.b32.xlu0 %v760_v48, %s5867_s21  ;;  %v1133_v15 = vsel %vm1115_vm5, %v6120_v51, %v778_v35 }
 0x106   : > { %1017 = vrot.lane.b32.xlu1 %v986_v29, %s5866_s18 }
 0x107   : > { %v1096_v13 = vpop.permute.xlu0 %1095 }
 0x108   : > { %v1360_v44 = vsel %vm1346_vm11, %v1327_v39, %v1096_v13  ;;  %v780_v20 = vpop.permute.xlu1 %779 }
 0x109   : > { %1015 = vrot.lane.b32.xlu0 %v873_v52, %s5866_s18  ;;  %5718 = vmatprep.mubr.msk.bf16.mxu0 %vm1401_vm13, %v1360_v44  ;;  %v1135_v11 = vsel %vm1115_vm5, %v6135_v7, %v780_v20 }
 0x10a   : > { %1049 = vrot.lane.b32.xlu1 %v5942_v4, %s5868_s22 }
 0x10b   : > { %v1098_v42 = vpop.permute.xlu0 %1097 }
 0x10c   : > { %v1362_v50 = vsel %vm1346_vm11, %v1329_v25, %v1098_v42  ;;  %v893_v48 = vpop.permute.xlu1 %892 }
 0x10d   : > { %1047 = vrot.lane.b32.xlu0 %v566_v58, %s5868_s22  ;;  %5719 = vmatmul.mubr.msk.bf16.gmra.mrb[12].mxu0 %vm1401_vm13, %v1362_v50  ;;  %v2197_v58 = vor.u32 %v2196_v55, %v2192_v53  ;;  %v1168_v16 = vsel %vm1148_vm6, %v1135_v11, %v893_v48 }
 0x10e   : > { %1081 = vrot.lane.b32.xlu1 %v5988_v40, %s5869_s23 }
 0x10f   : > { %v891_v31 = vpop.permute.xlu0 %890 }
 0x110   : > { %v926_v33 = vpop.permute.xlu1 %925  ;;  %v1166_v47 = vsel %vm1148_vm6, %v1133_v15, %v891_v31 }
 0x111   : > { %1079 = vrot.lane.b32.xlu0 %v950_v12, %s5869_s23  ;;  %v1201_v0 = vsel %vm1181_vm7, %v1168_v16, %v926_v33 }
 0x112   : > { %1113 = vrot.lane.b32.xlu1 %v5964_v19, %s5870_s24 }
 0x113   : > { %v924_v49 = vpop.permute.xlu0 %923 }
 0x114   : > { %v970_v52 = vpop.permute.xlu1 %969  ;;  %v1199_v38 = vsel %vm1181_vm7, %v1166_v47, %v924_v49 }
 0x115   : > { %1111 = vrot.lane.b32.xlu0 %v986_v29, %s5870_s24  ;;  %v1234_v7 = vsel %vm1214_vm8, %v1201_v0, %v970_v52 }
 0x116   : > { %2366 = vrot.lane.b32.xlu1 %v5946_v6, %s5872_s27 }
 0x117   : > { %v968_v60 = vpop.permute.xlu0 %967 }
 0x118   : > { %v1006_v46 = vpop.permute.xlu1 %1005  ;;  %v1232_v17 = vsel %vm1214_vm8, %v1199_v38, %v968_v60 }
 0x119   : > { %2247 = vrot.lane.b32.xlu0 %v2197_v58, %s5873_s28  ;;  %v1267_v51 = vsel %vm1247_vm9, %v1234_v7, %v1006_v46 }
 0x11a   : > { %2382 = vrot.lane.b32.xlu1 %v2197_v58, %s5874_s29 }
 0x11b   : > { %v1004_v2 = vpop.permute.xlu0 %1003 }
 0x11c   : > { %v1038_v8 = vpop.permute.xlu1 %1037  ;;  %v1265_v12 = vsel %vm1247_vm9, %v1232_v17, %v1004_v2 }
 0x11d   : > { %2279 = vrot.lane.b32.xlu0 %v8919_v61, %s5875_s11  ;;  %v1300_v14 = vsel %vm1280_vm10, %v1267_v51, %v1038_v8 }
 0x11f   : > { %v1036_v10 = vpop.permute.xlu0 %1035 }
 0x120   : > { %v1070_v54 = vpop.permute.xlu1 %1069  ;;  %v1298_v18 = vsel %vm1280_vm10, %v1265_v12, %v1036_v10 }
 0x121   : > { %3206 = vrot.lane.b32.xlu0 %v5942_v4, %s5875_s11  ;;  %v1333_v22 = vsel %vm1313_vm12, %v1300_v14, %v1070_v54 }
 0x123   : > { %v1068_v27 = vpop.permute.xlu0 %1067 }
 0x124   : > { %v1102_v56 = vpop.permute.xlu1 %1101  ;;  %v1331_v62 = vsel %vm1313_vm12, %v1298_v18, %v1068_v27 }
 0x125   : > { %3334 = vrot.lane.b32.xlu0 %v5988_v40, %s5876_s12  ;;  %v1366_v32 = vsel %vm1346_vm11, %v1333_v22, %v1102_v56 }
 0x127   : > { %v1100_v9 = vpop.permute.xlu0 %1099 }
 0x128   : > { %v1364_v57 = vsel %vm1346_vm11, %v1331_v62, %v1100_v9  ;;  %v784_v23 = vpop.permute.xlu1 %783 }
 0x129   : > { %5722 = vmatprep.mubr.msk.bf16.mxu0 %vm1401_vm13, %v1364_v57  ;;  %3532 = vrot.lane.b32.xlu0 %v5988_v40, %s5877_s13  ;;  %v1139_v25 = vsel %vm1115_vm5, %v6191_v3, %v784_v23 }
 0x12a   : > { %5723 = vmatmul.mubr.msk.bf16.gmra.mrb[16].mxu0 %vm1401_vm13, %v1366_v32 }
 0x12b   : > { %v782_v29 = vpop.permute.xlu0 %781 }
 0x12c   : > { %v897_v21 = vpop.permute.xlu1 %896  ;;  %v1137_v45 = vsel %vm1115_vm5, %v6165_v36, %v782_v29 }
 0x12d   : > { %3604 = vrot.lane.b32.xlu0 %v5964_v19, %s5872_s27  ;;  %v1172_v33 = vsel %vm1148_vm6, %v1139_v25, %v897_v21 }
 0x12f   : > { %v895_v35 = vpop.permute.xlu0 %894 }
 0x130   : > { %v930_v1 = vpop.permute.xlu1 %929  ;;  %v1170_v30 = vsel %vm1148_vm6, %v1137_v45, %v895_v35 }
 0x131   : > { %v1205_v55 = vsel %vm1181_vm7, %v1172_v33, %v930_v1  ;;  %v6552_v33 = vld [vmem:[%s8909_s2] ss:$0 sm:$0xff] }
 0x133   : > { %v928_v28 = vpop.permute.xlu0 %927 }
 0x134   : > { %v974_v37 = vpop.permute.xlu1 %973  ;;  %v1203_v42 = vsel %vm1181_vm7, %v1170_v30, %v928_v28 }
 0x135   : > { %v1238_v52 = vsel %vm1214_vm8, %v1205_v55, %v974_v37 }
 0x137   : > { %v972_v24 = vpop.permute.xlu0 %971 }
 0x138   : > { %v1010_v39 = vpop.permute.xlu1 %1009  ;;  %v1236_v48 = vsel %vm1214_vm8, %v1203_v42, %v972_v24 }
 0x139   : > { %v1271_v60 = vsel %vm1247_vm9, %v1238_v52, %v1010_v39 }
 0x13b   : > { %v1008_v13 = vpop.permute.xlu0 %1007 }
 0x13c   : > { %v1042_v41 = vpop.permute.xlu1 %1041  ;;  %v1269_v31 = vsel %vm1247_vm9, %v1236_v48, %v1008_v13 }
 0x13d   : > { %v1304_v46 = vsel %vm1280_vm10, %v1271_v60, %v1042_v41 }
 0x13f   : > { %v1040_v44 = vpop.permute.xlu0 %1039 }
 0x140   : > { %v1074_v20 = vpop.permute.xlu1 %1073  ;;  %v1302_v53 = vsel %vm1280_vm10, %v1269_v31, %v1040_v44 }
 0x141   : > { %v1337_v2 = vsel %vm1313_vm12, %v1304_v46, %v1074_v20 }
 0x143   : > { %v1072_v50 = vpop.permute.xlu0 %1071 }
 0x144   : > { %v786_v43 = vpop.permute.xlu1 %785  ;;  %v1335_v36 = vsel %vm1313_vm12, %v1302_v53, %v1072_v50 }
 0x145   : > { %v1141_v51 = vsel %vm1115_vm5, %v6255_v63, %v786_v43 }
 0x147   : > { %v1104_v49 = vpop.permute.xlu0 %1103 }
 0x148   : > { %v1368_v3 = vsel %vm1346_vm11, %v1335_v36, %v1104_v49  ;;  %v788_v58 = vpop.permute.xlu1 %787 }
 0x149   : > { %5726 = vmatprep.mubr.msk.bf16.mxu0 %vm1401_vm13, %v1368_v3  ;;  %v1143_v7 = vsel %vm1115_vm5, %v6276_v34, %v788_v58 }
 0x14b   : > { %v1106_v8 = vpop.permute.xlu0 %1105 }
 0x14c   : > { %v1370_v10 = vsel %vm1346_vm11, %v1337_v2, %v1106_v8  ;;  %v901_v11 = vpop.permute.xlu1 %900 }
 0x14d   : > { %5727 = vmatmul.mubr.msk.bf16.gmra.mrb[20].mxu0 %vm1401_vm13, %v1370_v10  ;;  %v1176_v14 = vsel %vm1148_vm6, %v1143_v7, %v901_v11 }
 0x14f   : > { %v899_v54 = vpop.permute.xlu0 %898 }
 0x150   : > { %v934_v15 = vpop.permute.xlu1 %933  ;;  %v1174_v18 = vsel %vm1148_vm6, %v1141_v51, %v899_v54 }
 0x151   : > { %v1209_v22 = vsel %vm1181_vm7, %v1176_v14, %v934_v15 }
 0x153   : > { %v932_v47 = vpop.permute.xlu0 %931 }
 0x154   : > { %v978_v16 = vpop.permute.xlu1 %977  ;;  %v1207_v62 = vsel %vm1181_vm7, %v1174_v18, %v932_v47 }
 0x155   : > { %v1242_v32 = vsel %vm1214_vm8, %v1209_v22, %v978_v16 }
 0x157   : > { %v976_v38 = vpop.permute.xlu0 %975 }
 0x158   : > { %v1014_v27 = vpop.permute.xlu1 %1013  ;;  %v1240_v57 = vsel %vm1214_vm8, %v1207_v62, %v976_v38 }
 0x159   : > { %v1275_v29 = vsel %vm1247_vm9, %v1242_v32, %v1014_v27 }
 0x15b   : > { %v1012_v0 = vpop.permute.xlu0 %1011 }
 0x15c   : > { %v1046_v17 = vpop.permute.xlu1 %1045  ;;  %v1273_v34 = vsel %vm1247_vm9, %v1240_v57, %v1012_v0 }
 0x15d   : > { %v1308_v21 = vsel %vm1280_vm10, %v1275_v29, %v1046_v17 }
 0x15f   : > { %v1044_v56 = vpop.permute.xlu0 %1043 }
 0x160   : > { %v1078_v12 = vpop.permute.xlu1 %1077  ;;  %v1306_v63 = vsel %vm1280_vm10, %v1273_v34, %v1044_v56 }
 0x161   : > { %v1341_v28 = vsel %vm1313_vm12, %v1308_v21, %v1078_v12 }
 0x163   : > { %v1076_v9 = vpop.permute.xlu0 %1075 }
 0x164   : > { %v1110_v23 = vpop.permute.xlu1 %1109  ;;  %v1339_v35 = vsel %vm1313_vm12, %v1306_v63, %v1076_v9 }
 0x165   : > { %v1374_v39 = vsel %vm1346_vm11, %v1341_v28, %v1110_v23 }
 0x167   : > { %v1108_v1 = vpop.permute.xlu0 %1107 }
 0x168   : > { %v1372_v37 = vsel %vm1346_vm11, %v1339_v35, %v1108_v1  ;;  %v792_v24 = vpop.permute.xlu1 %791 }
 0x169   : > { %5730 = vmatprep.mubr.msk.bf16.mxu0 %vm1401_vm13, %v1372_v37  ;;  %v1147_v50 = vsel %vm1115_vm5, %v6360_v59, %v792_v24 }
 0x16a   : > { %5731 = vmatmul.mubr.msk.bf16.gmra.mrb[24].mxu0 %vm1401_vm13, %v1374_v39 }
 0x16b   : > { %v790_v13 = vpop.permute.xlu0 %789 }
 0x16c   : > { %v905_v41 = vpop.permute.xlu1 %904  ;;  %v1145_v53 = vsel %vm1115_vm5, %v6340_v26, %v790_v13  ;;  %vm2068_vm5 = vcmask 1043456  }
 0x16d   : > { %v1180_v31 = vsel %vm1148_vm6, %v1147_v50, %v905_v41 }
 0x16f   : > { %v903_v44 = vpop.permute.xlu0 %902 }
 0x170   : > { %v938_v20 = vpop.permute.xlu1 %937  ;;  %v1178_v36 = vsel %vm1148_vm6, %v1145_v53, %v903_v44  ;;  %vm2384_vm6 = vcmask 130048  }
 0x171   : > { %v1213_v59 = vsel %vm1181_vm7, %v1180_v31, %v938_v20 }
 0x173   : > { %v936_v45 = vpop.permute.xlu0 %935 }
 0x174   : > { %v982_v30 = vpop.permute.xlu1 %981  ;;  %v1211_v3 = vsel %vm1181_vm7, %v1178_v36, %v936_v45  ;;  %vm2401_vm7 = vcmask 261120  }
 0x175   : > { %v1246_v2 = vsel %vm1214_vm8, %v1213_v59, %v982_v30 }
 0x177   : > { %v980_v25 = vpop.permute.xlu0 %979 }
 0x178   : > { %v1018_v42 = vpop.permute.xlu1 %1017  ;;  %v1244_v46 = vsel %vm1214_vm8, %v1211_v3, %v980_v25  ;;  %vm2418_vm8 = vcmask 392192  }
 0x179   : > { %v1279_v11 = vsel %vm1247_vm9, %v1246_v2, %v1018_v42 }
 0x17b   : > { %v1016_v48 = vpop.permute.xlu0 %1015 }
 0x17c   : > { %v1050_v43 = vpop.permute.xlu1 %1049  ;;  %v1277_v10 = vsel %vm1247_vm9, %v1244_v46, %v1016_v48  ;;  %vm2435_vm9 = vcmask 523264  }
 0x17d   : > { %v1312_v27 = vsel %vm1280_vm10, %v1279_v11, %v1050_v43 }
 0x17f   : > { %v1048_v55 = vpop.permute.xlu0 %1047 }
 0x180   : > { %v5708_v49 = vpop.f32.mrb[0].mxu0  ;;  %v1082_v52 = vpop.permute.xlu1 %1081  ;;  %v1310_v38 = vsel %vm1280_vm10, %v1277_v10, %v1048_v55  ;;  %vm2452_vm10 = vcmask 654336  }
 0x181   : > { %v1484_v58 = vadd.f32 %v5708_v49, %v6552_v33  ;;  %v1475_v60 = vpop.f32.mrb[1].mxu0  ;;  %v1345_v18 = vsel %vm1313_vm12, %v1312_v27, %v1082_v52 }
 0x182   : > { %v1476_v26 = vadd.f32 %v6552_v33, %v1475_v60  ;;  %v5709_v8 = vpop.f32.mrb[2].mxu0 }
 0x183   : > { %v1604_v54 = vmax.f32 %v1484_v58, 0.0  ;;  %v1487_v15 = vadd.f32 %v5709_v8, %v6552_v33  ;;  %v1478_v47 = vpop.f32.mrb[3].mxu0  ;;  %v1080_v16 = vpop.permute.xlu0 %1079 }
 0x184   : > { %v1602_v0 = vmax.f32 %v1476_v26, 0.0  ;;  %v1479_v17 = vadd.f32 %v6552_v33, %v1478_v47  ;;  %v1114_v56 = vpop.permute.xlu1 %1113  ;;  %v1343_v22 = vsel %vm1313_vm12, %v1310_v38, %v1080_v16  ;;  %vm2486_vm12 = vcmask 916480  }
 0x185   : > { %v1651_v7 = vrot.slane %v1604_v54, 1  ;;  %v3034_v12 = vrot.slane %v1604_v54, 7  ;;  %v1605_v51 = vmax.f32 %v1487_v15, 0.0  ;;  %v1378_v34 = vsel %vm1346_vm11, %v1345_v18, %v1114_v56 }
 0x186   : > { %v1650_v14 = vrot.slane %v1602_v0, 1  ;;  %v3031_v62 = vrot.slane %v1602_v0, 7  ;;  %v1603_v9 = vmax.f32 %v1479_v17, 0.0 }
 0x187   : > { %v1683_v57 = vmax.f32 %v1604_v54, %v1651_v7  ;;  %v1715_v23 = vrot.slane %v1605_v51, 1  ;;  %v3035_v32 = vrot.slane %v1605_v51, 7  ;;  %v3128_v29 = vsel %vm399_vm0, 0.0, %v3034_v12  ;;  %v1112_v58 = vpop.permute.xlu0 %1111 }
 0x188   : > { %v1682_v63 = vmax.f32 %v1602_v0, %v1650_v14  ;;  %v3127_v21 = vsel %vm399_vm0, 0.0, %v3031_v62  ;;  %v1714_v35 = vrot.slane %v1603_v9, 1  ;;  %v3032_v24 = vrot.slane %v1603_v9, 7 }
 0x189   : > { %v1779_v1 = vrot.slane %v1683_v57, 1  ;;  %v1811_v28 = vrot.slane %v1683_v57, 2  ;;  %v1747_v37 = vmax.f32 %v1605_v51, %v1715_v23  ;;  %v1843_v39 = vrot.slane %v1683_v57, 3 }
 0x18a   : > { %v1778_v13 = vrot.slane %v1682_v63, 1  ;;  %v1810_v41 = vrot.slane %v1682_v63, 2  ;;  %v3036_v44 = vsel %vm399_vm0, %v3034_v12, %v3035_v32  ;;  %v1842_v45 = vrot.slane %v1682_v63, 3 }
 0x18b   : > { %v2019_v20 = vsel %vm399_vm0, %v1683_v57, %v1779_v1  ;;  %v1891_v30 = vrot.slane %v1747_v37, 4  ;;  %v1923_v25 = vrot.slane %v1747_v37, 5  ;;  %v1955_v48 = vrot.slane %v1747_v37, 6 }
 0x18c   : > { %v2036_v42 = vsel %vm2034_vm14, %v2019_v20, %v1811_v28  ;;  %v2018_v50 = vsel %vm399_vm0, %v1682_v63, %v1778_v13  ;;  %v3144_v43 = vsel %vm399_vm0, %v3035_v32, 0.0  ;;  %v3161_v55 = vpack.c.bf16 %v3036_v44, %v3128_v29 }
 0x18d   : > { %v2053_v31 = vsel %vm2051_vm15, %v2036_v42, %v1843_v39  ;;  %v2035_v53 = vsel %vm2034_vm14, %v2018_v50, %v1810_v41  ;;  %v1746_v36 = vmax.f32 %v1603_v9, %v1714_v35  ;;  %v3033_v3 = vsel %vm399_vm0, %v3031_v62, %v3032_v24 }
 0x18e   : > { %v2052_v49 = vsel %vm2051_vm15, %v2035_v53, %v1842_v45  ;;  %v2070_v52 = vsel %vm2068_vm5, %v2053_v31, %v1891_v30  ;;  %v3143_v59 = vsel %vm399_vm0, %v3032_v24, 0.0  ;;  %v1987_v60 = vrot.slane %v1747_v37, 7  ;;  %3210 = vrot.lane.b32.xlu1 %v3161_v55, %s5875_s11  ;;  %3701 = vrot.lane.b32.xlu0 %v3161_v55, %s5876_s12 }
 0x18f   : > { %v2086_v46 = vsel %vm1434_vm3, %v2070_v52, %v1923_v25  ;;  %v1890_v2 = vrot.slane %v1746_v36, 4  ;;  %v1922_v26 = vrot.slane %v1746_v36, 5  ;;  %v1954_v10 = vrot.slane %v1746_v36, 6 }
 0x190   : > { %v2102_v8 = vsel %vm1435_vm4, %v2086_v46, %v1955_v48  ;;  %v3159_v11 = vpack.c.bf16 %v3033_v3, %v3127_v21  ;;  %v3160_v54 = vpack.c.bf16 %v3143_v59, %v3143_v59  ;;  %v1376_v47 = vsel %vm1346_vm11, %v1343_v22, %v1112_v58 }
 0x191   : > { %v2069_v15 = vsel %vm2068_vm5, %v2052_v49, %v1890_v2  ;;  %v3162_v16 = vpack.c.bf16 %v3144_v43, %v3144_v43  ;;  %v2119_v38 = vsel %vm825_vm1, %v2102_v8, %v1987_v60  ;;  %v1986_v27 = vrot.slane %v1746_v36, 7  ;;  %5734 = vmatprep.mubr.msk.bf16.mxu0 %vm1401_vm13, %v1376_v47 }
 0x192   : > { %v2085_v0 = vsel %vm1434_vm3, %v2069_v15, %v1922_v26  ;;  %v3637_v17 = vrot.slane %v3159_v11, 1  ;;  %v3638_v56 = vrot.slane %v3160_v54, 1  ;;  %5735 = vmatmul.mubr.msk.bf16.gmra.mrb[28].mxu0 %vm1401_vm13, %v1378_v34  ;;  %v3355_v12 = vshll.u32 %v3159_v11, 16  ;;  %3208 = vrot.lane.b32.xlu0 %v3159_v11, %s5875_s11 }
 0x193   : > { %v2101_v7 = vsel %vm1435_vm4, %v2085_v0, %v1954_v10  ;;  %4397 = vrot.lane.b32.xlu1 %v3162_v16, %s5875_s11  ;;  %v3360_v51 = vshll.u32 %v3160_v54, 16  ;;  %v3353_v9 = vshrl.u32 %v3159_v11, 16  ;;  %v3367_v23 = vshll.u32 %v3161_v55, 16 }
 0x194   : > { %v6599_v18 = vsel %vm825_vm1, %v3637_v17, %v3638_v56  ;;  %v2118_v14 = vsel %vm825_vm1, %v2101_v7, %v1986_v27  ;;  %v3357_v22 = vrot.slane %v3355_v12, 1  ;;  %v3372_v32 = vshll.u32 %v3162_v16, 16 }
 0x195   : > { %8977 = vst [vmem:[#allocation6_spill] sm:$0xff] %v6599_v18  ;;  %v2134_v62 = vmax.f32 %v2118_v14, %v2119_v38  ;;  %v3362_v57 = vrot.slane %v3360_v51, 1  ;;  %v3640_v63 = vrot.slane %v3161_v55, 1  ;;  %v3641_v21 = vrot.slane %v3162_v16, 1 }
 0x196   : > { %v3358_v29 = vor.u32 %v3357_v22, %v3353_v9  ;;  %3811 = vrot.lane.b32.xlu0 %v6599_v18, %s5873_s28  ;;  %v3365_v35 = vshrl.u32 %v3161_v55, 16  ;;  %v3369_v1 = vrot.slane %v3367_v23, 1  ;;  %v3374_v44 = vrot.slane %v3372_v32, 1 }
 0x197   : > { %3859 = vrot.lane.b32.xlu1 %v3161_v55, %s5878_s16  ;;  %v2150_v34 = vrot.slane %v2134_v62, 7  ;;  %v6611_v39 = vsel %vm825_vm1, %v3640_v63, %v3641_v21  ;;  %vm2469_vm11 = vcmask 785408  }
 0x198   : > { %v6608_v24 = vsel %vm568_vm2, %v3358_v29, %v3362_v57  ;;  %8978 = vst [vmem:[#allocation7_spill] sm:$0xff] %v6611_v39  ;;  %v3370_v41 = vor.u32 %v3369_v1, %v3365_v35 }
 0x199   : > { %v2166_v28 = vsel %vm399_vm0, 0.0, %v2150_v34  ;;  %v2174_v37 = vsel %vm399_vm0, %v2150_v34, 0.0 }
 0x19a   : > { %v6613_v13 = vpack.c.bf16 %v2174_v37, %v2166_v28  ;;  %v6620_v45 = vsel %vm568_vm2, %v3370_v41, %v3374_v44 }
 0x19b   : > { %3699 = vrot.lane.b32.xlu1 %v3159_v11, %s5876_s12 }
 0x19c   : > { %2296 = vrot.lane.b32.xlu0 %v6613_v13, %s5876_s12  ;;  %v2201_v20 = vshll.u32 %v6613_v13, 16  ;;  %v2272_v30 = vrot.slane %v6613_v13, 1  ;;  %v2199_v50 = vshrl.u32 %v6613_v13, 16 }
 0x19e   : > { %v2203_v25 = vrot.slane %v2201_v20, 1 }
 0x19f   : > { %3759 = vrot.lane.b32.xlu1 %v6608_v24, %s5872_s27 }
 0x1a0   : > { %2336 = vrot.lane.b32.xlu0 %v2272_v30, %s5877_s13  ;;  %v5712_v42 = vpop.f32.mrb[4].mxu0  ;;  %v2204_v55 = vor.u32 %v2203_v25, %v2199_v50 }
 0x1a1   : > { %v1500_v48 = vadd.f32 %v5712_v42, %v6552_v33  ;;  %v1491_v43 = vpop.f32.mrb[5].mxu0 }
 0x1a2   : > { %v1492_v31 = vadd.f32 %v6552_v33, %v1491_v43  ;;  %v5713_v53 = vpop.f32.mrb[6].mxu0 }
 0x1a3   : > { %2281 = vrot.lane.b32.xlu1 %v2272_v30, %s5875_s11  ;;  %v1608_v36 = vmax.f32 %v1500_v48, 0.0  ;;  %v1503_v49 = vadd.f32 %v5713_v53, %v6552_v33  ;;  %v1494_v52 = vpop.f32.mrb[7].mxu0 }
 0x1a4   : > { %v1606_v3 = vmax.f32 %v1492_v31, 0.0  ;;  %2319 = vrot.lane.b32.xlu0 %v2204_v55, %s5878_s16  ;;  %v1495_v59 = vadd.f32 %v6552_v33, %v1494_v52 }
 0x1a5   : > { %v1653_v58 = vrot.slane %v1608_v36, 1  ;;  %v3040_v60 = vrot.slane %v1608_v36, 7  ;;  %v1609_v46 = vmax.f32 %v1503_v49, 0.0 }
 0x1a6   : > { %v1652_v2 = vrot.slane %v1606_v3, 1  ;;  %v3037_v26 = vrot.slane %v1606_v3, 7  ;;  %v1607_v8 = vmax.f32 %v1495_v59, 0.0 }
 0x1a7   : > { %v1685_v10 = vmax.f32 %v1608_v36, %v1653_v58  ;;  %v1717_v11 = vrot.slane %v1609_v46, 1  ;;  %v3041_v54 = vrot.slane %v1609_v46, 7  ;;  %2249 = vrot.lane.b32.xlu1 %v2204_v55, %s5873_s28  ;;  %v3130_v15 = vsel %vm399_vm0, 0.0, %v3040_v60 }
 0x1a8   : > { %v1684_v47 = vmax.f32 %v1606_v3, %v1652_v2  ;;  %v3129_v16 = vsel %vm399_vm0, 0.0, %v3037_v26  ;;  %v1716_v38 = vrot.slane %v1607_v8, 1  ;;  %v3038_v56 = vrot.slane %v1607_v8, 7 }
 0x1a9   : > { %v1781_v27 = vrot.slane %v1685_v10, 1  ;;  %v1813_v0 = vrot.slane %v1685_v10, 2  ;;  %v1749_v17 = vmax.f32 %v1609_v46, %v1717_v11  ;;  %v1845_v7 = vrot.slane %v1685_v10, 3 }
 0x1aa   : > { %v1780_v12 = vrot.slane %v1684_v47, 1  ;;  %v1812_v51 = vrot.slane %v1684_v47, 2  ;;  %v3042_v14 = vsel %vm399_vm0, %v3040_v60, %v3041_v54  ;;  %v1844_v9 = vrot.slane %v1684_v47, 3 }
 0x1ab   : > { %v2021_v62 = vsel %vm399_vm0, %v1685_v10, %v1781_v27  ;;  %v1893_v22 = vrot.slane %v1749_v17, 4  ;;  %v1925_v57 = vrot.slane %v1749_v17, 5  ;;  %v1957_v34 = vrot.slane %v1749_v17, 6 }
 0x1ac   : > { %v2038_v23 = vsel %vm2034_vm14, %v2021_v62, %v1813_v0  ;;  %v2020_v32 = vsel %vm399_vm0, %v1684_v47, %v1780_v12  ;;  %v3146_v29 = vsel %vm399_vm0, %v3041_v54, 0.0  ;;  %v6643_v35 = vpack.c.bf16 %v3042_v14, %v3130_v15 }
 0x1ad   : > { %v2055_v63 = vsel %vm2051_vm15, %v2038_v23, %v1845_v7  ;;  %v2037_v21 = vsel %vm2034_vm14, %v2020_v32, %v1812_v51  ;;  %v1748_v1 = vmax.f32 %v1607_v8, %v1716_v38  ;;  %v3039_v41 = vsel %vm399_vm0, %v3037_v26, %v3038_v56  ;;  %v5816_v7 = vld [vmem:[%s8910_s3] sm:$0xff]   ;;  %v5817_v23 = vld [vmem:[%s8910_s3 + $0x8] sm:$0xff]  }
 0x1ae   : > { %v2054_v28 = vsel %vm2051_vm15, %v2037_v21, %v1844_v9  ;;  %v2072_v37 = vsel %vm2068_vm5, %v2055_v63, %v1893_v22  ;;  %v3145_v44 = vsel %vm399_vm0, %v3038_v56, 0.0  ;;  %v1989_v20 = vrot.slane %v1749_v17, 7  ;;  %v5818_v21 = vld [vmem:[%s8910_s3 + $0x10] sm:$0xff]  }
 0x1af   : > { %v2088_v30 = vsel %vm1434_vm3, %v2072_v37, %v1925_v57  ;;  %v1892_v25 = vrot.slane %v1748_v1, 4  ;;  %v1924_v42 = vrot.slane %v1748_v1, 5  ;;  %v1956_v48 = vrot.slane %v1748_v1, 6 }
 0x1b0   : > { %v2104_v50 = vsel %vm1435_vm4, %v2088_v30, %v1957_v34  ;;  %v6651_v43 = vpack.c.bf16 %v3039_v41, %v3129_v16  ;;  %v6653_v31 = vpack.c.bf16 %v3145_v44, %v3145_v44  ;;  %v1988_v55 = vrot.slane %v1748_v1, 7 }
 0x1b1   : > { %v2121_v53 = vsel %vm825_vm1, %v2104_v50, %v1989_v20  ;;  %v2071_v36 = vsel %vm2068_vm5, %v2054_v28, %v1892_v25  ;;  %v6657_v49 = vpack.c.bf16 %v3146_v29, %v3146_v29  ;;  %v3389_v58 = vshrl.u32 %v6643_v35, 16 }
 0x1b2   : > { %v2087_v52 = vsel %vm1434_vm3, %v2071_v36, %v1924_v42  ;;  %v3379_v3 = vshll.u32 %v6651_v43, 16  ;;  %v3384_v59 = vshll.u32 %v6653_v31, 16  ;;  %v3643_v46 = vrot.slane %v6651_v43, 1 }
 0x1b3   : > { %v2103_v60 = vsel %vm1435_vm4, %v2087_v52, %v1956_v48  ;;  %v3644_v2 = vrot.slane %v6653_v31, 1  ;;  %v3391_v26 = vshll.u32 %v6643_v35, 16  ;;  %v3377_v10 = vshrl.u32 %v6651_v43, 16 }
 0x1b4   : > { %v2120_v8 = vsel %vm825_vm1, %v2103_v60, %v1988_v55  ;;  %v3381_v11 = vrot.slane %v3379_v3, 1  ;;  %v3396_v54 = vshll.u32 %v6657_v49, 16  ;;  %v3646_v38 = vrot.slane %v6643_v35, 1 }
 0x1b5   : > { %v2135_v15 = vmax.f32 %v2120_v8, %v2121_v53  ;;  %v6671_v47 = vsel %vm825_vm1, %v3643_v46, %v3644_v2  ;;  %v3393_v16 = vrot.slane %v3391_v26, 1  ;;  %v3386_v0 = vrot.slane %v3384_v59, 1 }
 0x1b6   : > { %v3382_v27 = vor.u32 %v3381_v11, %v3377_v10  ;;  %v3647_v17 = vrot.slane %v6657_v49, 1  ;;  %v3398_v51 = vrot.slane %v3396_v54, 1  ;;  %v8917_v14 = vmov 0  }
 0x1b7   : > { %v2151_v56 = vrot.slane %v2135_v15, 7  ;;  %v3394_v12 = vor.u32 %v3393_v16, %v3389_v58  ;;  %2630 = vmatprep.subr.bf16.mxu1 %v8917_v14  ;;  %4977 = vmatprep.subr.bf16.mxu0 %v8917_v14 }
 0x1b8   : > { %v6680_v62 = vsel %vm568_vm2, %v3382_v27, %v3386_v0  ;;  %v6683_v9 = vsel %vm825_vm1, %v3646_v38, %v3647_v17  ;;  %2631 = vmatpush1.bf16.msra.mxu1 %v5816_v7  ;;  %5812 = vset.pattern.permute.xlu1 %v8917_v14 }
 0x1b9   : > { %8979 = vst [vmem:[#allocation8_spill] sm:$0xff] %v6683_v9  ;;  %v2167_v22 = vsel %vm399_vm0, 0.0, %v2151_v56  ;;  %v2175_v57 = vsel %vm399_vm0, %v2151_v56, 0.0  ;;  %v6692_v32 = vsel %vm568_vm2, %v3394_v12, %v3398_v51  ;;  %2632 = vmatprep.subr.bf16.mxu1 %v8917_v14  ;;  %5813 = vset.pattern.permute.xlu0 %v8917_v14  ;;  %v5819_v12 = vld [vmem:[%s8910_s3 + $0x18] sm:$0xff]  }
 0x1ba   : > { %v6695_v34 = vpack.c.bf16 %v2175_v57, %v2167_v22 }
 0x1bc   : > { %2298 = vrot.lane.b32.xlu1 %v6695_v34, %s5876_s12  ;;  %2352 = vrot.lane.b32.xlu0 %v6695_v34, %s5872_s27  ;;  %v2208_v29 = vshll.u32 %v6695_v34, 16  ;;  %v6709_v28 = vrot.slane %v6695_v34, 1  ;;  %v2206_v50 = vshrl.u32 %v6695_v34, 16 }
 0x1bd   : > { %v5716_v63 = vpop.f32.mrb[8].mxu0  ;;  %2633 = vmatpush1.bf16.msra.mxu1 %v5817_v23 }
 0x1be   : > { %v1516_v1 = vadd.f32 %v5716_v63, %v6552_v33  ;;  %v1507_v37 = vpop.f32.mrb[9].mxu0  ;;  %v2210_v41 = vrot.slane %v2208_v29, 1  ;;  %2634 = vmatprep.subr.bf16.mxu1 %v8917_v14 }
 0x1bf   : > { %v1508_v44 = vadd.f32 %v6552_v33, %v1507_v37  ;;  %v5717_v20 = vpop.f32.mrb[10].mxu0 }
 0x1c0   : > { %v1612_v30 = vmax.f32 %v1516_v1, 0.0  ;;  %2338 = vrot.lane.b32.xlu1 %v6709_v28, %s5877_s13  ;;  %2283 = vrot.lane.b32.xlu0 %v6709_v28, %s5875_s11  ;;  %v1519_v25 = vadd.f32 %v5717_v20, %v6552_v33  ;;  %v1510_v42 = vpop.f32.mrb[11].mxu0  ;;  %v2211_v3 = vor.u32 %v2210_v41, %v2206_v50 }
 0x1c1   : > { %v1610_v48 = vmax.f32 %v1508_v44, 0.0  ;;  %v1511_v53 = vadd.f32 %v6552_v33, %v1510_v42  ;;  %2635 = vmatpush1.bf16.msra.mxu1 %v5818_v21 }
 0x1c2   : > { %v1655_v55 = vrot.slane %v1612_v30, 1  ;;  %v3046_v36 = vrot.slane %v1612_v30, 7  ;;  %v1613_v52 = vmax.f32 %v1519_v25, 0.0  ;;  %2636 = vmatprep.subr.bf16.mxu1 %v8917_v14 }
 0x1c3   : > { %v1654_v59 = vrot.slane %v1610_v48, 1  ;;  %v3043_v58 = vrot.slane %v1610_v48, 7  ;;  %v1611_v60 = vmax.f32 %v1511_v53, 0.0 }
 0x1c4   : > { %v1687_v46 = vmax.f32 %v1612_v30, %v1655_v55  ;;  %v1719_v2 = vrot.slane %v1613_v52, 1  ;;  %v3047_v26 = vrot.slane %v1613_v52, 7  ;;  %2321 = vrot.lane.b32.xlu1 %v2211_v3, %s5878_s16  ;;  %2368 = vrot.lane.b32.xlu0 %v2211_v3, %s5874_s29  ;;  %v3132_v8 = vsel %vm399_vm0, 0.0, %v3046_v36 }
 0x1c5   : > { %v1686_v10 = vmax.f32 %v1610_v48, %v1654_v59  ;;  %v3131_v11 = vsel %vm399_vm0, 0.0, %v3043_v58  ;;  %v1718_v54 = vrot.slane %v1611_v60, 1  ;;  %v3044_v27 = vrot.slane %v1611_v60, 7  ;;  %2637 = vmatpush1.bf16.msra.mxu1 %v5819_v12  ;;  %v5820_v48 = vld [vmem:[%s8910_s3 + $0x20] sm:$0xff]  }
 0x1c6   : > { %v1783_v15 = vrot.slane %v1687_v46, 1  ;;  %v1815_v16 = vrot.slane %v1687_v46, 2  ;;  %v1751_v38 = vmax.f32 %v1613_v52, %v1719_v2  ;;  %v1847_v0 = vrot.slane %v1687_v46, 3  ;;  %2638 = vmatprep.subr.bf16.mxu1 %v8917_v14 }
 0x1c7   : > { %v1782_v17 = vrot.slane %v1686_v10, 1  ;;  %v1814_v56 = vrot.slane %v1686_v10, 2  ;;  %v3048_v7 = vsel %vm399_vm0, %v3046_v36, %v3047_v26  ;;  %v1846_v22 = vrot.slane %v1686_v10, 3 }
 0x1c8   : > { %v2023_v51 = vsel %vm399_vm0, %v1687_v46, %v1783_v15  ;;  %v1895_v57 = vrot.slane %v1751_v38, 4  ;;  %v1927_v23 = vrot.slane %v1751_v38, 5  ;;  %2251 = vrot.lane.b32.xlu0 %v2211_v3, %s5873_s28  ;;  %v1959_v21 = vrot.slane %v1751_v38, 6 }
 0x1c9   : > { %v2040_v29 = vsel %vm2034_vm14, %v2023_v51, %v1815_v16  ;;  %v2022_v63 = vsel %vm399_vm0, %v1686_v10, %v1782_v17  ;;  %v3148_v1 = vsel %vm399_vm0, %v3047_v26, 0.0  ;;  %v6736_v44 = vpack.c.bf16 %v3048_v7, %v3132_v8  ;;  %2639 = vmatpush1.bf16.msra.mxu1 %v5820_v48 }
 0x1ca   : > { %v2057_v37 = vsel %vm2051_vm15, %v2040_v29, %v1847_v0  ;;  %v2039_v41 = vsel %vm2034_vm14, %v2022_v63, %v1814_v56  ;;  %v1750_v20 = vmax.f32 %v1611_v60, %v1718_v54  ;;  %v3045_v42 = vsel %vm399_vm0, %v3043_v58, %v3044_v27  ;;  %2640 = vmatprep.subr.bf16.mxu1 %v8917_v14  ;;  %v5821_v54 = vld [vmem:[%s8910_s3 + $0x28] sm:$0xff]   ;;  %v5822_v63 = vld [vmem:[%s8910_s3 + $0x30] sm:$0xff]  }
 0x1cb   : > { %v2056_v30 = vsel %vm2051_vm15, %v2039_v41, %v1846_v22  ;;  %v2074_v25 = vsel %vm2068_vm5, %v2057_v37, %v1895_v57  ;;  %v3147_v50 = vsel %vm399_vm0, %v3044_v27, 0.0  ;;  %v1991_v53 = vrot.slane %v1751_v38, 7 }
 0x1cc   : > { %v2090_v55 = vsel %vm1434_vm3, %v2074_v25, %v1927_v23  ;;  %v1894_v36 = vrot.slane %v1750_v20, 4  ;;  %v1926_v52 = vrot.slane %v1750_v20, 5  ;;  %v1958_v59 = vrot.slane %v1750_v20, 6 }
 0x1cd   : > { %v2106_v3 = vsel %vm1435_vm4, %v2090_v55, %v1959_v21  ;;  %v6748_v60 = vpack.c.bf16 %v3045_v42, %v3131_v11  ;;  %v6750_v46 = vpack.c.bf16 %v3147_v50, %v3147_v50  ;;  %v1990_v2 = vrot.slane %v1750_v20, 7  ;;  %2641 = vmatpush1.bf16.msra.mxu1 %v5821_v54 }
 0x1ce   : > { %v2123_v58 = vsel %vm825_vm1, %v2106_v3, %v1991_v53  ;;  %v2073_v26 = vsel %vm2068_vm5, %v2056_v30, %v1894_v36  ;;  %v6755_v8 = vpack.c.bf16 %v3148_v1, %v3148_v1  ;;  %v3413_v16 = vshrl.u32 %v6736_v44, 16  ;;  %2642 = vmatprep.subr.bf16.mxu1 %v8917_v14  ;;  %v5823_v53 = vld [vmem:[%s8910_s3 + $0x38] sm:$0xff]  }
 0x1cf   : > { %v2089_v10 = vsel %vm1434_vm3, %v2073_v26, %v1926_v52  ;;  %v3403_v11 = vshll.u32 %v6748_v60, 16  ;;  %v3408_v15 = vshll.u32 %v6750_v46, 16  ;;  %v3649_v27 = vrot.slane %v6748_v60, 1 }
 0x1d0   : > { %v2105_v38 = vsel %vm1435_vm4, %v2089_v10, %v1958_v59  ;;  %v3650_v0 = vrot.slane %v6750_v46, 1  ;;  %v3415_v17 = vshll.u32 %v6736_v44, 16  ;;  %v3401_v7 = vshrl.u32 %v6748_v60, 16  ;;  %v5824_v59 = vld [vmem:[%s8910_s3 + $0x40] sm:$0xff]  }
 0x1d1   : > { %v2122_v56 = vsel %vm825_vm1, %v2105_v38, %v1990_v2  ;;  %v3405_v12 = vrot.slane %v3403_v11, 1  ;;  %v3420_v51 = vshll.u32 %v6755_v8, 16  ;;  %v3652_v29 = vrot.slane %v6736_v44, 1  ;;  %2643 = vmatpush1.bf16.msra.mxu1 %v5822_v63 }
 0x1d2   : > { %v2136_v22 = vmax.f32 %v2122_v56, %v2123_v58  ;;  %v6773_v57 = vsel %vm825_vm1, %v3649_v27, %v3650_v0  ;;  %v3417_v23 = vrot.slane %v3415_v17, 1  ;;  %v3410_v1 = vrot.slane %v3408_v15, 1  ;;  %2644 = vmatprep.subr.bf16.mxu1 %v8917_v14 }
 0x1d3   : > { %8980 = vst [vmem:[#allocation9_spill] sm:$0xff] %v6773_v57  ;;  %v3406_v21 = vor.u32 %v3405_v12, %v3401_v7  ;;  %v3653_v37 = vrot.slane %v6755_v8, 1  ;;  %v3422_v30 = vrot.slane %v3420_v51, 1 }
 0x1d4   : > { %v2152_v41 = vrot.slane %v2136_v22, 7  ;;  %v3418_v20 = vor.u32 %v3417_v23, %v3413_v16 }
 0x1d5   : > { %v6781_v25 = vsel %vm568_vm2, %v3406_v21, %v3410_v1  ;;  %v6784_v42 = vsel %vm825_vm1, %v3652_v29, %v3653_v37  ;;  %2645 = vmatpush1.bf16.msra.mxu1 %v5823_v53 }
 0x1d6   : > { %8981 = vst [vmem:[#allocation10_spill] sm:$0xff] %v6784_v42  ;;  %v2168_v50 = vsel %vm399_vm0, 0.0, %v2152_v41  ;;  %v2176_v48 = vsel %vm399_vm0, %v2152_v41, 0.0  ;;  %v6793_v55 = vsel %vm568_vm2, %v3418_v20, %v3422_v30  ;;  %2646 = vmatprep.subr.bf16.mxu1 %v8917_v14 }
 0x1d7   : > { %v6795_v36 = vpack.c.bf16 %v2176_v48, %v2168_v50 }
 0x1d9   : > { %2354 = vrot.lane.b32.xlu1 %v6795_v36, %s5872_s27  ;;  %2300 = vrot.lane.b32.xlu0 %v6795_v36, %s5876_s12  ;;  %v2274_v52 = vrot.slane %v6795_v36, 1  ;;  %v2215_v3 = vshll.u32 %v6795_v36, 16  ;;  %v2213_v26 = vshrl.u32 %v6795_v36, 16 }
 0x1da   : > { %2647 = vmatpush1.bf16.msra.mxu1 %v5824_v59 }
 0x1db   : > { %v5437_v58 = vcombine.low %v6709_v28, %v2274_v52  ;;  %v2217_v2 = vrot.slane %v2215_v3, 1 }
 0x1dd   : > { %2285 = vrot.lane.b32.xlu1 %v2274_v52, %s5875_s11  ;;  %5453 = vmatprep.mubr.msk.bf16.mxu1 %vm2384_vm6, %v5437_v58  ;;  %v2218_v10 = vor.u32 %v2217_v2, %v2213_v26 }
 0x1de   : > { %2340 = vrot.lane.b32.xlu0 %v2274_v52, %s5877_s13 }
 0x1e0   : > { %v5720_v54 = vpop.f32.mrb[12].mxu0 }
 0x1e1   : > { %2370 = vrot.lane.b32.xlu1 %v2218_v10, %s5874_s29  ;;  %v1532_v11 = vadd.f32 %v5720_v54, %v6552_v33  ;;  %v1523_v15 = vpop.f32.mrb[13].mxu0 }
 0x1e2   : > { %2323 = vrot.lane.b32.xlu0 %v2218_v10, %s5878_s16  ;;  %v1524_v28 = vadd.f32 %v6552_v33, %v1523_v15  ;;  %v5721_v16 = vpop.f32.mrb[14].mxu0 }
 0x1e3   : > { %v1616_v38 = vmax.f32 %v1532_v11, 0.0  ;;  %v1535_v27 = vadd.f32 %v5721_v16, %v6552_v33  ;;  %v1526_v0 = vpop.f32.mrb[15].mxu0 }
 0x1e4   : > { %v1614_v17 = vmax.f32 %v1524_v28, 0.0  ;;  %v1527_v56 = vadd.f32 %v6552_v33, %v1526_v0 }
 0x1e5   : > { %v1657_v7 = vrot.slane %v1616_v38, 1  ;;  %v3052_v12 = vrot.slane %v1616_v38, 7  ;;  %v1617_v51 = vmax.f32 %v1535_v27, 0.0  ;;  %2253 = vrot.lane.b32.xlu1 %v2218_v10, %s5873_s28 }
 0x1e6   : > { %v1656_v22 = vrot.slane %v1614_v17, 1  ;;  %v3049_v23 = vrot.slane %v1614_v17, 7  ;;  %v1615_v29 = vmax.f32 %v1527_v56, 0.0 }
 0x1e7   : > { %v1689_v63 = vmax.f32 %v1616_v38, %v1657_v7  ;;  %v1721_v21 = vrot.slane %v1617_v51, 1  ;;  %v3053_v1 = vrot.slane %v1617_v51, 7  ;;  %v3134_v37 = vsel %vm399_vm0, 0.0, %v3052_v12 }
 0x1e8   : > { %v1688_v41 = vmax.f32 %v1614_v17, %v1656_v22  ;;  %v3133_v20 = vsel %vm399_vm0, 0.0, %v3049_v23  ;;  %v1720_v30 = vrot.slane %v1615_v29, 1  ;;  %v3050_v52 = vrot.slane %v1615_v29, 7 }
 0x1e9   : > { %v1785_v50 = vrot.slane %v1689_v63, 1  ;;  %v1817_v48 = vrot.slane %v1689_v63, 2  ;;  %v1753_v53 = vmax.f32 %v1617_v51, %v1721_v21  ;;  %v1849_v3 = vrot.slane %v1689_v63, 3 }
 0x1ea   : > { %v1784_v59 = vrot.slane %v1688_v41, 1  ;;  %v1816_v58 = vrot.slane %v1688_v41, 2  ;;  %v3054_v2 = vsel %vm399_vm0, %v3052_v12, %v3053_v1  ;;  %v1848_v10 = vrot.slane %v1688_v41, 3 }
 0x1eb   : > { %v2025_v26 = vsel %vm399_vm0, %v1689_v63, %v1785_v50  ;;  %v1897_v54 = vrot.slane %v1753_v53, 4  ;;  %v1929_v11 = vrot.slane %v1753_v53, 5  ;;  %v1961_v16 = vrot.slane %v1753_v53, 6 }
 0x1ec   : > { %v2042_v15 = vsel %vm2034_vm14, %v2025_v26, %v1817_v48  ;;  %v2024_v28 = vsel %vm399_vm0, %v1688_v41, %v1784_v59  ;;  %v3150_v38 = vsel %vm399_vm0, %v3053_v1, 0.0  ;;  %v6828_v17 = vpack.c.bf16 %v3054_v2, %v3134_v37 }
 0x1ed   : > { %v2059_v27 = vsel %vm2051_vm15, %v2042_v15, %v1849_v3  ;;  %v2041_v0 = vsel %vm2034_vm14, %v2024_v28, %v1816_v58  ;;  %v1752_v56 = vmax.f32 %v1615_v29, %v1720_v30  ;;  %v3051_v51 = vsel %vm399_vm0, %v3049_v23, %v3050_v52 }
 0x1ee   : > { %8982 = vst [vmem:[#allocation11_spill] sm:$0xff] %v6828_v17  ;;  %v2058_v7 = vsel %vm2051_vm15, %v2041_v0, %v1848_v10  ;;  %v2076_v12 = vsel %vm2068_vm5, %v2059_v27, %v1897_v54  ;;  %v3149_v22 = vsel %vm399_vm0, %v3050_v52, 0.0  ;;  %v1993_v63 = vrot.slane %v1753_v53, 7 }
 0x1ef   : > { %v2092_v21 = vsel %vm1434_vm3, %v2076_v12, %v1929_v11  ;;  %v1896_v41 = vrot.slane %v1752_v56, 4  ;;  %v1928_v1 = vrot.slane %v1752_v56, 5  ;;  %v1960_v48 = vrot.slane %v1752_v56, 6 }
 0x1f0   : > { %v2108_v50 = vsel %vm1435_vm4, %v2092_v21, %v1961_v16  ;;  %v6836_v3 = vpack.c.bf16 %v3051_v51, %v3133_v20  ;;  %v6838_v37 = vpack.c.bf16 %v3149_v22, %v3149_v22  ;;  %v1992_v30 = vrot.slane %v1752_v56, 7 }
 0x1f1   : > { %v2125_v29 = vsel %vm825_vm1, %v2108_v50, %v1993_v63  ;;  %v2075_v59 = vsel %vm2068_vm5, %v2058_v7, %v1896_v41  ;;  %v6842_v23 = vpack.c.bf16 %v3150_v38, %v3150_v38  ;;  %v3437_v2 = vshrl.u32 %v6828_v17, 16 }
 0x1f2   : > { %v2091_v53 = vsel %vm1434_vm3, %v2075_v59, %v1928_v1  ;;  %v3427_v52 = vshll.u32 %v6836_v3, 16  ;;  %v3432_v58 = vshll.u32 %v6838_v37, 16  ;;  %v3655_v26 = vrot.slane %v6836_v3, 1  ;;  %v6873_v59 = vpop.permute.xlu0 %2247 }
 0x1f3   : > { %8983 = vst [vmem:[#allocation12_spill] sm:$0xff] %v6842_v23  ;;  %v2107_v20 = vsel %vm1435_vm4, %v2091_v53, %v1960_v48  ;;  %v3656_v10 = vrot.slane %v6838_v37, 1  ;;  %v3439_v54 = vshll.u32 %v6828_v17, 16  ;;  %v3425_v15 = vshrl.u32 %v6836_v3, 16 }
 0x1f4   : > { %v2124_v11 = vsel %vm825_vm1, %v2107_v20, %v1992_v30  ;;  %v3429_v28 = vrot.slane %v3427_v52, 1  ;;  %v3444_v16 = vshll.u32 %v6842_v23, 16  ;;  %v3658_v56 = vrot.slane %v6828_v17, 1 }
 0x1f5   : > { %v2137_v38 = vmax.f32 %v2124_v11, %v2125_v29  ;;  %v6856_v27 = vsel %vm825_vm1, %v3655_v26, %v3656_v10  ;;  %v3441_v0 = vrot.slane %v3439_v54, 1  ;;  %v3434_v12 = vrot.slane %v3432_v58, 1  ;;  %v6880_v58 = vpop.permute.xlu1 %2366 }
 0x1f6   : > { %8984 = vst [vmem:[#allocation13_spill] sm:$0xff] %v6856_v27  ;;  %v3430_v7 = vor.u32 %v3429_v28, %v3425_v15  ;;  %v3659_v51 = vrot.slane %v6842_v23, 1  ;;  %v3446_v21 = vrot.slane %v3444_v16, 1  ;;  %8987 = vst [vmem:[#allocation16_spill] sm:$0xff] %v6880_v58 }
 0x1f7   : > { %v2153_v22 = vrot.slane %v2137_v38, 7  ;;  %v3442_v63 = vor.u32 %v3441_v0, %v3437_v2  ;;  %v6893_v0 = vpop.permute.xlu0 %2279 }
 0x1f8   : > { %v6861_v41 = vsel %vm568_vm2, %v3430_v7, %v3434_v12  ;;  %v6864_v1 = vsel %vm825_vm1, %v3658_v56, %v3659_v51 }
 0x1f9   : > { %8985 = vst [vmem:[#allocation14_spill] sm:$0xff] %v6864_v1  ;;  %v2169_v50 = vsel %vm399_vm0, 0.0, %v2153_v22  ;;  %v2177_v48 = vsel %vm399_vm0, %v2153_v22, 0.0  ;;  %v6869_v29 = vsel %vm568_vm2, %v3442_v63, %v3446_v21 }
 0x1fa   : > { %8986 = vst [vmem:[#allocation15_spill] sm:$0xff] %v6869_v29  ;;  %v6871_v30 = vpack.c.bf16 %v2177_v48, %v2169_v50  ;;  %v6896_v48 = vpop.permute.xlu1 %2382 }
 0x1fb   : > { %8988 = vst [vmem:[#allocation17_spill] sm:$0xff] %v6896_v48 }
 0x1fc   : > { %2302 = vrot.lane.b32.xlu1 %v6871_v30, %s5876_s12  ;;  %2356 = vrot.lane.b32.xlu0 %v6871_v30, %s5872_s27  ;;  %v2222_v53 = vshll.u32 %v6871_v30, 16  ;;  %v6884_v20 = vrot.slane %v6871_v30, 1  ;;  %v2220_v38 = vshrl.u32 %v6871_v30, 16 }
 0x1fd   : > { %v5724_v52 = vpop.f32.mrb[16].mxu0 }
 0x1fe   : > { %v1548_v2 = vadd.f32 %v5724_v52, %v6552_v33  ;;  %v1539_v26 = vpop.f32.mrb[17].mxu0  ;;  %v2224_v10 = vrot.slane %v2222_v53, 1 }
 0x1ff   : > { %v1540_v54 = vadd.f32 %v6552_v33, %v1539_v26  ;;  %v5725_v11 = vpop.f32.mrb[18].mxu0 }
 0x200   : > { %v1620_v15 = vmax.f32 %v1548_v2, 0.0  ;;  %2342 = vrot.lane.b32.xlu1 %v6884_v20, %s5877_s13  ;;  %2287 = vrot.lane.b32.xlu0 %v6884_v20, %s5875_s11  ;;  %v1551_v28 = vadd.f32 %v5725_v11, %v6552_v33  ;;  %v1542_v16 = vpop.f32.mrb[19].mxu0  ;;  %v2225_v63 = vor.u32 %v2224_v10, %v2220_v38  ;;  %v6901_v38 = vpop.permute.xlu0 %3206 }
 0x201   : > { %v1618_v56 = vmax.f32 %v1540_v54, 0.0  ;;  %v1543_v7 = vadd.f32 %v6552_v33, %v1542_v16  ;;  %8989 = vst [vmem:[#allocation18_spill] sm:$0xff] %v6901_v38  ;;  %v6910_v38 = vpop.permute.xlu1 %3210 }
 0x202   : > { %v1659_v12 = vrot.slane %v1620_v15, 1  ;;  %v3058_v51 = vrot.slane %v1620_v15, 7  ;;  %v1621_v22 = vmax.f32 %v1551_v28, 0.0  ;;  %8990 = vst [vmem:[#allocation19_spill] sm:$0xff] %v6910_v38 }
 0x203   : > { %v1658_v21 = vrot.slane %v1618_v56, 1  ;;  %v1619_v50 = vmax.f32 %v1543_v7, 0.0  ;;  %v3055_v11 = vrot.slane %v1618_v56, 7 }
 0x204   : > { %v1691_v53 = vmax.f32 %v1620_v15, %v1659_v12  ;;  %v1723_v52 = vrot.slane %v1621_v22, 1  ;;  %v3059_v2 = vrot.slane %v1621_v22, 7  ;;  %2325 = vrot.lane.b32.xlu1 %v2225_v63, %s5878_s16  ;;  %2372 = vrot.lane.b32.xlu0 %v2225_v63, %s5874_s29  ;;  %v3136_v26 = vsel %vm399_vm0, 0.0, %v3058_v51 }
 0x205   : > { %v1690_v54 = vmax.f32 %v1618_v56, %v1658_v21  ;;  %v1722_v33 = vrot.slane %v1619_v50, 1  ;;  %v3056_v10 = vrot.slane %v1619_v50, 7 }
 0x206   : > { %v1787_v16 = vrot.slane %v1691_v53, 1  ;;  %v1819_v14 = vrot.slane %v1691_v53, 2  ;;  %v1755_v28 = vmax.f32 %v1621_v22, %v1723_v52  ;;  %v1851_v7 = vrot.slane %v1691_v53, 3 }
 0x207   : > { %v1786_v61 = vrot.slane %v1690_v54, 1  ;;  %v1818_v15 = vrot.slane %v1690_v54, 2  ;;  %v3060_v12 = vsel %vm399_vm0, %v3058_v51, %v3059_v2  ;;  %v1850_v5 = vrot.slane %v1690_v54, 3 }
 0x208   : > { %v2027_v40 = vsel %vm399_vm0, %v1691_v53, %v1787_v16  ;;  %v1899_v18 = vrot.slane %v1755_v28, 4  ;;  %v1931_v19 = vrot.slane %v1755_v28, 5  ;;  %2255 = vrot.lane.b32.xlu0 %v2225_v63, %s5873_s28  ;;  %v1963_v22 = vrot.slane %v1755_v28, 6 }
 0x209   : > { %v2044_v56 = vsel %vm2034_vm14, %v2027_v40, %v1819_v14  ;;  %v2026_v21 = vsel %vm399_vm0, %v1690_v54, %v1786_v61  ;;  %v3152_v52 = vsel %vm399_vm0, %v3059_v2, 0.0  ;;  %v6913_v48 = vpack.c.bf16 %v3060_v12, %v3136_v26 }
 0x20a   : > { %v2061_v4 = vsel %vm2051_vm15, %v2044_v56, %v1851_v7  ;;  %v2043_v51 = vsel %vm2034_vm14, %v2026_v21, %v1818_v15  ;;  %v1754_v53 = vmax.f32 %v1619_v50, %v1722_v33  ;;  %v3057_v40 = vsel %vm399_vm0, %v3055_v11, %v3056_v10  ;;  %v6921_v56 = vpop.permute.xlu0 %3334 }
 0x20b   : > { %8991 = vst [vmem:[#allocation20_spill] sm:$0xff] %v6913_v48  ;;  %v2060_v16 = vsel %vm2051_vm15, %v2043_v51, %v1850_v5  ;;  %v2078_v63 = vsel %vm2068_vm5, %v2061_v4, %v1899_v18  ;;  %v3151_v61 = vsel %vm399_vm0, %v3056_v10, 0.0  ;;  %v3135_v14 = vsel %vm399_vm0, 0.0, %v3055_v11  ;;  %8992 = vst [vmem:[#allocation21_spill] sm:$0xff] %v6921_v56 }
 0x20c   : > { %v1995_v2 = vrot.slane %v1755_v28, 7  ;;  %v2094_v54 = vsel %vm1434_vm3, %v2078_v63, %v1931_v19  ;;  %v1898_v7 = vrot.slane %v1754_v53, 4  ;;  %v1930_v15 = vrot.slane %v1754_v53, 5 }
 0x20d   : > { %v2110_v26 = vsel %vm1435_vm4, %v2094_v54, %v1963_v22  ;;  %v6924_v50 = vpack.c.bf16 %v3057_v40, %v3135_v14  ;;  %v6926_v5 = vpack.c.bf16 %v3151_v61, %v3151_v61  ;;  %v1962_v18 = vrot.slane %v1754_v53, 6  ;;  %v6936_v22 = vpop.permute.xlu1 %4397 }
 0x20e   : > { %v2127_v4 = vsel %vm825_vm1, %v2110_v26, %v1995_v2  ;;  %v2077_v33 = vsel %vm2068_vm5, %v2060_v16, %v1898_v7  ;;  %v6930_v10 = vpack.c.bf16 %v3152_v52, %v3152_v52  ;;  %v1994_v11 = vrot.slane %v1754_v53, 7  ;;  %8996 = vst [vmem:[#allocation25_spill] sm:$0xff] %v6936_v22  ;;  %v6949_v26 = vpop.permute.xlu0 %3532 }
 0x20f   : > { %8993 = vst [vmem:[#allocation22_spill] sm:$0xff] %v6924_v50  ;;  %8994 = vst [vmem:[#allocation23_spill] sm:$0xff] %v6926_v5  ;;  %v2093_v19 = vsel %vm1434_vm3, %v2077_v33, %v1930_v15  ;;  %v3449_v28 = vshrl.u32 %v6924_v50, 16  ;;  %v3451_v12 = vshll.u32 %v6924_v50, 16  ;;  %v3456_v51 = vshll.u32 %v6926_v5, 16 }
 0x210   : > { %8995 = vst [vmem:[#allocation24_spill] sm:$0xff] %v6930_v10  ;;  %v2109_v21 = vsel %vm1435_vm4, %v2093_v19, %v1962_v18  ;;  %v3661_v63 = vrot.slane %v6924_v50, 1  ;;  %v3662_v40 = vrot.slane %v6926_v5, 1  ;;  %v3463_v53 = vshll.u32 %v6913_v48, 16  ;;  %8998 = vst [vmem:[#allocation27_spill] sm:$0xff] %v6949_v26 }
 0x211   : > { %v2126_v52 = vsel %vm825_vm1, %v2109_v21, %v1994_v11  ;;  %v3453_v16 = vrot.slane %v3451_v12, 1  ;;  %v3468_v61 = vshll.u32 %v6930_v10, 16  ;;  %v3461_v54 = vshrl.u32 %v6913_v48, 16 }
 0x212   : > { %v2138_v14 = vmax.f32 %v2126_v52, %v2127_v4  ;;  %v6945_v2 = vsel %vm825_vm1, %v3661_v63, %v3662_v40  ;;  %v3664_v7 = vrot.slane %v6913_v48, 1  ;;  %v3458_v18 = vrot.slane %v3456_v51, 1  ;;  %v6958_v40 = vpop.permute.xlu1 %3859 }
 0x213   : > { %8997 = vst [vmem:[#allocation26_spill] sm:$0xff] %v6945_v2  ;;  %v3454_v15 = vor.u32 %v3453_v16, %v3449_v28  ;;  %v3465_v33 = vrot.slane %v3463_v53, 1  ;;  %v3665_v11 = vrot.slane %v6930_v10, 1  ;;  %v3470_v4 = vrot.slane %v3468_v61, 1  ;;  %9001 = vst [vmem:[#allocation30_spill] sm:$0xff] %v6958_v40  ;;  %v6967_v16 = vpop.permute.xlu0 %3604 }
 0x214   : > { %v2154_v19 = vrot.slane %v2138_v14, 7  ;;  %9003 = vst [vmem:[#allocation32_spill] sm:$0xff] %v6967_v16 }
 0x215   : > { %v6953_v12 = vsel %vm568_vm2, %v3454_v15, %v3458_v18  ;;  %v3466_v21 = vor.u32 %v3465_v33, %v3461_v54  ;;  %v6956_v63 = vsel %vm825_vm1, %v3664_v7, %v3665_v11  ;;  %v6991_v33 = vld [vmem:[%s8909_s2] ss:$0 sm:$0xff] }
 0x216   : > { %8999 = vst [vmem:[#allocation28_spill] sm:$0xff] %v6953_v12  ;;  %9000 = vst [vmem:[#allocation29_spill] sm:$0xff] %v6956_v63  ;;  %v2170_v52 = vsel %vm399_vm0, 0.0, %v2154_v19  ;;  %v2178_v26 = vsel %vm399_vm0, %v2154_v19, 0.0  ;;  %v6977_v54 = vpop.permute.xlu1 %3699 }
 0x217   : > { %v6962_v28 = vpack.c.bf16 %v2178_v26, %v2170_v52  ;;  %v6965_v51 = vsel %vm568_vm2, %v3466_v21, %v3470_v4  ;;  %9004 = vst [vmem:[#allocation33_spill] sm:$0xff] %v6977_v54  ;;  %v6984_v26 = vpop.permute.xlu0 %3701 }
 0x218   : > { %9002 = vst [vmem:[#allocation31_spill] sm:$0xff] %v6965_v51  ;;  %9005 = vst [vmem:[#allocation34_spill] sm:$0xff] %v6984_v26 }
 0x219   : > { %2304 = vrot.lane.b32.xlu0 %v6962_v28, %s5876_s12  ;;  %2358 = vrot.lane.b32.xlu1 %v6962_v28, %s5872_s27  ;;  %v2229_v53 = vshll.u32 %v6962_v28, 16  ;;  %v6975_v61 = vrot.slane %v6962_v28, 1  ;;  %v2227_v7 = vshrl.u32 %v6962_v28, 16 }
 0x21a   : > { %v6994_v21 = vpop.permute.xlu1 %3759 }
 0x21b   : > { %v2231_v14 = vrot.slane %v2229_v53, 1  ;;  %9006 = vst [vmem:[#allocation35_spill] sm:$0xff] %v6994_v21  ;;  %v6999_v54 = vpop.permute.xlu0 %3208 }
 0x21c   : > { %9007 = vst [vmem:[#allocation36_spill] sm:$0xff] %v6999_v54 }
 0x21d   : > { %2344 = vrot.lane.b32.xlu0 %v6975_v61, %s5877_s13  ;;  %2289 = vrot.lane.b32.xlu1 %v6975_v61, %s5875_s11  ;;  %v2232_v15 = vor.u32 %v2231_v14, %v2227_v7 }
 0x21e   : > { %v7003_v58 = vpop.permute.xlu1 %2281 }
 0x220   : > { %v5728_v18 = vpop.f32.mrb[20].mxu0 }
 0x221   : > { %2374 = vrot.lane.b32.xlu1 %v2232_v15, %s5874_s29  ;;  %2327 = vrot.lane.b32.xlu0 %v2232_v15, %s5878_s16  ;;  %v1564_v11 = vadd.f32 %v6991_v33, %v5728_v18  ;;  %v1555_v19 = vpop.f32.mrb[21].mxu0 }
 0x222   : > { %v1556_v4 = vadd.f32 %v6991_v33, %v1555_v19  ;;  %v5729_v52 = vpop.f32.mrb[22].mxu0  ;;  %v2250_v17 = vpop.permute.xlu1 %2249 }
 0x223   : > { %v1624_v53 = vmax.f32 %v1564_v11, 0.0  ;;  %v1567_v14 = vadd.f32 %v6991_v33, %v5729_v52  ;;  %v1558_v7 = vpop.f32.mrb[23].mxu0 }
 0x224   : > { %v1622_v40 = vmax.f32 %v1556_v4, 0.0  ;;  %v1559_v26 = vadd.f32 %v6991_v33, %v1558_v7 }
 0x225   : > { %v1661_v16 = vrot.slane %v1624_v53, 1  ;;  %v3064_v56 = vrot.slane %v1624_v53, 7  ;;  %v1625_v22 = vmax.f32 %v1567_v14, 0.0  ;;  %3907 = vrot.lane.b32.xlu1 %v6620_v45, %s5874_s29 }
 0x226   : > { %v1660_v18 = vrot.slane %v1622_v40, 1  ;;  %v3061_v21 = vrot.slane %v1622_v40, 7  ;;  %v1623_v38 = vmax.f32 %v1559_v26, 0.0 }
 0x227   : > { %v1693_v19 = vmax.f32 %v1624_v53, %v1661_v16  ;;  %v1725_v63 = vrot.slane %v1625_v22, 1  ;;  %v3065_v11 = vrot.slane %v1625_v22, 7  ;;  %v3138_v4 = vsel %vm399_vm0, 0.0, %v3064_v56  ;;  %v7009_v53 = vpop.permute.xlu0 %3811 }
 0x228   : > { %v1692_v52 = vmax.f32 %v1622_v40, %v1660_v18  ;;  %v3137_v7 = vsel %vm399_vm0, 0.0, %v3061_v21  ;;  %v1724_v14 = vrot.slane %v1623_v38, 1  ;;  %v3062_v16 = vrot.slane %v1623_v38, 7  ;;  %9008 = vst [vmem:[#allocation37_spill] sm:$0xff] %v7009_v53 }
 0x229   : > { %v1789_v54 = vrot.slane %v1693_v19, 1  ;;  %v1821_v51 = vrot.slane %v1693_v19, 2  ;;  %v1757_v10 = vmax.f32 %v1625_v22, %v1725_v63  ;;  %2257 = vrot.lane.b32.xlu1 %v2232_v15, %s5873_s28  ;;  %v3066_v26 = vsel %vm399_vm0, %v3064_v56, %v3065_v11 }
 0x22a   : > { %v1788_v2 = vrot.slane %v1692_v52, 1  ;;  %v1820_v48 = vrot.slane %v1692_v52, 2  ;;  %v1853_v12 = vrot.slane %v1693_v19, 3  ;;  %v1852_v50 = vrot.slane %v1692_v52, 3 }
 0x22b   : > { %v2029_v5 = vsel %vm399_vm0, %v1693_v19, %v1789_v54  ;;  %v1901_v40 = vrot.slane %v1757_v10, 4  ;;  %v1933_v22 = vrot.slane %v1757_v10, 5  ;;  %v1965_v63 = vrot.slane %v1757_v10, 6 }
 0x22c   : > { %v2046_v18 = vsel %vm2034_vm14, %v2029_v5, %v1821_v51  ;;  %v2028_v1 = vsel %vm399_vm0, %v1692_v52, %v1788_v2  ;;  %v7016_v23 = vpack.c.bf16 %v3066_v26, %v3138_v4  ;;  %v1756_v56 = vmax.f32 %v1623_v38, %v1724_v14  ;;  %v2297_v51 = vpop.permute.xlu0 %2296 }
 0x22d   : > { %v2063_v15 = vsel %vm2051_vm15, %v2046_v18, %v1853_v12  ;;  %v2045_v29 = vsel %vm2034_vm14, %v2028_v1, %v1820_v48  ;;  %v3063_v19 = vsel %vm399_vm0, %v3061_v21, %v3062_v16  ;;  %v3153_v5 = vsel %vm399_vm0, %v3062_v16, 0.0 }
 0x22e   : > { %9009 = vst [vmem:[#allocation38_spill] sm:$0xff] %v7016_v23  ;;  %v2062_v53 = vsel %vm2051_vm15, %v2045_v29, %v1852_v50  ;;  %v2080_v54 = vsel %vm2068_vm5, %v2063_v15, %v1901_v40  ;;  %v1997_v2 = vrot.slane %v1757_v10, 7  ;;  %v3154_v12 = vsel %vm399_vm0, %v3065_v11, 0.0  ;;  %v2299_v26 = vpop.permute.xlu1 %2298 }
 0x22f   : > { %v2096_v52 = vsel %vm1434_vm3, %v2080_v54, %v1933_v22  ;;  %v1900_v18 = vrot.slane %v1756_v56, 4  ;;  %v1932_v48 = vrot.slane %v1756_v56, 5  ;;  %v1964_v38 = vrot.slane %v1756_v56, 6 }
 0x230   : > { %v2112_v1 = vsel %vm1435_vm4, %v2096_v52, %v1965_v63  ;;  %v7025_v4 = vpack.c.bf16 %v3063_v19, %v3137_v7  ;;  %v1996_v50 = vrot.slane %v1756_v56, 7  ;;  %v7029_v14 = vpack.c.bf16 %v3153_v5, %v3153_v5  ;;  %v2337_v5 = vpop.permute.xlu0 %2336 }
 0x231   : > { %v2129_v29 = vsel %vm825_vm1, %v2112_v1, %v1997_v2  ;;  %v2079_v21 = vsel %vm2068_vm5, %v2062_v53, %v1900_v18  ;;  %v7038_v15 = vpack.c.bf16 %v3154_v12, %v3154_v12  ;;  %v3485_v54 = vshrl.u32 %v7016_v23, 16 }
 0x232   : > { %9010 = vst [vmem:[#allocation39_spill] sm:$0xff] %v7025_v4  ;;  %9011 = vst [vmem:[#allocation40_spill] sm:$0xff] %v7029_v14  ;;  %v2095_v10 = vsel %vm1434_vm3, %v2079_v21, %v1932_v48  ;;  %v3473_v16 = vshrl.u32 %v7025_v4, 16  ;;  %v3475_v11 = vshll.u32 %v7025_v4, 16  ;;  %v3667_v40 = vrot.slane %v7025_v4, 1 }
 0x233   : > { %v2111_v22 = vsel %vm1435_vm4, %v2095_v10, %v1964_v38  ;;  %v3480_v7 = vshll.u32 %v7029_v14, 16  ;;  %v3668_v63 = vrot.slane %v7029_v14, 1  ;;  %9012 = vst [vmem:[#allocation41_spill] sm:$0xff] %v7038_v15  ;;  %v3487_v19 = vshll.u32 %v7016_v23, 16 }
 0x234   : > { %v2128_v53 = vsel %vm825_vm1, %v2111_v22, %v1996_v50  ;;  %v3477_v56 = vrot.slane %v3475_v11, 1  ;;  %v3492_v1 = vshll.u32 %v7038_v15, 16  ;;  %v3670_v12 = vrot.slane %v7016_v23, 1  ;;  %v2339_v11 = vpop.permute.xlu1 %2338 }
 0x235   : > { %v2139_v2 = vmax.f32 %v2128_v53, %v2129_v29  ;;  %v3482_v52 = vrot.slane %v3480_v7, 1  ;;  %v7044_v18 = vsel %vm825_vm1, %v3667_v40, %v3668_v63  ;;  %v3489_v38 = vrot.slane %v3487_v19, 1  ;;  %v2320_v19 = vpop.permute.xlu0 %2319 }
 0x236   : > { %9013 = vst [vmem:[#allocation42_spill] sm:$0xff] %v7044_v18  ;;  %v3478_v48 = vor.u32 %v3477_v56, %v3473_v16  ;;  %v3671_v21 = vrot.slane %v7038_v15, 1  ;;  %v2386_v50 = vsel %vm2384_vm6, %v5946_v6, %v6873_v59  ;;  %v3494_v22 = vrot.slane %v3492_v1, 1 }
 0x237   : > { %v2155_v10 = vrot.slane %v2139_v2, 7  ;;  %v3490_v40 = vor.u32 %v3489_v38, %v3485_v54  ;;  %v2403_v53 = vsel %vm2401_vm7, %v2386_v50, %v6893_v0  ;;  %v2388_v54 = vsel %vm2384_vm6, %v6613_v13, %v2250_v17 }
 0x238   : > { %v7053_v29 = vsel %vm568_vm2, %v3478_v48, %v3482_v52  ;;  %v7056_v7 = vsel %vm825_vm1, %v3670_v12, %v3671_v21  ;;  %v2420_v0 = vsel %vm2418_vm8, %v2403_v53, %v2297_v51  ;;  %v2322_v48 = vpop.permute.xlu1 %2321  ;;  %v2405_v21 = vsel %vm2401_vm7, %v2388_v54, %v7003_v58 }
 0x239   : > { %9014 = vst [vmem:[#allocation43_spill] sm:$0xff] %v7053_v29  ;;  %9015 = vst [vmem:[#allocation44_spill] sm:$0xff] %v7056_v7  ;;  %v2171_v16 = vsel %vm399_vm0, 0.0, %v2155_v10  ;;  %v2179_v63 = vsel %vm399_vm0, %v2155_v10, 0.0  ;;  %v7065_v56 = vsel %vm568_vm2, %v3490_v40, %v3494_v22  ;;  %v2437_v1 = vsel %vm2435_vm9, %v2420_v0, %v2320_v19  ;;  %v2353_v40 = vpop.permute.xlu0 %2352 }
 0x23a   : > { %v7062_v59 = vpack.c.bf16 %v2179_v63, %v2171_v16  ;;  %9017 = vst [vmem:[#allocation46_spill] sm:$0xff] %v7065_v56  ;;  %v2422_v51 = vsel %vm2418_vm8, %v2405_v21, %v2299_v26  ;;  %v2454_v58 = vsel %vm2452_vm10, %v2437_v1, %v2337_v5 }
 0x23b   : > { %v2439_v19 = vsel %vm2435_vm9, %v2422_v51, %v2322_v48 }
 0x23c   : > { %9016 = vst [vmem:[#allocation45_spill] sm:$0xff] %v7062_v59  ;;  %2360 = vrot.lane.b32.xlu0 %v7062_v59, %s5872_s27  ;;  %2306 = vrot.lane.b32.xlu1 %v7062_v59, %s5876_s12  ;;  %v2236_v2 = vshll.u32 %v7062_v59, 16  ;;  %v7078_v12 = vrot.slane %v7062_v59, 1  ;;  %v2234_v53 = vshrl.u32 %v7062_v59, 16  ;;  %v2456_v5 = vsel %vm2452_vm10, %v2439_v19, %v2339_v11 }
 0x23d   : > { %v5732_v52 = vpop.f32.mrb[24].mxu0 }
 0x23e   : > { %v1580_v38 = vadd.f32 %v6991_v33, %v5732_v52  ;;  %v1571_v13 = vpop.f32.mrb[25].mxu0  ;;  %v2238_v17 = vrot.slane %v2236_v2, 1 }
 0x23f   : > { %v1572_v50 = vadd.f32 %v6991_v33, %v1571_v13  ;;  %v5733_v10 = vpop.f32.mrb[26].mxu0  ;;  %v7094_v13 = vsel %vm2469_vm11, %v2454_v58, %v2353_v40 }
 0x240   : > { %v1628_v22 = vmax.f32 %v1580_v38, 0.0  ;;  %2291 = vrot.lane.b32.xlu0 %v7078_v12, %s5875_s11  ;;  %2346 = vrot.lane.b32.xlu1 %v7078_v12, %s5877_s13  ;;  %v1583_v16 = vadd.f32 %v6991_v33, %v5733_v10  ;;  %v1574_v63 = vpop.f32.mrb[27].mxu0  ;;  %v2239_v38 = vor.u32 %v2238_v17, %v2234_v53 }
 0x241   : > { %v1626_v54 = vmax.f32 %v1572_v50, 0.0  ;;  %v1575_v26 = vadd.f32 %v6991_v33, %v1574_v63 }
 0x242   : > { %v1663_v2 = vrot.slane %v1628_v22, 1  ;;  %v3070_v0 = vrot.slane %v1628_v22, 7  ;;  %v1629_v52 = vmax.f32 %v1583_v16, 0.0 }
 0x243   : > { %v1662_v21 = vrot.slane %v1626_v54, 1  ;;  %v3067_v7 = vrot.slane %v1626_v54, 7  ;;  %v1627_v10 = vmax.f32 %v1575_v26, 0.0 }
 0x244   : > { %v1695_v56 = vmax.f32 %v1628_v22, %v1663_v2  ;;  %v1727_v15 = vrot.slane %v1629_v52, 1  ;;  %v3071_v23 = vrot.slane %v1629_v52, 7  ;;  %2376 = vrot.lane.b32.xlu0 %v2239_v38, %s5874_s29  ;;  %2329 = vrot.lane.b32.xlu1 %v2239_v38, %s5878_s16  ;;  %v3140_v1 = vsel %vm399_vm0, 0.0, %v3070_v0 }
 0x245   : > { %v1694_v48 = vmax.f32 %v1626_v54, %v1662_v21  ;;  %v3139_v17 = vsel %vm399_vm0, 0.0, %v3067_v7  ;;  %v1726_v50 = vrot.slane %v1627_v10, 1  ;;  %v3068_v63 = vrot.slane %v1627_v10, 7 }
 0x246   : > { %v1791_v51 = vrot.slane %v1695_v56, 1  ;;  %v1823_v40 = vrot.slane %v1695_v56, 2  ;;  %v1759_v16 = vmax.f32 %v1629_v52, %v1727_v15  ;;  %v1855_v53 = vrot.slane %v1695_v56, 3 }
 0x247   : > { %v1790_v22 = vrot.slane %v1694_v48, 1  ;;  %v1822_v58 = vrot.slane %v1694_v48, 2  ;;  %v3072_v26 = vsel %vm399_vm0, %v3070_v0, %v3071_v23  ;;  %v1854_v18 = vrot.slane %v1694_v48, 3 }
 0x248   : > { %v2031_v2 = vsel %vm399_vm0, %v1695_v56, %v1791_v51  ;;  %v1903_v29 = vrot.slane %v1759_v16, 4  ;;  %v1935_v11 = vrot.slane %v1759_v16, 5  ;;  %2259 = vrot.lane.b32.xlu0 %v2239_v38, %s5873_s28  ;;  %v1967_v21 = vrot.slane %v1759_v16, 6  ;;  %v7110_v56 = vpop.permute.xlu0 %2283 }
 0x249   : > { %v2048_v19 = vsel %vm2034_vm14, %v2031_v2, %v1823_v40  ;;  %v2030_v54 = vsel %vm399_vm0, %v1694_v48, %v1790_v22  ;;  %v1999_v15 = vrot.slane %v1759_v16, 7  ;;  %v7108_v4 = vpack.c.bf16 %v3072_v26, %v3140_v1 }
 0x24a   : > { %v2065_v52 = vsel %vm2051_vm15, %v2048_v19, %v1855_v53  ;;  %v2047_v14 = vsel %vm2034_vm14, %v2030_v54, %v1822_v58  ;;  %v1758_v0 = vmax.f32 %v1627_v10, %v1726_v50  ;;  %v3069_v59 = vsel %vm399_vm0, %v3067_v7, %v3068_v63 }
 0x24b   : > { %v2064_v51 = vsel %vm2051_vm15, %v2047_v14, %v1854_v18  ;;  %v2082_v38 = vsel %vm2068_vm5, %v2065_v52, %v1903_v29  ;;  %v3155_v40 = vsel %vm399_vm0, %v3068_v63, 0.0  ;;  %v2355_v48 = vpop.permute.xlu1 %2354  ;;  %v3156_v53 = vsel %vm399_vm0, %v3071_v23, 0.0 }
 0x24c   : > { %v2098_v16 = vsel %vm1434_vm3, %v2082_v38, %v1935_v11  ;;  %v1902_v22 = vrot.slane %v1758_v0, 4  ;;  %v1934_v58 = vrot.slane %v1758_v0, 5  ;;  %v1966_v10 = vrot.slane %v1758_v0, 6 }
 0x24d   : > { %v2114_v1 = vsel %vm1435_vm4, %v2098_v16, %v1967_v21  ;;  %v1998_v50 = vrot.slane %v1758_v0, 7  ;;  %v7119_v26 = vpack.c.bf16 %v3069_v59, %v3139_v17  ;;  %v2473_v29 = vsel %vm2469_vm11, %v2456_v5, %v2355_v48  ;;  %v2369_v5 = vpop.permute.xlu0 %2368 }
 0x24e   : > { %v2131_v14 = vsel %vm825_vm1, %v2114_v1, %v1999_v15  ;;  %v2081_v18 = vsel %vm2068_vm5, %v2064_v51, %v1902_v22  ;;  %v7124_v7 = vpack.c.bf16 %v3155_v40, %v3155_v40  ;;  %v7135_v21 = vpack.c.bf16 %v3156_v53, %v3156_v53 }
 0x24f   : > { %v2097_v63 = vsel %vm1434_vm3, %v2081_v18, %v1934_v58  ;;  %v7127_v2 = vpop.permute.xlu1 %2285  ;;  %v3497_v23 = vshrl.u32 %v7119_v26, 16  ;;  %v3499_v11 = vshll.u32 %v7119_v26, 16  ;;  %v3673_v19 = vrot.slane %v7119_v26, 1 }
 0x250   : > { %v2113_v59 = vsel %vm1435_vm4, %v2097_v63, %v1966_v10  ;;  %v3504_v17 = vshll.u32 %v7124_v7, 16  ;;  %v3674_v54 = vrot.slane %v7124_v7, 1  ;;  %v3509_v0 = vshrl.u32 %v7108_v4, 16 }
 0x251   : > { %v2130_v15 = vsel %vm825_vm1, %v2113_v59, %v1998_v50  ;;  %v3501_v52 = vrot.slane %v3499_v11, 1  ;;  %v3511_v51 = vshll.u32 %v7108_v4, 16  ;;  %v3516_v16 = vshll.u32 %v7135_v21, 16 }
 0x252   : > { %v2140_v38 = vmax.f32 %v2130_v15, %v2131_v14  ;;  %v3506_v40 = vrot.slane %v3504_v17, 1  ;;  %v7141_v48 = vsel %vm825_vm1, %v3673_v19, %v3674_v54  ;;  %v3676_v53 = vrot.slane %v7108_v4, 1 }
 0x253   : > { %9018 = vst [vmem:[#allocation47_spill] sm:$0xff] %v7141_v48  ;;  %v2371_v22 = vpop.permute.xlu1 %2370  ;;  %v3502_v58 = vor.u32 %v3501_v52, %v3497_v23  ;;  %v3513_v1 = vrot.slane %v3511_v51, 1  ;;  %v3677_v10 = vrot.slane %v7135_v21, 1  ;;  %v2488_v50 = vsel %vm2486_vm12, %v7094_v13, %v2369_v5 }
 0x254   : > { %v2156_v18 = vrot.slane %v2140_v38, 7  ;;  %v2490_v63 = vsel %vm2486_vm12, %v2473_v29, %v2371_v22  ;;  %v3518_v59 = vrot.slane %v3516_v16, 1  ;;  %v5439_v23 = vcombine.low %v6884_v20, %v6975_v61 }
 0x255   : > { %v5436_v14 = vcombine.low %v2488_v50, %v2490_v63  ;;  %v7150_v11 = vsel %vm568_vm2, %v3502_v58, %v3506_v40  ;;  %v3514_v19 = vor.u32 %v3513_v1, %v3509_v0  ;;  %v7157_v15 = vsel %vm825_vm1, %v3676_v53, %v3677_v10 }
 0x256   : > { %v2172_v17 = vsel %vm399_vm0, 0.0, %v2156_v18  ;;  %v2180_v54 = vsel %vm399_vm0, %v2156_v18, 0.0  ;;  %9019 = vst [vmem:[#allocation48_spill] sm:$0xff] %v7157_v15 }
 0x257   : > { %2663 = vmatmul.mubr.bf16.vlgmr.msra.gmra.mrb[0].mxu1 %v5436_v14  ;;  %v7159_v13 = vpack.c.bf16 %v2180_v54, %v2172_v17  ;;  %v7162_v29 = vsel %vm568_vm2, %v3514_v19, %v3518_v59 }
 0x258   : > { %9020 = vst [vmem:[#allocation49_spill] sm:$0xff] %v7162_v29  ;;  %5454 = vmatprep.mubr.msk.bf16.mxu1 %vm2384_vm6, %v5439_v23 }
 0x259   : > { %2308 = vrot.lane.b32.xlu0 %v7159_v13, %s5876_s12  ;;  %2362 = vrot.lane.b32.xlu1 %v7159_v13, %s5872_s27  ;;  %v2243_v20 = vshll.u32 %v7159_v13, 16  ;;  %v7171_v61 = vrot.slane %v7159_v13, 1  ;;  %v2241_v52 = vshrl.u32 %v7159_v13, 16 }
 0x25b   : > { %v2245_v5 = vrot.slane %v2243_v20, 1 }
 0x25d   : > { %2348 = vrot.lane.b32.xlu0 %v7171_v61, %s5877_s13  ;;  %2293 = vrot.lane.b32.xlu1 %v7171_v61, %s5875_s11  ;;  %v2246_v0 = vor.u32 %v2245_v5, %v2241_v52 }
 0x261   : > { %3534 = vrot.lane.b32.xlu0 %v6608_v24, %s5877_s13  ;;  %2378 = vrot.lane.b32.xlu1 %v2246_v0, %s5874_s29 }
 0x265   : > { %3212 = vrot.lane.b32.xlu0 %v6651_v43, %s5875_s11  ;;  %3761 = vrot.lane.b32.xlu1 %v6620_v45, %s5872_s27  ;;  %v5736_v51 = vpop.f32.mrb[28].mxu0 }
 0x266   : > { %v1596_v38 = vadd.f32 %v6991_v33, %v5736_v51  ;;  %v1587_v40 = vpop.f32.mrb[29].mxu0 }
 0x267   : > { %v1588_v16 = vadd.f32 %v6991_v33, %v1587_v40  ;;  %v5737_v22 = vpop.f32.mrb[30].mxu0 }
 0x268   : > { %v1632_v58 = vmax.f32 %v1596_v38, 0.0  ;;  %v1599_v1 = vadd.f32 %v6991_v33, %v5737_v22  ;;  %v1590_v53 = vpop.f32.mrb[31].mxu0  ;;  %v7202_v22 = vpop.permute.xlu0 %2251 }
 0x269   : > { %4399 = vrot.lane.b32.xlu0 %v6653_v31, %s5875_s11  ;;  %3813 = vrot.lane.b32.xlu1 %v6611_v39, %s5873_s28  ;;  %v1630_v24 = vmax.f32 %v1588_v16, 0.0  ;;  %v1591_v10 = vadd.f32 %v6991_v33, %v1590_v53 }
 0x26a   : > { %v1665_v50 = vrot.slane %v1632_v58, 1  ;;  %v1633_v18 = vmax.f32 %v1599_v1, 0.0  ;;  %v3076_v59 = vrot.slane %v1632_v58, 7 }
 0x26b   : > { %v1664_v63 = vrot.slane %v1630_v24, 1  ;;  %v7193_v14 = vmax.f32 %v1591_v10, 0.0  ;;  %v3073_v54 = vrot.slane %v1630_v24, 7 }
 0x26c   : > { %v1697_v19 = vmax.f32 %v1632_v58, %v1665_v50  ;;  %v1729_v23 = vrot.slane %v1633_v18, 1  ;;  %v3077_v17 = vrot.slane %v1633_v18, 7 }
 0x26d   : > { %3703 = vrot.lane.b32.xlu0 %v6651_v43, %s5876_s12  ;;  %3861 = vrot.lane.b32.xlu1 %v6651_v43, %s5878_s16  ;;  %v1696_v31 = vmax.f32 %v1630_v24, %v1664_v63  ;;  %v1728_v52 = vrot.slane %v7193_v14, 1  ;;  %v3142_v43 = vsel %vm399_vm0, 0.0, %v3076_v59  ;;  %v9022_v15 = vrot.slane %v7193_v14, 7 }
 0x26e   : > { %v1793_v20 = vrot.slane %v1697_v19, 1  ;;  %v1825_v5 = vrot.slane %v1697_v19, 2  ;;  %v1761_v33 = vmax.f32 %v1633_v18, %v1729_v23  ;;  %v3078_v40 = vsel %vm399_vm0, %v3076_v59, %v3077_v17 }
 0x26f   : > { %v1792_v51 = vrot.slane %v1696_v31, 1  ;;  %v1824_v38 = vrot.slane %v1696_v31, 2  ;;  %v1857_v58 = vrot.slane %v1697_v19, 3  ;;  %v1856_v10 = vrot.slane %v1696_v31, 3 }
 0x270   : > { %v2033_v1 = vsel %vm399_vm0, %v1697_v19, %v1793_v20  ;;  %v1905_v53 = vrot.slane %v1761_v33, 4  ;;  %v1937_v18 = vrot.slane %v1761_v33, 5  ;;  %v7213_v16 = vpack.c.bf16 %v3078_v40, %v3142_v43 }
 0x271   : > { %2331 = vrot.lane.b32.xlu0 %v2246_v0, %s5878_s16  ;;  %3909 = vrot.lane.b32.xlu1 %v6680_v62, %s5874_s29  ;;  %v2050_v24 = vsel %vm2034_vm14, %v2033_v1, %v1825_v5  ;;  %v2032_v50 = vsel %vm399_vm0, %v1696_v31, %v1792_v51  ;;  %v1760_v19 = vmax.f32 %v7193_v14, %v1728_v52  ;;  %v1969_v20 = vrot.slane %v1761_v33, 6  ;;  %v2301_v1 = vpop.permute.xlu0 %2300 }
 0x272   : > { %v2067_v63 = vsel %vm2051_vm15, %v2050_v24, %v1857_v58  ;;  %v2049_v23 = vsel %vm2034_vm14, %v2032_v50, %v1824_v38  ;;  %9021 = vst [vmem:[#allocation50_spill] sm:$0xff] %v7213_v16  ;;  %v3075_v5 = vsel %vm399_vm0, %v3073_v54, %v9022_v15  ;;  %v3141_v31 = vsel %vm399_vm0, 0.0, %v3073_v54  ;;  %v2254_v24 = vpop.permute.xlu1 %2253 }
 0x273   : > { %v2066_v59 = vsel %vm2051_vm15, %v2049_v23, %v1856_v10  ;;  %v2084_v39 = vsel %vm2068_vm5, %v2067_v63, %v1905_v53  ;;  %v2001_v51 = vrot.slane %v1761_v33, 7  ;;  %v1904_v38 = vrot.slane %v1760_v19, 4 }
 0x274   : > { %v2100_v58 = vsel %vm1434_vm3, %v2084_v39, %v1937_v18  ;;  %v1936_v40 = vrot.slane %v1760_v19, 5  ;;  %v7225_v43 = vpack.c.bf16 %v3075_v5, %v3141_v31  ;;  %v3158_v53 = vsel %vm399_vm0, %v3077_v17, 0.0 }
 0x275   : > { %2261 = vrot.lane.b32.xlu1 %v2246_v0, %s5873_s28  ;;  %v2116_v52 = vsel %vm1435_vm4, %v2100_v58, %v1969_v20  ;;  %v1968_v10 = vrot.slane %v1760_v19, 6  ;;  %v2083_v15 = vsel %vm2068_vm5, %v2066_v59, %v1904_v38  ;;  %v2000_v54 = vrot.slane %v1760_v19, 7  ;;  %v2341_v63 = vpop.permute.xlu0 %2340 }
 0x276   : > { %v2133_v50 = vsel %vm825_vm1, %v2116_v52, %v2001_v51  ;;  %v2099_v33 = vsel %vm1434_vm3, %v2083_v15, %v1936_v40  ;;  %v7233_v18 = vpack.c.bf16 %v3158_v53, %v3158_v53  ;;  %v2303_v23 = vpop.permute.xlu1 %2302  ;;  %v3750_v5 = vshll.u32 %v7213_v16, 16 }
 0x277   : > { %v2115_v39 = vsel %vm1435_vm4, %v2099_v33, %v1968_v10  ;;  %v3808_v59 = vrot.slane %v7213_v16, 1  ;;  %v3748_v19 = vshrl.u32 %v7213_v16, 16 }
 0x278   : > { %v2132_v0 = vsel %vm825_vm1, %v2115_v39, %v2000_v54  ;;  %9023 = vst [vmem:[#allocation51_spill] sm:$0xff] %v7233_v18  ;;  %v3755_v31 = vshll.u32 %v7233_v18, 16  ;;  %v3752_v51 = vrot.slane %v3750_v5, 1  ;;  %v3809_v58 = vrot.slane %v7233_v18, 1 }
 0x279   : > { %v2141_v20 = vmax.f32 %v2132_v0, %v2133_v50  ;;  %v2324_v50 = vpop.permute.xlu0 %2323 }
 0x27a   : > { %v3753_v53 = vor.u32 %v3752_v51, %v3748_v19  ;;  %v3757_v10 = vrot.slane %v3755_v31, 1  ;;  %v7245_v15 = vsel %vm825_vm1, %v3808_v59, %v3809_v58  ;;  %v2343_v54 = vpop.permute.xlu1 %2342  ;;  %v2390_v19 = vsel %vm2384_vm6, %v6695_v34, %v7202_v22 }
 0x27b   : > { %v2157_v17 = vrot.slane %v2141_v20, 7  ;;  %9024 = vst [vmem:[#allocation52_spill] sm:$0xff] %v7245_v15  ;;  %v2392_v51 = vsel %vm2384_vm6, %v6795_v36, %v2254_v24 }
 0x27c   : > { %v7253_v39 = vsel %vm568_vm2, %v3753_v53, %v3757_v10  ;;  %v2409_v53 = vsel %vm2401_vm7, %v2392_v51, %v7127_v2 }
 0x27d   : > { %v2173_v38 = vsel %vm399_vm0, 0.0, %v2157_v17  ;;  %v2181_v52 = vsel %vm399_vm0, %v2157_v17, 0.0  ;;  %9025 = vst [vmem:[#allocation53_spill] sm:$0xff] %v7253_v39  ;;  %v2357_v17 = vpop.permute.xlu0 %2356  ;;  %v2426_v34 = vsel %vm2418_vm8, %v2409_v53, %v2303_v23 }
 0x27e   : > { %v7242_v40 = vpack.c.bf16 %v2181_v52, %v2173_v38  ;;  %v2326_v59 = vpop.permute.xlu1 %2325  ;;  %v2407_v52 = vsel %vm2401_vm7, %v2390_v19, %v7110_v56 }
 0x27f   : > { %v2424_v10 = vsel %vm2418_vm8, %v2407_v52, %v2301_v1  ;;  %v2443_v22 = vsel %vm2435_vm9, %v2426_v34, %v2326_v59 }
 0x280   : > { %2364 = vrot.lane.b32.xlu0 %v7242_v40, %s5872_s27  ;;  %2310 = vrot.lane.b32.xlu1 %v7242_v40, %s5876_s12  ;;  %v2315_v33 = vshll.u32 %v7242_v40, 16  ;;  %v2335_v0 = vrot.slane %v7242_v40, 1  ;;  %v2313_v20 = vshrl.u32 %v7242_v40, 16  ;;  %v2441_v36 = vsel %vm2435_vm9, %v2424_v10, %v2324_v50  ;;  %v9026_v10 = vld [vmem:[#allocation11_spill] sm:$0xff]  ;;  %v9030_v40 = vld [vmem:[#allocation14_spill] sm:$0xff] }
 0x281   : > { %v7267_v58 = vpop.permute.xlu0 %2287  ;;  %v2458_v56 = vsel %vm2452_vm10, %v2441_v36, %v2341_v63  ;;  %v2460_v2 = vsel %vm2452_vm10, %v2443_v22, %v2343_v54  ;;  %v5441_v63 = vcombine.low %v7078_v12, %v7171_v61 }
 0x282   : > { %v2317_v5 = vrot.slane %v2315_v33, 1  ;;  %v2475_v1 = vsel %vm2469_vm11, %v2458_v56, %v2357_v17 }
 0x284   : > { %2350 = vrot.lane.b32.xlu1 %v2335_v0, %s5877_s13  ;;  %v2318_v31 = vor.u32 %v2317_v5, %v2313_v20 }
 0x285   : > { %v2373_v33 = vpop.permute.xlu0 %2372 }
 0x286   : > { %2380 = vrot.lane.b32.xlu0 %v2318_v31, %s5874_s29  ;;  %v2492_v50 = vsel %vm2486_vm12, %v2475_v1, %v2373_v33  ;;  %v9027_v1 = vld [vmem:[#allocation12_spill] sm:$0xff] }
 0x288   : > { %2333 = vrot.lane.b32.xlu1 %v2318_v31, %s5878_s16 }
 0x28a   : > { %3763 = vrot.lane.b32.xlu0 %v6680_v62, %s5872_s27 }
 0x28b   : > { %v2359_v38 = vpop.permute.xlu1 %2358 }
 0x28c   : > { %3536 = vrot.lane.b32.xlu1 %v6620_v45, %s5877_s13  ;;  %v2477_v45 = vsel %vm2469_vm11, %v2460_v2, %v2359_v38 }
 0x28e   : > { %3815 = vrot.lane.b32.xlu0 %v6671_v47, %s5873_s28 }
 0x28f   : > { %v2290_v24 = vpop.permute.xlu1 %2289 }
 0x290   : > { %3214 = vrot.lane.b32.xlu1 %v6643_v35, %s5875_s11 }
 0x292   : > { %3863 = vrot.lane.b32.xlu0 %v6643_v35, %s5878_s16 }
 0x293   : > { %v2375_v23 = vpop.permute.xlu1 %2374 }
 0x294   : > { %v2494_v20 = vsel %vm2486_vm12, %v2477_v45, %v2375_v23  ;;  %4401 = vrot.lane.b32.xlu1 %v6657_v49, %s5875_s11  ;;  %v2256_v49 = vpop.permute.xlu0 %2255  ;;  %v9028_v45 = vrot.slane %v5946_v6, 1 }
 0x295   : > { %v5438_v5 = vcombine.low %v2492_v50, %v2494_v20  ;;  %v2394_v17 = vsel %vm2384_vm6, %v6871_v30, %v2256_v49  ;;  %v9029_v20 = vld [vmem:[#allocation15_spill] sm:$0xff] }
 0x296   : > { %3911 = vrot.lane.b32.xlu0 %v6692_v32, %s5874_s29  ;;  %v5443_v23 = vcombine.low %v2335_v0, %v9028_v45 }
 0x297   : > { %2671 = vmatmul.mubr.bf16.gmra.mrb[4].mxu1 %v5438_v5  ;;  %v7324_v12 = vpop.permute.xlu1 %3907 }
 0x298   : > { %5455 = vmatprep.mubr.msk.bf16.mxu1 %vm2384_vm6, %v5441_v63  ;;  %3705 = vrot.lane.b32.xlu1 %v6643_v35, %s5876_s12  ;;  %v2305_v35 = vpop.permute.xlu0 %2304  ;;  %v9031_v63 = vld [vmem:[#allocation22_spill] sm:$0xff] }
 0x29a   : > { %3765 = vrot.lane.b32.xlu0 %v6692_v32, %s5872_s27 }
 0x29c   : > { %3538 = vrot.lane.b32.xlu1 %v6680_v62, %s5877_s13  ;;  %v2345_v62 = vpop.permute.xlu0 %2344 }
 0x29e   : > { %3817 = vrot.lane.b32.xlu0 %v6683_v9, %s5873_s28  ;;  %v5838_v9 = vld [vmem:[%s8912_s5 + $0x18] sm:$0xff]  }
 0x2a0   : > { %3216 = vrot.lane.b32.xlu1 %v6748_v60, %s5875_s11 }
 0x2a2   : > { %3865 = vrot.lane.b32.xlu0 %v6748_v60, %s5878_s16 }
 0x2a4   : > { %4403 = vrot.lane.b32.xlu1 %v6750_v46, %s5875_s11  ;;  %v2328_v46 = vpop.permute.xlu0 %2327 }
 0x2a6   : > { %3913 = vrot.lane.b32.xlu0 %v6781_v25, %s5874_s29 }
 0x2a8   : > { %3707 = vrot.lane.b32.xlu1 %v6748_v60, %s5876_s12 }
 0x2aa   : > { %3540 = vrot.lane.b32.xlu0 %v6692_v32, %s5877_s13  ;;  %v2258_v32 = vpop.permute.xlu1 %2257 }
 0x2ab   : > { %v2396_v31 = vsel %vm2384_vm6, %v6962_v28, %v2258_v32 }
 0x2ac   : > { %3767 = vrot.lane.b32.xlu1 %v6781_v25, %s5872_s27  ;;  %v2413_v51 = vsel %vm2401_vm7, %v2396_v31, %v2290_v24  ;;  %v9037_v31 = vld [vmem:[#allocation45_spill] sm:$0xff] }
 0x2ae   : > { %3218 = vrot.lane.b32.xlu0 %v6736_v44, %s5875_s11  ;;  %v2361_v60 = vpop.permute.xlu0 %2360  ;;  %v2307_v61 = vpop.permute.xlu1 %2306 }
 0x2af   : > { %v2430_v30 = vsel %vm2418_vm8, %v2413_v51, %v2307_v61  ;;  %v9034_v61 = vld [vmem:[#allocation20_spill] sm:$0xff] }
 0x2b0   : > { %3819 = vrot.lane.b32.xlu1 %v6773_v57, %s5873_s28 }
 0x2b2   : > { %4405 = vrot.lane.b32.xlu0 %v6755_v8, %s5875_s11  ;;  %v7338_v54 = vpop.permute.xlu0 %2291  ;;  %v2347_v8 = vpop.permute.xlu1 %2346 }
 0x2b4   : > { %3867 = vrot.lane.b32.xlu1 %v6736_v44, %s5878_s16 }
 0x2b6   : > { %3709 = vrot.lane.b32.xlu0 %v6736_v44, %s5876_s12  ;;  %v2377_v44 = vpop.permute.xlu0 %2376 }
 0x2b8   : > { %3915 = vrot.lane.b32.xlu1 %v6793_v55, %s5874_s29 }
 0x2ba   : > { %3542 = vrot.lane.b32.xlu0 %v6781_v25, %s5877_s13  ;;  %v2330_v25 = vpop.permute.xlu1 %2329  ;;  %v2260_v59 = vpop.permute.xlu0 %2259 }
 0x2bb   : > { %v2447_v52 = vsel %vm2435_vm9, %v2430_v30, %v2330_v25 }
 0x2bc   : > { %3769 = vrot.lane.b32.xlu1 %v6793_v55, %s5872_s27  ;;  %v2464_v34 = vsel %vm2452_vm10, %v2447_v52, %v2347_v8  ;;  %v9038_v52 = vld [vmem:[#allocation31_spill] sm:$0xff] }
 0x2be   : > { %3220 = vrot.lane.b32.xlu0 %v6836_v3, %s5875_s11 }
 0x2c0   : > { %3821 = vrot.lane.b32.xlu1 %v6784_v42, %s5873_s28 }
 0x2c2   : > { %4407 = vrot.lane.b32.xlu0 %v6838_v37, %s5875_s11  ;;  %v2411_v37 = vsel %vm2401_vm7, %v2394_v17, %v7267_v58  ;;  %v9036_v17 = vld [vmem:[#allocation24_spill] sm:$0xff] }
 0x2c4   : > { %3869 = vrot.lane.b32.xlu1 %v6836_v3, %s5878_s16 }
 0x2c6   : > { %3711 = vrot.lane.b32.xlu0 %v6836_v3, %s5876_s12  ;;  %v2428_v3 = vsel %vm2418_vm8, %v2411_v37, %v2305_v35 }
 0x2c7   : > { %v2445_v38 = vsel %vm2435_vm9, %v2428_v3, %v2328_v46 }
 0x2c8   : > { %3917 = vrot.lane.b32.xlu1 %v6861_v41, %s5874_s29  ;;  %v2462_v58 = vsel %vm2452_vm10, %v2445_v38, %v2345_v62  ;;  %v9032_v62 = vld [vmem:[#allocation23_spill] sm:$0xff] }
 0x2c9   : > { %v2479_v36 = vsel %vm2469_vm11, %v2462_v58, %v2361_v60 }
 0x2ca   : > { %3771 = vrot.lane.b32.xlu0 %v6861_v41, %s5872_s27  ;;  %v2496_v24 = vsel %vm2486_vm12, %v2479_v36, %v2377_v44  ;;  %v9035_v44 = vld [vmem:[#allocation26_spill] sm:$0xff] }
 0x2cb   : > { %v2363_v19 = vpop.permute.xlu1 %2362  ;;  %v2309_v28 = vpop.permute.xlu0 %2308 }
 0x2cc   : > { %3544 = vrot.lane.b32.xlu1 %v6793_v55, %s5877_s13  ;;  %v2481_v55 = vsel %vm2469_vm11, %v2464_v34, %v2363_v19  ;;  %v2398_v19 = vsel %vm2384_vm6, %v9037_v31, %v2260_v59 }
 0x2cd   : > { %v2415_v30 = vsel %vm2401_vm7, %v2398_v19, %v7338_v54 }
 0x2ce   : > { %3823 = vrot.lane.b32.xlu0 %v6856_v27, %s5873_s28  ;;  %v2432_v38 = vsel %vm2418_vm8, %v2415_v30, %v2309_v28 }
 0x2cf   : > { %v2294_v53 = vpop.permute.xlu1 %2293  ;;  %v2349_v33 = vpop.permute.xlu0 %2348 }
 0x2d0   : > { %3222 = vrot.lane.b32.xlu1 %v9026_v10, %s5875_s11 }
 0x2d2   : > { %3871 = vrot.lane.b32.xlu0 %v9026_v10, %s5878_s16 }
 0x2d3   : > { %v2379_v22 = vpop.permute.xlu1 %2378  ;;  %v7394_v5 = vpop.permute.xlu0 %3534 }
 0x2d4   : > { %v2498_v56 = vsel %vm2486_vm12, %v2481_v55, %v2379_v22  ;;  %4409 = vrot.lane.b32.xlu1 %v9027_v1, %s5875_s11  ;;  %v9040_v1 = vld [vmem:[#allocation39_spill] sm:$0xff] }
 0x2d5   : > { %v5440_v2 = vcombine.low %v2496_v24, %v2498_v56 }
 0x2d6   : > { %3919 = vrot.lane.b32.xlu0 %v9029_v20, %s5874_s29 }
 0x2d7   : > { %v7387_v50 = vpop.permute.xlu1 %3761  ;;  %2679 = vmatmul.mubr.bf16.gmra.mrb[8].mxu1 %v5440_v2  ;;  %v7404_v0 = vpop.permute.xlu0 %3212 }
 0x2d8   : > { %5456 = vmatprep.mubr.msk.bf16.mxu1 %vm2384_vm6, %v5443_v23  ;;  %3713 = vrot.lane.b32.xlu1 %v9026_v10, %s5876_s12 }
 0x2da   : > { %3773 = vrot.lane.b32.xlu0 %v9029_v20, %s5872_s27 }
 0x2db   : > { %v7398_v6 = vpop.permute.xlu1 %3813  ;;  %v7412_v35 = vpop.permute.xlu0 %4399 }
 0x2dc   : > { %3546 = vrot.lane.b32.xlu1 %v6861_v41, %s5877_s13  ;;  %v9033_v41 = vld [vmem:[#allocation28_spill] sm:$0xff] }
 0x2de   : > { %3825 = vrot.lane.b32.xlu0 %v9030_v40, %s5873_s28 }
 0x2df   : > { %v7408_v49 = vpop.permute.xlu1 %3861  ;;  %v7422_v32 = vpop.permute.xlu0 %3703 }
 0x2e0   : > { %3224 = vrot.lane.b32.xlu1 %v9031_v63, %s5875_s11 }
 0x2e2   : > { %3873 = vrot.lane.b32.xlu0 %v9031_v63, %s5878_s16 }
 0x2e3   : > { %v7418_v46 = vpop.permute.xlu1 %3909  ;;  %v2332_v8 = vpop.permute.xlu0 %2331 }
 0x2e4   : > { %4411 = vrot.lane.b32.xlu1 %v9032_v62, %s5875_s11  ;;  %v2449_v58 = vsel %vm2435_vm9, %v2432_v38, %v2332_v8  ;;  %v9044_v8 = vld [vmem:[#allocation43_spill] sm:$0xff]  ;;  %v9050_v38 = vld [vmem:[#allocation41_spill] sm:$0xff] }
 0x2e5   : > { %v2466_v54 = vsel %vm2452_vm10, %v2449_v58, %v2349_v33  ;;  %v9041_v33 = vld [vmem:[#allocation17_spill] sm:$0xff]  ;;  %v9052_v58 = vld [vmem:[#allocation46_spill] sm:$0xff] }
 0x2e6   : > { %3921 = vrot.lane.b32.xlu0 %v9033_v41, %s5874_s29 }
 0x2e7   : > { %v2262_v60 = vpop.permute.xlu1 %2261 }
 0x2e8   : > { %3715 = vrot.lane.b32.xlu1 %v9031_v63, %s5876_s12  ;;  %v2400_v51 = vsel %vm2384_vm6, %v7159_v13, %v2262_v60 }
 0x2e9   : > { %v2417_v10 = vsel %vm2401_vm7, %v2400_v51, %v2294_v53  ;;  %v9039_v53 = vld [vmem:[#allocation16_spill] sm:$0xff]  ;;  %v9048_v51 = vld [vmem:[#allocation38_spill] sm:$0xff] }
 0x2ea   : > { %3548 = vrot.lane.b32.xlu0 %v9029_v20, %s5877_s13  ;;  %v9042_v20 = vld [vmem:[#allocation29_spill] sm:$0xff] }
 0x2ec   : > { %3775 = vrot.lane.b32.xlu1 %v9033_v41, %s5872_s27 }
 0x2ee   : > { %3226 = vrot.lane.b32.xlu0 %v9034_v61, %s5875_s11 }
 0x2f0   : > { %3827 = vrot.lane.b32.xlu1 %v9035_v44, %s5873_s28 }
 0x2f2   : > { %v2311_v25 = vpop.permute.xlu1 %2310  ;;  %4413 = vrot.lane.b32.xlu0 %v9036_v17, %s5875_s11  ;;  %v2365_v37 = vpop.permute.xlu0 %2364 }
 0x2f3   : > { %v2434_v34 = vsel %vm2418_vm8, %v2417_v10, %v2311_v25  ;;  %v2483_v22 = vsel %vm2469_vm11, %v2466_v54, %v2365_v37  ;;  %v9047_v37 = vld [vmem:[#allocation42_spill] sm:$0xff]  ;;  %v9056_v54 = vld [vmem:[#allocation44_spill] sm:$0xff] }
 0x2f4   : > { %3875 = vrot.lane.b32.xlu1 %v9034_v61, %s5878_s16 }
 0x2f6   : > { %v2351_v3 = vpop.permute.xlu1 %2350  ;;  %3717 = vrot.lane.b32.xlu0 %v9034_v61, %s5876_s12 }
 0x2f8   : > { %3923 = vrot.lane.b32.xlu1 %v9038_v52, %s5874_s29  ;;  %v2381_v59 = vpop.permute.xlu0 %2380 }
 0x2f9   : > { %v2500_v56 = vsel %vm2486_vm12, %v2483_v22, %v2381_v59 }
 0x2fa   : > { %v2334_v13 = vpop.permute.xlu1 %2333  ;;  %3550 = vrot.lane.b32.xlu0 %v9033_v41, %s5877_s13  ;;  %v9043_v41 = vld [vmem:[#allocation40_spill] sm:$0xff] }
 0x2fb   : > { %v2451_v36 = vsel %vm2435_vm9, %v2434_v34, %v2334_v13 }
 0x2fc   : > { %v2468_v28 = vsel %vm2452_vm10, %v2451_v36, %v2351_v3  ;;  %3777 = vrot.lane.b32.xlu1 %v9038_v52, %s5872_s27  ;;  %v7457_v55 = vpop.permute.xlu0 %3763 }
 0x2fd   : > { %v2485_v24 = vsel %vm2469_vm11, %v2468_v28, %v9039_v53  ;;  %v5825_v28 = vld [vmem:[%s8912_s5 + $0x80] sm:$0xff]   ;;  %v9057_v53 = vmov 0  }
 0x2fe   : > { %v7463_v2 = vpop.permute.xlu1 %3536  ;;  %3228 = vrot.lane.b32.xlu0 %v9040_v1, %s5875_s11  ;;  %v2502_v45 = vsel %vm2486_vm12, %v2485_v24, %v9041_v33  ;;  %4978 = vmatpush1.bf16.msra.mxu0 %v5825_v28 }
 0x2ff   : > { %v5442_v23 = vcombine.low %v2500_v56, %v2502_v45  ;;  %4979 = vmatprep.subr.bf16.mxu0 %v9057_v53  ;;  %v5826_v56 = vld [vmem:[%s8912_s5 + $0x88] sm:$0xff]   ;;  %v7560_v45 = vld [vmem:[%s8911_s4] ss:$0 sm:$0xff] }
 0x300   : > { %3829 = vrot.lane.b32.xlu1 %v9042_v20, %s5873_s28  ;;  %v7471_v63 = vpop.permute.xlu0 %3815 }
 0x301   : > { %2687 = vmatmul.mubr.bf16.gmra.mrb[12].mxu1 %v5442_v23  ;;  %v5827_v23 = vld [vmem:[%s8912_s5 + $0x90] sm:$0xff]  }
 0x302   : > { %v7473_v62 = vpop.permute.xlu1 %3214  ;;  %4415 = vrot.lane.b32.xlu0 %v9043_v41, %s5875_s11  ;;  %4980 = vmatpush1.bf16.msra.mxu0 %v5826_v56 }
 0x303   : > { %4981 = vmatprep.subr.bf16.mxu0 %v9057_v53 }
 0x304   : > { %3877 = vrot.lane.b32.xlu1 %v9040_v1, %s5878_s16  ;;  %v7479_v60 = vpop.permute.xlu0 %3863 }
 0x306   : > { %v7481_v61 = vpop.permute.xlu1 %4401  ;;  %3719 = vrot.lane.b32.xlu0 %v9040_v1, %s5876_s12  ;;  %4982 = vmatpush1.bf16.msra.mxu0 %v5827_v23  ;;  %v5830_v23 = vld [vmem:[%s8912_s5 + $0x98] sm:$0xff]  }
 0x307   : > { %4983 = vmatprep.subr.bf16.mxu0 %v9057_v53 }
 0x308   : > { %3925 = vrot.lane.b32.xlu1 %v9044_v8, %s5874_s29  ;;  %v7487_v25 = vpop.permute.xlu0 %3911 }
 0x309   : > { %9045 = vst [vmem:[#allocation11_spill] sm:$0xff] %v7487_v25 }
 0x30a   : > { %v7489_v17 = vpop.permute.xlu1 %3705  ;;  %3779 = vrot.lane.b32.xlu0 %v9044_v8, %s5872_s27  ;;  %4984 = vmatpush1.bf16.msra.mxu0 %v5830_v23  ;;  %v5833_v23 = vld [vmem:[%s8912_s5 + $0xa0] sm:$0xff]  }
 0x30b   : > { %4985 = vmatprep.subr.bf16.mxu0 %v9057_v53 }
 0x30c   : > { %3552 = vrot.lane.b32.xlu1 %v9038_v52, %s5877_s13  ;;  %v7495_v31 = vpop.permute.xlu0 %3765 }
 0x30e   : > { %v7497_v19 = vpop.permute.xlu1 %3538  ;;  %3831 = vrot.lane.b32.xlu0 %v9047_v37, %s5873_s28  ;;  %4986 = vmatpush1.bf16.msra.mxu0 %v5833_v23 }
 0x30f   : > { %9046 = vst [vmem:[#allocation12_spill] sm:$0xff] %v7497_v19  ;;  %4987 = vmatprep.subr.bf16.mxu0 %v9057_v53 }
 0x310   : > { %3230 = vrot.lane.b32.xlu1 %v9048_v51, %s5875_s11  ;;  %v7503_v3 = vpop.permute.xlu0 %3817 }
 0x311   : > { %9049 = vst [vmem:[#allocation15_spill] sm:$0xff] %v7503_v3 }
 0x312   : > { %v7505_v30 = vpop.permute.xlu1 %3216  ;;  %3879 = vrot.lane.b32.xlu0 %v9048_v51, %s5878_s16 }
 0x314   : > { %4417 = vrot.lane.b32.xlu1 %v9050_v38, %s5875_s11  ;;  %v7511_v52 = vpop.permute.xlu0 %3865 }
 0x315   : > { %9051 = vst [vmem:[#allocation22_spill] sm:$0xff] %v7511_v52 }
 0x316   : > { %v7513_v59 = vpop.permute.xlu1 %4403  ;;  %3927 = vrot.lane.b32.xlu0 %v9052_v58, %s5874_s29 }
 0x318   : > { %3721 = vrot.lane.b32.xlu1 %v9048_v51, %s5876_s12  ;;  %v7519_v10 = vpop.permute.xlu0 %3913 }
 0x319   : > { %9053 = vst [vmem:[#allocation23_spill] sm:$0xff] %v7519_v10 }
 0x31a   : > { %v7521_v34 = vpop.permute.xlu1 %3707  ;;  %3781 = vrot.lane.b32.xlu0 %v9052_v58, %s5872_s27 }
 0x31b   : > { %9054 = vst [vmem:[#allocation28_spill] sm:$0xff] %v7521_v34 }
 0x31c   : > { %3554 = vrot.lane.b32.xlu1 %v9044_v8, %s5877_s13  ;;  %v7527_v13 = vpop.permute.xlu0 %3540  ;;  %v5828_v8 = vld [vmem:[%s8912_s5 + $0x40] sm:$0xff]  }
 0x31d   : > { %5556 = vmatprep.subr.bf16.mxu1 %v5828_v8 }
 0x31e   : > { %v7529_v36 = vpop.permute.xlu1 %3767  ;;  %3833 = vrot.lane.b32.xlu0 %v9056_v54, %s5873_s28 }
 0x31f   : > { %9055 = vst [vmem:[#allocation20_spill] sm:$0xff] %v7529_v36 }
 0x320   : > { %3232 = vrot.lane.b32.xlu1 %v7119_v26, %s5875_s11  ;;  %v7538_v22 = vpop.permute.xlu0 %3218 }
 0x322   : > { %v7541_v24 = vpop.permute.xlu1 %3819  ;;  %3881 = vrot.lane.b32.xlu0 %v7119_v26, %s5878_s16 }
 0x323   : > { %9058 = vst [vmem:[#allocation24_spill] sm:$0xff] %v7541_v24 }
 0x324   : > { %4419 = vrot.lane.b32.xlu1 %v7124_v7, %s5875_s11  ;;  %v7550_v1 = vpop.permute.xlu0 %4405 }
 0x326   : > { %v7553_v33 = vpop.permute.xlu1 %3867  ;;  %3929 = vrot.lane.b32.xlu0 %v7150_v11, %s5874_s29 }
 0x327   : > { %9059 = vst [vmem:[#allocation45_spill] sm:$0xff] %v7553_v33 }
 0x328   : > { %3723 = vrot.lane.b32.xlu1 %v7119_v26, %s5876_s12  ;;  %v7567_v7 = vpop.permute.xlu0 %3709  ;;  %v5829_v26 = vld [vmem:[%s8912_s5] sm:$0xff]  }
 0x329   : > { %9060 = vst [vmem:[#allocation31_spill] sm:$0xff] %v7567_v7  ;;  %5557 = vmatpush3.bf16.msra.mxu1 %v5829_v26  ;;  %v5834_v7 = vld [vmem:[%s8912_s5 + $0x50] sm:$0xff]  }
 0x32a   : > { %v2664_v41 = vpop.f32.mrb[0].mxu1  ;;  %v7574_v28 = vpop.permute.xlu1 %3915  ;;  %3556 = vrot.lane.b32.xlu0 %v9052_v58, %s5877_s13  ;;  %v5831_v58 = vld [vmem:[%s8912_s5 + $0x48] sm:$0xff]  }
 0x32b   : > { %v2665_v51 = vadd.f32 %v7560_v45, %v2664_v41  ;;  %v2666_v38 = vpop.f32.mrb[1].mxu1  ;;  %9061 = vst [vmem:[#allocation16_spill] sm:$0xff] %v7574_v28  ;;  %5558 = vmatprep.subr.bf16.mxu1 %v5831_v58 }
 0x32c   : > { %v2667_v56 = vpop.f32.mrb[2].mxu1  ;;  %3783 = vrot.lane.b32.xlu1 %v7150_v11, %s5872_s27  ;;  %v7589_v37 = vpop.permute.xlu0 %3542 }
 0x32d   : > { %v7584_v54 = vmax.f32 %v2665_v51, 0.0  ;;  %v2668_v41 = vadd.f32 %v7560_v45, %v2667_v56  ;;  %v2669_v38 = vpop.f32.mrb[3].mxu1  ;;  %9062 = vst [vmem:[#allocation39_spill] sm:$0xff] %v7589_v37 }
 0x32e   : > { %v7599_v56 = vpop.permute.xlu1 %3769  ;;  %3234 = vrot.lane.b32.xlu0 %v7108_v4, %s5875_s11 }
 0x32f   : > { %v2711_v8 = vrot.slane %v7584_v54, 7  ;;  %v7595_v20 = vmax.f32 %v2668_v41, 0.0  ;;  %v2727_v51 = vrot.slane %v7584_v54, 6  ;;  %v2743_v44 = vrot.slane %v7584_v54, 5  ;;  %9063 = vst [vmem:[#allocation17_spill] sm:$0xff] %v7599_v56  ;;  %v5832_v41 = vld [vmem:[%s8912_s5 + $0x8] sm:$0xff]  }
 0x330   : > { %v2759_v26 = vrot.slane %v7584_v54, 4  ;;  %v2775_v38 = vrot.slane %v7584_v54, 3  ;;  %v2791_v40 = vrot.slane %v7584_v54, 2  ;;  %v2807_v15 = vrot.slane %v7584_v54, 1  ;;  %3835 = vrot.lane.b32.xlu1 %v7141_v48, %s5873_s28  ;;  %v7621_v58 = vpop.permute.xlu0 %3220  ;;  %5559 = vmatpush3.bf16.msra.mxu1 %v5832_v41 }
 0x331   : > { %v2712_v27 = vrot.slane %v7595_v20, 7  ;;  %v2823_v37 = vsel %vm399_vm0, %v7584_v54, %v2711_v8  ;;  %v2728_v28 = vrot.slane %v7595_v20, 6  ;;  %v2744_v42 = vrot.slane %v7595_v20, 5  ;;  %5560 = vmatprep.subr.bf16.mxu1 %v5834_v7 }
 0x332   : > { %v2831_v56 = vsel %vm2034_vm14, %v2823_v37, %v2711_v8  ;;  %v2879_v36 = vsel %vm399_vm0, %v2759_v26, %v2775_v38  ;;  %v2760_v33 = vrot.slane %v7595_v20, 4  ;;  %v2776_v39 = vrot.slane %v7595_v20, 3  ;;  %v7634_v37 = vpop.permute.xlu1 %3821  ;;  %4421 = vrot.lane.b32.xlu0 %v7135_v21, %s5875_s11 }
 0x333   : > { %v2839_v34 = vsel %vm2051_vm15, %v2831_v56, %v2727_v51  ;;  %v2887_v10 = vsel %vm2034_vm14, %v2879_v36, %v2775_v38  ;;  %v2792_v48 = vrot.slane %v7595_v20, 2  ;;  %v2808_v18 = vrot.slane %v7595_v20, 1  ;;  %9064 = vst [vmem:[#allocation40_spill] sm:$0xff] %v7634_v37  ;;  %v5835_v36 = vld [vmem:[%s8912_s5 + $0x10] sm:$0xff]  }
 0x334   : > { %v2847_v8 = vsel %vm2068_vm5, %v2839_v34, %v2727_v51  ;;  %v2895_v41 = vsel %vm2051_vm15, %v2887_v10, %v2791_v40  ;;  %v2824_v57 = vsel %vm399_vm0, %v7595_v20, %v2712_v27  ;;  %v2880_v56 = vsel %vm399_vm0, %v2760_v33, %v2776_v39  ;;  %v5836_v10 = vld [vmem:[%s8912_s5 + $0xa8] sm:$0xff]   ;;  %v5837_v34 = vld [vmem:[%s8912_s5 + $0x58] sm:$0xff]   ;;  %3883 = vrot.lane.b32.xlu1 %v7108_v4, %s5878_s16  ;;  %v7658_v51 = vpop.permute.xlu0 %4407 }
 0x335   : > { %v2855_v38 = vsel %vm1434_vm3, %v2847_v8, %v2743_v44  ;;  %v2903_v23 = vsel %vm2068_vm5, %v2895_v41, %v2791_v40  ;;  %v2832_v37 = vsel %vm2034_vm14, %v2824_v57, %v2712_v27  ;;  %v2888_v21 = vsel %vm2034_vm14, %v2880_v56, %v2776_v39  ;;  %5561 = vmatpush3.bf16.msra.mxu1 %v5835_v36 }
 0x336   : > { %v2863_v40 = vsel %vm1435_vm4, %v2855_v38, %v2743_v44  ;;  %v2911_v57 = vsel %vm1434_vm3, %v2903_v23, %v2807_v15  ;;  %v2840_v27 = vsel %vm2051_vm15, %v2832_v37, %v2728_v28  ;;  %v2896_v39 = vsel %vm2051_vm15, %v2888_v21, %v2792_v48  ;;  %v7671_v44 = vpop.permute.xlu1 %3869  ;;  %3725 = vrot.lane.b32.xlu0 %v7108_v4, %s5876_s12  ;;  %v5839_v4 = vld [vmem:[%s8912_s5 + $0xb0] sm:$0xff]  }
 0x337   : > { %v2871_v7 = vsel %vm825_vm1, %v2863_v40, %v2759_v26  ;;  %v2919_v8 = vsel %vm1435_vm4, %v2911_v57, %v2807_v15  ;;  %v2848_v41 = vsel %vm2068_vm5, %v2840_v27, %v2728_v28  ;;  %v2904_v56 = vsel %vm2068_vm5, %v2896_v39, %v2792_v48  ;;  %9065 = vst [vmem:[#allocation43_spill] sm:$0xff] %v7671_v44  ;;  %v5840_v48 = vld [vmem:[%s8912_s5 + $0x60] sm:$0xff]  }
 0x338   : > { %v2927_v37 = vsel %vm825_vm1, %v2919_v8, %v7584_v54  ;;  %v2951_v26 = vrot.slane %v2871_v7, 7  ;;  %v2856_v15 = vsel %vm1434_vm3, %v2848_v41, %v2744_v42  ;;  %v2912_v28 = vsel %vm1434_vm3, %v2904_v56, %v2808_v18  ;;  %4988 = vmatpush1.bf16.msra.mxu0 %v5836_v10  ;;  %5562 = vmatprep.subr.bf16.mxu1 %v5837_v34  ;;  %v7690_v54 = vpop.permute.xlu0 %3711  ;;  %v5841_v27 = vld [vmem:[%s8912_s5 + $0x20] sm:$0xff]   ;;  %v5842_v41 = vld [vmem:[%s8912_s5 + $0xb8] sm:$0xff]  }
 0x339   : > { %v2952_v36 = vrot.slane %v2927_v37, 7  ;;  %v2864_v38 = vsel %vm1435_vm4, %v2856_v15, %v2744_v42  ;;  %v2920_v23 = vsel %vm1435_vm4, %v2912_v28, %v2808_v18  ;;  %3931 = vrot.lane.b32.xlu1 %v7162_v29, %s5874_s29  ;;  %9066 = vst [vmem:[#allocation38_spill] sm:$0xff] %v7690_v54  ;;  %4989 = vmatprep.subr.bf16.mxu0 %v9057_v53  ;;  %v9069_v37 = vld [vmem:[#allocation19_spill] sm:$0xff]  ;;  %v9070_v15 = vld [vmem:[#allocation25_spill] sm:$0xff] }
 0x33a   : > { %v2999_v21 = vsel %vm399_vm0, 0.0, %v2951_v26  ;;  %v2872_v40 = vsel %vm825_vm1, %v2864_v38, %v2760_v33  ;;  %v2928_v42 = vsel %vm825_vm1, %v2920_v23, %v7595_v20  ;;  %5563 = vmatpush3.bf16.msra.mxu1 %v5838_v9  ;;  %v7702_v39 = vpop.permute.xlu1 %3917  ;;  %3558 = vrot.lane.b32.xlu0 %v7150_v11, %s5877_s13  ;;  %v5843_v11 = vld [vmem:[%s8912_s5 + $0x68] sm:$0xff]  }
 0x33b   : > { %v2953_v18 = vsel %vm399_vm0, %v2951_v26, %v2952_v36  ;;  %v2954_v10 = vrot.slane %v2872_v40, 7  ;;  %v2955_v34 = vrot.slane %v2928_v42, 7  ;;  %v3007_v57 = vsel %vm399_vm0, %v2952_v36, 0.0  ;;  %9067 = vst [vmem:[#allocation41_spill] sm:$0xff] %v7702_v39  ;;  %5564 = vmatprep.subr.bf16.mxu1 %v5840_v48  ;;  %v5844_v23 = vld [vmem:[%s8912_s5 + $0x28] sm:$0xff]   ;;  %v5846_v40 = vld [vmem:[%s8912_s5 + $0x70] sm:$0xff]  }
 0x33c   : > { %v7706_v33 = vpack.c.bf16 %v2953_v18, %v2999_v21  ;;  %v7708_v20 = vpack.c.bf16 %v3007_v57, %v3007_v57  ;;  %4990 = vmatpush1.bf16.msra.mxu0 %v5839_v4  ;;  %v7721_v56 = vpop.permute.xlu0 %3771  ;;  %v5845_v18 = vld [vmem:[%s8912_s5 + $0xc0] sm:$0xff]   ;;  %v5847_v57 = vld [vmem:[%s8912_s5 + $0x30] sm:$0xff]  }
 0x33d   : > { %v2956_v7 = vsel %vm399_vm0, %v2954_v10, %v2955_v34  ;;  %v3000_v8 = vsel %vm399_vm0, 0.0, %v2954_v10  ;;  %v3008_v9 = vsel %vm399_vm0, %v2955_v34, 0.0  ;;  %3785 = vrot.lane.b32.xlu1 %v7162_v29, %s5872_s27  ;;  %9068 = vst [vmem:[#allocation46_spill] sm:$0xff] %v7721_v56  ;;  %4991 = vmatprep.subr.bf16.mxu0 %v9057_v53  ;;  %v9072_v10 = vld [vmem:[#allocation48_spill] sm:$0xff] }
 0x33e   : > { %v7726_v26 = vsel %vm2401_vm7, %v7706_v33, %v9069_v37  ;;  %v4432_v28 = vsel %vm2401_vm7, %v7708_v20, %v9070_v15  ;;  %v7732_v48 = vpack.c.bf16 %v2956_v7, %v3000_v8  ;;  %5565 = vmatpush3.bf16.msra.mxu1 %v5841_v27  ;;  %v7738_v4 = vpop.permute.xlu1 %3544  ;;  %3236 = vrot.lane.b32.xlu0 %v7225_v43, %s5875_s11  ;;  %v3580_v8 = vrot.slane %v7706_v33, 1  ;;  %v5849_v37 = vld [vmem:[%s8912_s5 + $0x78] sm:$0xff]  }
 0x33f   : > { %v4497_v36 = vrot.slane %v7726_v26, 1  ;;  %v4498_v38 = vrot.slane %v4432_v28, 1  ;;  %9071 = vst [vmem:[#allocation19_spill] sm:$0xff] %v7738_v4  ;;  %v7742_v21 = vpack.c.bf16 %v3008_v9, %v3008_v9  ;;  %5566 = vmatprep.subr.bf16.mxu1 %v5843_v11  ;;  %v3581_v9 = vrot.slane %v7708_v20, 1 }
 0x340   : > { %4992 = vmatpush1.bf16.msra.mxu0 %v5842_v41  ;;  %v7753_v34 = vpop.permute.xlu0 %3823  ;;  %v7763_v27 = vsel %vm2401_vm7, %v7732_v48, %v7404_v0  ;;  %v3241_v41 = vshll.u32 %v7706_v33, 16  ;;  %v5848_v0 = vld [vmem:[%s8912_s5 + $0xc8] sm:$0xff]  }
 0x341   : > { %v4499_v42 = vsel %vm825_vm1, %v4497_v36, %v4498_v38  ;;  %3837 = vrot.lane.b32.xlu1 %v9072_v10, %s5873_s28  ;;  %9073 = vst [vmem:[#allocation25_spill] sm:$0xff] %v7753_v34  ;;  %4993 = vmatprep.subr.bf16.mxu0 %v9057_v53  ;;  %v4434_v11 = vsel %vm2401_vm7, %v7742_v21, %v7412_v35  ;;  %v4500_v15 = vrot.slane %v7763_v27, 1 }
 0x342   : > { %5485 = vmatprep.mubr.msk.bf16.mxu0 %vm2418_vm8, %v4499_v42  ;;  %5567 = vmatpush3.bf16.msra.mxu1 %v5844_v23  ;;  %v7765_v7 = vpop.permute.xlu1 %3222  ;;  %v4501_v28 = vrot.slane %v4434_v11, 1  ;;  %v7785_v36 = vsel %vm2401_vm7, %v7732_v48, %v7473_v62  ;;  %v4436_v35 = vsel %vm2401_vm7, %v7742_v21, %v7481_v61  ;;  %v5850_v62 = vld [vmem:[%s8912_s5 + $0x38] sm:$0xff]   ;;  %v3582_v11 = vsel %vm825_vm1, %v3580_v8, %v3581_v9 }
 0x343   : > { %3682 = vrot.lane.b32.xlu0 %v7706_v33, %s5873_s28  ;;  %5568 = vmatprep.subr.bf16.mxu1 %v5846_v40  ;;  %v4503_v23 = vrot.slane %v7785_v36, 1  ;;  %v4504_v40 = vrot.slane %v4436_v35, 1  ;;  %v3243_v35 = vrot.slane %v3241_v41, 1  ;;  %v3246_v8 = vshll.u32 %v7708_v20, 16 }
 0x344   : > { %4994 = vmatpush1.bf16.msra.mxu0 %v5845_v18  ;;  %v7790_v38 = vpop.permute.xlu0 %3871  ;;  %v7800_v42 = vsel %vm825_vm1, %v4500_v15, %v4501_v28  ;;  %v3583_v15 = vrot.slane %v7732_v48, 1  ;;  %v3239_v28 = vshrl.u32 %v7706_v33, 16 }
 0x345   : > { %9074 = vst [vmem:[#allocation54_spill] sm:$0xff] %v7790_v38  ;;  %3845 = vrot.lane.b32.xlu1 %v7732_v48, %s5875_s11  ;;  %4995 = vmatprep.subr.bf16.mxu0 %v9057_v53  ;;  %v7807_v61 = vsel %vm825_vm1, %v4503_v23, %v4504_v40  ;;  %v3248_v40 = vrot.slane %v3246_v8, 1 }
 0x346   : > { %5569 = vmatpush3.bf16.msra.mxu1 %v5847_v57  ;;  %v7802_v18 = vpop.permute.xlu1 %4409  ;;  %v5851_v57 = vld [vmem:[%s8912_s5 + $0xd0] sm:$0xff]   ;;  %v3244_v41 = vor.u32 %v3243_v35, %v3239_v28  ;;  %v3251_v35 = vshrl.u32 %v7732_v48, 16 }
 0x347   : > { %3843 = vrot.lane.b32.xlu0 %v7706_v33, %s5875_s11  ;;  %5570 = vmatprep.subr.bf16.mxu1 %v5849_v37  ;;  %v3584_v37 = vrot.slane %v7742_v21, 1 }
 0x348   : > { %4996 = vmatpush1.bf16.msra.mxu0 %v5848_v0  ;;  %v7813_v10 = vpop.permute.xlu0 %3919  ;;  %v3253_v0 = vshll.u32 %v7732_v48, 16  ;;  %v3249_v20 = vsel %vm568_vm2, %v3244_v41, %v3248_v40 }
 0x349   : > { %9075 = vst [vmem:[#allocation55_spill] sm:$0xff] %v7813_v10  ;;  %3791 = vrot.lane.b32.xlu1 %v3582_v11, %s5874_s29  ;;  %4997 = vmatprep.subr.bf16.mxu0 %v9057_v53  ;;  %v3585_v53 = vsel %vm825_vm1, %v3583_v15, %v3584_v37 }
 0x34a   : > { %5571 = vmatpush3.bf16.msra.mxu1 %v5850_v62  ;;  %v7821_v9 = vpop.permute.xlu1 %3713  ;;  %v3255_v62 = vrot.slane %v3253_v0, 1 }
 0x34b   : > { %9076 = vst [vmem:[#allocation56_spill] sm:$0xff] %v7821_v9  ;;  %3684 = vrot.lane.b32.xlu0 %v7732_v48, %s5873_s28 }
 0x34c   : > { %4998 = vmatpush1.bf16.msra.mxu0 %v5851_v57  ;;  %v7826_v23 = vpop.permute.xlu0 %3773  ;;  %v3258_v57 = vshll.u32 %v7742_v21, 16 }
 0x34d   : > { %9077 = vst [vmem:[#allocation57_spill] sm:$0xff] %v7826_v23  ;;  %3606 = vrot.lane.b32.xlu1 %v3582_v11, %s5872_s27  ;;  %v3256_v11 = vor.u32 %v3255_v62, %v3251_v35 }
 0x34e   : > { %v7830_v10 = vpop.permute.xlu1 %3546  ;;  %v3260_v37 = vrot.slane %v3258_v57, 1 }
 0x34f   : > { %9078 = vst [vmem:[#allocation58_spill] sm:$0xff] %v7830_v10  ;;  %3793 = vrot.lane.b32.xlu0 %v3585_v53, %s5874_s29 }
 0x350   : > { %v7834_v38 = vpop.permute.xlu0 %3825  ;;  %v3261_v41 = vsel %vm568_vm2, %v3256_v11, %v3260_v37 }
 0x351   : > { %9079 = vst [vmem:[#allocation59_spill] sm:$0xff] %v7834_v38  ;;  %3731 = vrot.lane.b32.xlu1 %v3249_v20, %s5878_s16 }
 0x352   : > { %v7839_v28 = vpop.permute.xlu1 %3224 }
 0x353   : > { %3608 = vrot.lane.b32.xlu0 %v3585_v53, %s5872_s27 }
 0x354   : > { %v7842_v15 = vpop.permute.xlu0 %3873 }
 0x355   : > { %9080 = vst [vmem:[#allocation60_spill] sm:$0xff] %v7842_v15  ;;  %3891 = vrot.lane.b32.xlu1 %v3249_v20, %s5877_s13 }
 0x356   : > { %v7845_v8 = vpop.permute.xlu1 %4411 }
 0x357   : > { %3336 = vrot.lane.b32.xlu0 %v3249_v20, %s5876_s12 }
 0x358   : > { %v7849_v0 = vpop.permute.xlu0 %3921 }
 0x359   : > { %9081 = vst [vmem:[#allocation61_spill] sm:$0xff] %v7849_v0  ;;  %3893 = vrot.lane.b32.xlu1 %v3261_v41, %s5877_s13 }
 0x35a   : > { %v7852_v48 = vpop.permute.xlu1 %3715 }
 0x35b   : > { %9082 = vst [vmem:[#allocation62_spill] sm:$0xff] %v7852_v48  ;;  %3733 = vrot.lane.b32.xlu0 %v3261_v41, %s5878_s16 }
 0x35c   : > { %v7855_v21 = vpop.permute.xlu0 %3548 }
 0x35d   : > { %9083 = vst [vmem:[#allocation63_spill] sm:$0xff] %v7855_v21  ;;  %3338 = vrot.lane.b32.xlu1 %v3261_v41, %s5876_s12 }
 0x35e   : > { %v7858_v53 = vpop.permute.xlu1 %3775 }
 0x35f   : > { %9084 = vst [vmem:[#allocation64_spill] sm:$0xff] %v7858_v53 }
 0x360   : > { %v7860_v40 = vpop.permute.xlu0 %3226 }
 0x362   : > { %v7862_v62 = vpop.permute.xlu1 %3827 }
 0x363   : > { %9085 = vst [vmem:[#allocation65_spill] sm:$0xff] %v7862_v62 }
 0x364   : > { %v7864_v20 = vpop.permute.xlu0 %4413 }
 0x366   : > { %v7866_v35 = vpop.permute.xlu1 %3875 }
 0x367   : > { %9086 = vst [vmem:[#allocation66_spill] sm:$0xff] %v7866_v35 }
 0x368   : > { %v7868_v57 = vpop.permute.xlu0 %3717 }
 0x369   : > { %9087 = vst [vmem:[#allocation67_spill] sm:$0xff] %v7868_v57 }
 0x36a   : > { %v2672_v11 = vpop.f32.mrb[4].mxu1  ;;  %v7871_v0 = vpop.permute.xlu1 %3923 }
 0x36b   : > { %v2673_v37 = vadd.f32 %v7560_v45, %v2672_v11  ;;  %v2674_v48 = vpop.f32.mrb[5].mxu1  ;;  %9088 = vst [vmem:[#allocation68_spill] sm:$0xff] %v7871_v0 }
 0x36c   : > { %v2675_v15 = vpop.f32.mrb[6].mxu1  ;;  %v7874_v10 = vpop.permute.xlu0 %3550 }
 0x36d   : > { %v2697_v41 = vmax.f32 %v2673_v37, 0.0  ;;  %v2676_v53 = vadd.f32 %v7560_v45, %v2675_v15  ;;  %v2677_v38 = vpop.f32.mrb[7].mxu1  ;;  %9089 = vst [vmem:[#allocation69_spill] sm:$0xff] %v7874_v10 }
 0x36e   : > { %v7876_v35 = vpop.permute.xlu1 %3777 }
 0x36f   : > { %v2713_v62 = vrot.slane %v2697_v41, 7  ;;  %v2698_v23 = vmax.f32 %v2676_v53, 0.0  ;;  %v2729_v4 = vrot.slane %v2697_v41, 6  ;;  %v2745_v9 = vrot.slane %v2697_v41, 5  ;;  %9090 = vst [vmem:[#allocation70_spill] sm:$0xff] %v7876_v35 }
 0x370   : > { %v2761_v57 = vrot.slane %v2697_v41, 4  ;;  %v2777_v39 = vrot.slane %v2697_v41, 3  ;;  %v2793_v34 = vrot.slane %v2697_v41, 2  ;;  %v2809_v11 = vrot.slane %v2697_v41, 1  ;;  %v7879_v56 = vpop.permute.xlu0 %3228 }
 0x371   : > { %v2714_v48 = vrot.slane %v2698_v23, 7  ;;  %v2825_v0 = vsel %vm399_vm0, %v2697_v41, %v2713_v62  ;;  %v2730_v21 = vrot.slane %v2698_v23, 6  ;;  %v2746_v37 = vrot.slane %v2698_v23, 5 }
 0x372   : > { %v2833_v38 = vsel %vm2034_vm14, %v2825_v0, %v2713_v62  ;;  %v2881_v15 = vsel %vm399_vm0, %v2761_v57, %v2777_v39  ;;  %v2762_v53 = vrot.slane %v2698_v23, 4  ;;  %v2778_v10 = vrot.slane %v2698_v23, 3  ;;  %v7885_v24 = vpop.permute.xlu1 %3829 }
 0x373   : > { %v2841_v44 = vsel %vm2051_vm15, %v2833_v38, %v2729_v4  ;;  %v2889_v35 = vsel %vm2034_vm14, %v2881_v15, %v2777_v39  ;;  %v2794_v54 = vrot.slane %v2698_v23, 2  ;;  %v2810_v52 = vrot.slane %v2698_v23, 1  ;;  %9091 = vst [vmem:[#allocation71_spill] sm:$0xff] %v7885_v24 }
 0x374   : > { %v2849_v3 = vsel %vm2068_vm5, %v2841_v44, %v2729_v4  ;;  %v2897_v16 = vsel %vm2051_vm15, %v2889_v35, %v2793_v34  ;;  %v2826_v25 = vsel %vm399_vm0, %v2698_v23, %v2714_v48  ;;  %v2882_v0 = vsel %vm399_vm0, %v2762_v53, %v2778_v10  ;;  %v7895_v15 = vpop.permute.xlu0 %4415 }
 0x375   : > { %v2857_v62 = vsel %vm1434_vm3, %v2849_v3, %v2745_v9  ;;  %v2905_v19 = vsel %vm2068_vm5, %v2897_v16, %v2793_v34  ;;  %v2834_v38 = vsel %vm2034_vm14, %v2826_v25, %v2714_v48  ;;  %v2890_v39 = vsel %vm2034_vm14, %v2882_v0, %v2778_v10 }
 0x376   : > { %v2865_v24 = vsel %vm1435_vm4, %v2857_v62, %v2745_v9  ;;  %v2913_v44 = vsel %vm1434_vm3, %v2905_v19, %v2809_v11  ;;  %v2842_v4 = vsel %vm2051_vm15, %v2834_v38, %v2730_v21  ;;  %v2898_v35 = vsel %vm2051_vm15, %v2890_v39, %v2794_v54  ;;  %v7905_v34 = vpop.permute.xlu1 %3877 }
 0x377   : > { %v2873_v29 = vsel %vm825_vm1, %v2865_v24, %v2761_v57  ;;  %v2921_v3 = vsel %vm1435_vm4, %v2913_v44, %v2809_v11  ;;  %v2850_v16 = vsel %vm2068_vm5, %v2842_v4, %v2730_v21  ;;  %v2906_v25 = vsel %vm2068_vm5, %v2898_v35, %v2794_v54  ;;  %9092 = vst [vmem:[#allocation72_spill] sm:$0xff] %v7905_v34 }
 0x378   : > { %v2929_v10 = vsel %vm825_vm1, %v2921_v3, %v2697_v41  ;;  %v2957_v48 = vrot.slane %v2873_v29, 7  ;;  %v2858_v9 = vsel %vm1434_vm3, %v2850_v16, %v2746_v37  ;;  %v2914_v19 = vsel %vm1434_vm3, %v2906_v25, %v2810_v52  ;;  %v7912_v57 = vpop.permute.xlu0 %3719 }
 0x379   : > { %v2958_v0 = vrot.slane %v2929_v10, 7  ;;  %v2866_v62 = vsel %vm1435_vm4, %v2858_v9, %v2746_v37  ;;  %v2922_v24 = vsel %vm1435_vm4, %v2914_v19, %v2810_v52  ;;  %9093 = vst [vmem:[#allocation73_spill] sm:$0xff] %v7912_v57 }
 0x37a   : > { %v3001_v21 = vsel %vm399_vm0, 0.0, %v2957_v48  ;;  %v2874_v54 = vsel %vm825_vm1, %v2866_v62, %v2762_v53  ;;  %v2930_v11 = vsel %vm825_vm1, %v2922_v24, %v2698_v23  ;;  %v7919_v44 = vpop.permute.xlu1 %3925 }
 0x37b   : > { %v2959_v41 = vsel %vm399_vm0, %v2957_v48, %v2958_v0  ;;  %v2960_v29 = vrot.slane %v2874_v54, 7  ;;  %v2961_v38 = vrot.slane %v2930_v11, 7  ;;  %v3009_v39 = vsel %vm399_vm0, %v2958_v0, 0.0  ;;  %9094 = vst [vmem:[#allocation74_spill] sm:$0xff] %v7919_v44 }
 0x37c   : > { %v3019_v4 = vpack.c.bf16 %v2959_v41, %v3001_v21  ;;  %v3020_v37 = vpack.c.bf16 %v3009_v39, %v3009_v39  ;;  %v7924_v16 = vpop.permute.xlu0 %3779 }
 0x37d   : > { %v2962_v52 = vsel %vm399_vm0, %v2960_v29, %v2961_v38  ;;  %v3002_v35 = vsel %vm399_vm0, 0.0, %v2960_v29  ;;  %v3010_v3 = vsel %vm399_vm0, %v2961_v38, 0.0  ;;  %9095 = vst [vmem:[#allocation75_spill] sm:$0xff] %v7924_v16 }
 0x37e   : > { %3686 = vrot.lane.b32.xlu1 %v3019_v4, %s5873_s28  ;;  %3847 = vrot.lane.b32.xlu0 %v3019_v4, %s5875_s11  ;;  %v3021_v23 = vpack.c.bf16 %v2962_v52, %v3002_v35  ;;  %v3022_v53 = vpack.c.bf16 %v3010_v3, %v3010_v3  ;;  %v3586_v25 = vrot.slane %v3019_v4, 1  ;;  %v3587_v10 = vrot.slane %v3020_v37, 1  ;;  %v7932_v9 = vpop.permute.xlu1 %3552 }
 0x37f   : > { %v7930_v48 = vsel %vm2401_vm7, %v3019_v4, %v7505_v30  ;;  %9097 = vst [vmem:[#allocation77_spill] sm:$0xff] %v7932_v9  ;;  %v3265_v62 = vshll.u32 %v3019_v4, 16  ;;  %v4438_v21 = vsel %vm2401_vm7, %v3020_v37, %v7513_v59  ;;  %v7943_v30 = vsel %vm2401_vm7, %v3019_v4, %v7538_v22 }
 0x380   : > { %9096 = vst [vmem:[#allocation76_spill] sm:$0xff] %v7930_v48  ;;  %v3589_v19 = vrot.slane %v3021_v23, 1  ;;  %v3590_v0 = vrot.slane %v3022_v53, 1  ;;  %v7934_v24 = vpop.permute.xlu0 %3831  ;;  %v4506_v54 = vrot.slane %v7930_v48, 1  ;;  %9099 = vst [vmem:[#allocation79_spill] sm:$0xff] %v7943_v30  ;;  %v3588_v11 = vsel %vm825_vm1, %v3586_v25, %v3587_v10 }
 0x381   : > { %9098 = vst [vmem:[#allocation78_spill] sm:$0xff] %v7934_v24  ;;  %v3263_v41 = vshrl.u32 %v3019_v4, 16  ;;  %v4507_v29 = vrot.slane %v4438_v21, 1  ;;  %v4440_v39 = vsel %vm2401_vm7, %v3020_v37, %v7550_v1  ;;  %v4509_v52 = vrot.slane %v7943_v30, 1 }
 0x382   : > { %3849 = vrot.lane.b32.xlu1 %v3021_v23, %s5875_s11  ;;  %3688 = vrot.lane.b32.xlu0 %v3021_v23, %s5873_s28  ;;  %v7946_v38 = vpop.permute.xlu1 %3230  ;;  %v7953_v59 = vsel %vm2401_vm7, %v3021_v23, %v7765_v7  ;;  %v7957_v35 = vsel %vm2401_vm7, %v3021_v23, %v7621_v58  ;;  %v3591_v22 = vsel %vm825_vm1, %v3589_v19, %v3590_v0  ;;  %v3267_v3 = vrot.slane %v3265_v62, 1 }
 0x383   : > { %9100 = vst [vmem:[#allocation80_spill] sm:$0xff] %v7953_v59  ;;  %9101 = vst [vmem:[#allocation81_spill] sm:$0xff] %v7957_v35  ;;  %v7961_v4 = vsel %vm825_vm1, %v4506_v54, %v4507_v29  ;;  %v4510_v25 = vrot.slane %v4440_v39, 1  ;;  %v4515_v1 = vrot.slane %v7953_v59, 1  ;;  %v4512_v7 = vrot.slane %v7957_v35, 1 }
 0x384   : > { %v7963_v10 = vpop.permute.xlu0 %3879  ;;  %v4442_v58 = vsel %vm2401_vm7, %v3022_v53, %v7658_v51  ;;  %v4444_v19 = vsel %vm2401_vm7, %v3022_v53, %v7802_v18  ;;  %v3270_v0 = vshll.u32 %v3020_v37, 16  ;;  %v3268_v39 = vor.u32 %v3267_v3, %v3263_v41 }
 0x385   : > { %9102 = vst [vmem:[#allocation82_spill] sm:$0xff] %v7963_v10  ;;  %v7974_v62 = vsel %vm825_vm1, %v4509_v52, %v4510_v25  ;;  %v4513_v21 = vrot.slane %v4442_v58, 1  ;;  %v4516_v54 = vrot.slane %v4444_v19, 1  ;;  %v3277_v10 = vshll.u32 %v3021_v23, 16 }
 0x386   : > { %3795 = vrot.lane.b32.xlu1 %v3588_v11, %s5874_s29  ;;  %3797 = vrot.lane.b32.xlu0 %v3591_v22, %s5874_s29  ;;  %9103 = vst [vmem:[#allocation83_spill] sm:$0xff] %v7974_v62  ;;  %v7976_v29 = vpop.permute.xlu1 %4417  ;;  %v3272_v18 = vrot.slane %v3270_v0, 1  ;;  %v9108_v52 = vrot.slane %v7193_v14, 7 }
 0x387   : > { %v7979_v9 = vsel %vm825_vm1, %v4512_v7, %v4513_v21  ;;  %v7982_v16 = vsel %vm825_vm1, %v4515_v1, %v4516_v54  ;;  %v3279_v25 = vrot.slane %v3277_v10, 1  ;;  %v3282_v1 = vshll.u32 %v3022_v53, 16 }
 0x388   : > { %9104 = vst [vmem:[#allocation84_spill] sm:$0xff] %v7979_v9  ;;  %9105 = vst [vmem:[#allocation85_spill] sm:$0xff] %v7982_v16  ;;  %v7984_v51 = vpop.permute.xlu0 %3927  ;;  %v3157_v41 = vsel %vm399_vm0, %v9108_v52, 0.0  ;;  %v3273_v3 = vsel %vm568_vm2, %v3268_v39, %v3272_v18 }
 0x389   : > { %9106 = vst [vmem:[#allocation86_spill] sm:$0xff] %v7984_v51  ;;  %v8001_v58 = vpack.c.bf16 %v3157_v41, %v3157_v41  ;;  %v3284_v10 = vrot.slane %v3282_v1, 1 }
 0x38a   : > { %3610 = vrot.lane.b32.xlu1 %v3588_v11, %s5872_s27  ;;  %3612 = vrot.lane.b32.xlu0 %v3591_v22, %s5872_s27  ;;  %v7988_v37 = vpop.permute.xlu1 %3721  ;;  %v3275_v11 = vshrl.u32 %v3021_v23, 16 }
 0x38b   : > { %9107 = vst [vmem:[#allocation87_spill] sm:$0xff] %v7988_v37  ;;  %9111 = vst [vmem:[#allocation90_spill] sm:$0xff] %v8001_v58 }
 0x38c   : > { %v7994_v7 = vpop.permute.xlu0 %3781  ;;  %v3280_v19 = vor.u32 %v3279_v25, %v3275_v11 }
 0x38d   : > { %9109 = vst [vmem:[#allocation88_spill] sm:$0xff] %v7994_v7 }
 0x38e   : > { %3885 = vrot.lane.b32.xlu1 %v7225_v43, %s5878_s16  ;;  %3895 = vrot.lane.b32.xlu0 %v3273_v3, %s5877_s13  ;;  %v7999_v22 = vpop.permute.xlu1 %3554  ;;  %v3285_v21 = vsel %vm568_vm2, %v3280_v19, %v3284_v10 }
 0x38f   : > { %9110 = vst [vmem:[#allocation89_spill] sm:$0xff] %v7999_v22  ;;  %v9128_v22 = vld [vmem:[#allocation2_spill] sm:$0xff] }
 0x390   : > { %v8003_v14 = vpop.permute.xlu0 %3833 }
 0x391   : > { %9112 = vst [vmem:[#allocation91_spill] sm:$0xff] %v8003_v14 }
 0x392   : > { %3735 = vrot.lane.b32.xlu1 %v3273_v3, %s5878_s16  ;;  %4423 = vrot.lane.b32.xlu0 %v8001_v58, %s5875_s11  ;;  %v8008_v0 = vpop.permute.xlu1 %3232 }
 0x393   : > { %9113 = vst [vmem:[#allocation92_spill] sm:$0xff] %v8008_v0  ;;  %v9143_v0 = vld [vmem:[#allocation35_spill] sm:$0xff] }
 0x394   : > { %v8011_v54 = vpop.permute.xlu0 %3881 }
 0x395   : > { %9114 = vst [vmem:[#allocation93_spill] sm:$0xff] %v8011_v54 }
 0x396   : > { %3897 = vrot.lane.b32.xlu1 %v3285_v21, %s5877_s13  ;;  %3340 = vrot.lane.b32.xlu0 %v3273_v3, %s5876_s12  ;;  %v8015_v23 = vpop.permute.xlu1 %4419 }
 0x397   : > { %9115 = vst [vmem:[#allocation94_spill] sm:$0xff] %v8015_v23 }
 0x398   : > { %v8017_v53 = vpop.permute.xlu0 %3929 }
 0x399   : > { %9116 = vst [vmem:[#allocation95_spill] sm:$0xff] %v8017_v53 }
 0x39a   : > { %3342 = vrot.lane.b32.xlu1 %v3285_v21, %s5876_s12  ;;  %3737 = vrot.lane.b32.xlu0 %v3285_v21, %s5878_s16  ;;  %v8021_v39 = vpop.permute.xlu1 %3723 }
 0x39b   : > { %9117 = vst [vmem:[#allocation96_spill] sm:$0xff] %v8021_v39 }
 0x39c   : > { %v8023_v18 = vpop.permute.xlu0 %3556 }
 0x39d   : > { %9118 = vst [vmem:[#allocation97_spill] sm:$0xff] %v8023_v18 }
 0x39e   : > { %v8025_v52 = vpop.permute.xlu1 %3783 }
 0x39f   : > { %9119 = vst [vmem:[#allocation98_spill] sm:$0xff] %v8025_v52 }
 0x3a0   : > { %v8027_v41 = vpop.permute.xlu0 %3234 }
 0x3a1   : > { %9120 = vst [vmem:[#allocation99_spill] sm:$0xff] %v8027_v41 }
 0x3a2   : > { %v8029_v25 = vpop.permute.xlu1 %3835 }
 0x3a3   : > { %9121 = vst [vmem:[#allocation100_spill] sm:$0xff] %v8029_v25  ;;  %v9127_v25 = vld [vmem:[#allocation18_spill] sm:$0xff] }
 0x3a4   : > { %v8031_v11 = vpop.permute.xlu0 %4421  ;;  %v8046_v51 = vsel %vm2401_vm7, %v9128_v22, %v9127_v25 }
 0x3a5   : > { %9122 = vst [vmem:[#allocation101_spill] sm:$0xff] %v8031_v11  ;;  %9129 = vst [vmem:[#allocation106_spill] sm:$0xff] %v8046_v51 }
 0x3a6   : > { %v8033_v3 = vpop.permute.xlu1 %3883 }
 0x3a7   : > { %9123 = vst [vmem:[#allocation102_spill] sm:$0xff] %v8033_v3 }
 0x3a8   : > { %v8035_v1 = vpop.permute.xlu0 %3725 }
 0x3a9   : > { %9124 = vst [vmem:[#allocation103_spill] sm:$0xff] %v8035_v1 }
 0x3aa   : > { %v2680_v19 = vpop.f32.mrb[8].mxu1 }
 0x3ab   : > { %v2681_v10 = vadd.f32 %v7560_v45, %v2680_v19  ;;  %v2682_v21 = vpop.f32.mrb[9].mxu1  ;;  %v8038_v53 = vpop.permute.xlu1 %3931 }
 0x3ac   : > { %9125 = vst [vmem:[#allocation104_spill] sm:$0xff] %v8038_v53  ;;  %v2683_v39 = vpop.f32.mrb[10].mxu1  ;;  %v8041_v14 = vpop.permute.xlu0 %3558 }
 0x3ad   : > { %v2699_v18 = vmax.f32 %v2681_v10, 0.0  ;;  %v2684_v52 = vadd.f32 %v7560_v45, %v2683_v39  ;;  %v2685_v54 = vpop.f32.mrb[11].mxu1  ;;  %9126 = vst [vmem:[#allocation105_spill] sm:$0xff] %v8041_v14 }
 0x3af   : > { %v2715_v3 = vrot.slane %v2699_v18, 7  ;;  %v2700_v1 = vmax.f32 %v2684_v52, 0.0  ;;  %v8048_v7 = vpop.permute.xlu1 %3785  ;;  %v2731_v19 = vrot.slane %v2699_v18, 6  ;;  %v2747_v21 = vrot.slane %v2699_v18, 5 }
 0x3b0   : > { %9130 = vst [vmem:[#allocation107_spill] sm:$0xff] %v8048_v7  ;;  %v2763_v44 = vrot.slane %v2699_v18, 4  ;;  %v2779_v53 = vrot.slane %v2699_v18, 3  ;;  %v2795_v10 = vrot.slane %v2699_v18, 2  ;;  %v2811_v57 = vrot.slane %v2699_v18, 1  ;;  %v8051_v54 = vpop.permute.xlu0 %3236 }
 0x3b1   : > { %v2716_v37 = vrot.slane %v2700_v1, 7  ;;  %v2827_v45 = vsel %vm399_vm0, %v2699_v18, %v2715_v3  ;;  %9131 = vst [vmem:[#allocation108_spill] sm:$0xff] %v8051_v54  ;;  %v2764_v14 = vrot.slane %v2700_v1, 4  ;;  %v2780_v24 = vrot.slane %v2700_v1, 3  ;;  %v9139_v54 = vld [vmem:[#allocation33_spill] sm:$0xff] }
 0x3b2   : > { %v2835_v39 = vsel %vm2034_vm14, %v2827_v45, %v2715_v3  ;;  %v2883_v25 = vsel %vm399_vm0, %v2763_v44, %v2779_v53  ;;  %v2732_v34 = vrot.slane %v2700_v1, 6  ;;  %v2796_v22 = vrot.slane %v2700_v1, 2 }
 0x3b3   : > { %v2843_v52 = vsel %vm2051_vm15, %v2835_v39, %v2731_v19  ;;  %v2891_v7 = vsel %vm2034_vm14, %v2883_v25, %v2779_v53  ;;  %v8057_v35 = vpop.permute.xlu1 %3837  ;;  %v2828_v59 = vsel %vm399_vm0, %v2700_v1, %v2716_v37  ;;  %v2884_v3 = vsel %vm399_vm0, %v2764_v14, %v2780_v24 }
 0x3b4   : > { %9132 = vst [vmem:[#allocation109_spill] sm:$0xff] %v8057_v35  ;;  %v2851_v16 = vsel %vm2068_vm5, %v2843_v52, %v2731_v19  ;;  %v2899_v30 = vsel %vm2051_vm15, %v2891_v7, %v2795_v10  ;;  %v2836_v39 = vsel %vm2034_vm14, %v2828_v59, %v2716_v37  ;;  %v2892_v53 = vsel %vm2034_vm14, %v2884_v3, %v2780_v24 }
 0x3b5   : > { %v2859_v45 = vsel %vm1434_vm3, %v2851_v16, %v2747_v21  ;;  %v2907_v9 = vsel %vm2068_vm5, %v2899_v30, %v2795_v10  ;;  %v3683_v25 = vpop.permute.xlu0 %3682  ;;  %v2844_v19 = vsel %vm2051_vm15, %v2836_v39, %v2732_v34  ;;  %v2900_v7 = vsel %vm2051_vm15, %v2892_v53, %v2796_v22  ;;  %v9133_v10 = vld [vmem:[#allocation21_spill] sm:$0xff] }
 0x3b6   : > { %v2867_v48 = vsel %vm1435_vm4, %v2859_v45, %v2747_v21  ;;  %v2915_v35 = vsel %vm1434_vm3, %v2907_v9, %v2811_v57  ;;  %v2748_v37 = vrot.slane %v2700_v1, 5  ;;  %v2812_v24 = vrot.slane %v2700_v1, 1 }
 0x3b7   : > { %v2875_v52 = vsel %vm825_vm1, %v2867_v48, %v2763_v44  ;;  %v2923_v62 = vsel %vm1435_vm4, %v2915_v35, %v2811_v57  ;;  %v8073_v16 = vpop.permute.xlu1 %3845  ;;  %v3972_v21 = vsel %vm2418_vm8, %v8046_v51, %v9133_v10  ;;  %v2852_v3 = vsel %vm2068_vm5, %v2844_v19, %v2732_v34 }
 0x3b8   : > { %v2931_v30 = vsel %vm825_vm1, %v2923_v62, %v2699_v18  ;;  %v2963_v59 = vrot.slane %v2875_v52, 7  ;;  %v2908_v45 = vsel %vm2068_vm5, %v2900_v7, %v2796_v22  ;;  %v2860_v57 = vsel %vm1434_vm3, %v2852_v3, %v2748_v37 }
 0x3b9   : > { %v2964_v9 = vrot.slane %v2931_v30, 7  ;;  %v3844_v39 = vpop.permute.xlu0 %3843  ;;  %v2916_v48 = vsel %vm1434_vm3, %v2908_v45, %v2812_v24  ;;  %v3523_v35 = vshll.u32 %v7225_v43, 16  ;;  %v2868_v18 = vsel %vm1435_vm4, %v2860_v57, %v2748_v37  ;;  %v9134_v45 = vld [vmem:[#allocation27_spill] sm:$0xff] }
 0x3ba   : > { %v3003_v44 = vsel %vm399_vm0, 0.0, %v2963_v59  ;;  %v2924_v53 = vsel %vm1435_vm4, %v2916_v48, %v2812_v24  ;;  %v2876_v19 = vsel %vm825_vm1, %v2868_v18, %v2764_v14  ;;  %v3521_v48 = vshrl.u32 %v7225_v43, 16 }
 0x3bb   : > { %v2965_v62 = vsel %vm399_vm0, %v2963_v59, %v2964_v9  ;;  %v3011_v52 = vsel %vm399_vm0, %v2964_v9, 0.0  ;;  %v8089_v34 = vpop.permute.xlu1 %3791  ;;  %v2932_v7 = vsel %vm825_vm1, %v2924_v53, %v2700_v1  ;;  %v2966_v30 = vrot.slane %v2876_v19, 7  ;;  %v9135_v9 = vld [vmem:[#allocation4_spill] sm:$0xff] }
 0x3bc   : > { %v8091_v22 = vpack.c.bf16 %v2965_v62, %v3003_v44  ;;  %v2967_v10 = vrot.slane %v2932_v7, 7  ;;  %v8095_v3 = vpack.c.bf16 %v3011_v52, %v3011_v52  ;;  %v3997_v59 = vsel %vm2452_vm10, %v3972_v21, %v9134_v45  ;;  %v9136_v44 = vld [vmem:[#allocation6_spill] sm:$0xff]  ;;  %v9137_v62 = vld [vmem:[#allocation37_spill] sm:$0xff] }
 0x3bd   : > { %v3685_v37 = vpop.permute.xlu0 %3684  ;;  %v3525_v24 = vrot.slane %v3523_v35, 1  ;;  %v4071_v14 = vsel %vm2384_vm6, %v9135_v9, %v3683_v25  ;;  %v4073_v1 = vsel %vm2384_vm6, %v9136_v44, %v3683_v25  ;;  %v4238_v21 = vsel %vm2384_vm6, %v8089_v34, %v9137_v62  ;;  %v9138_v44 = vld [vmem:[#allocation32_spill] sm:$0xff] }
 0x3be   : > { %3690 = vrot.lane.b32.xlu1 %v8091_v22, %s5873_s28  ;;  %3851 = vrot.lane.b32.xlu0 %v8091_v22, %s5875_s11  ;;  %v2968_v57 = vsel %vm399_vm0, %v2966_v30, %v2967_v10  ;;  %v4240_v18 = vsel %vm2384_vm6, %v8089_v34, %v7398_v6  ;;  %v3004_v35 = vsel %vm399_vm0, 0.0, %v2966_v30  ;;  %v3012_v52 = vsel %vm399_vm0, %v2967_v10, 0.0 }
 0x3bf   : > { %v8115_v53 = vpop.permute.xlu1 %3606  ;;  %v8119_v19 = vpack.c.bf16 %v2968_v57, %v3004_v35  ;;  %v3592_v25 = vrot.slane %v8091_v22, 1  ;;  %v3593_v7 = vrot.slane %v8095_v3, 1  ;;  %v8123_v9 = vpack.c.bf16 %v3012_v52, %v3012_v52  ;;  %v9140_v57 = vld [vmem:[#allocation36_spill] sm:$0xff] }
 0x3c0   : > { %v4029_v62 = vsel %vm2469_vm11, %v3997_v59, %v9138_v44  ;;  %v3526_v6 = vor.u32 %v3525_v24, %v3521_v48  ;;  %v3528_v51 = vshll.u32 %v8001_v58, 16  ;;  %v3289_v30 = vshll.u32 %v8091_v22, 16  ;;  %v9141_v48 = vld [vmem:[#allocation7_spill] sm:$0xff]  ;;  %v9142_v58 = vld [vmem:[#allocation34_spill] sm:$0xff] }
 0x3c1   : > { %v8127_v45 = vpop.permute.xlu0 %3793  ;;  %v4110_v10 = vsel %vm2418_vm8, %v4071_v14, %v9139_v54  ;;  %v3942_v59 = vsel %vm2401_vm7, %v7706_v33, %v9140_v57  ;;  %v3595_v35 = vrot.slane %v8119_v19, 1  ;;  %v3596_v24 = vrot.slane %v8123_v9, 1 }
 0x3c2   : > { %3853 = vrot.lane.b32.xlu1 %v8119_v19, %s5875_s11  ;;  %3692 = vrot.lane.b32.xlu0 %v8119_v19, %s5873_s28  ;;  %v4076_v52 = vsel %vm2384_vm6, %v9141_v48, %v3685_v37  ;;  %v4112_v54 = vsel %vm2418_vm8, %v4073_v1, %v9142_v58  ;;  %v4270_v14 = vsel %vm2401_vm7, %v4238_v21, %v3844_v39  ;;  %v3291_v21 = vrot.slane %v3289_v30, 1 }
 0x3c3   : > { %v3732_v44 = vpop.permute.xlu1 %3731  ;;  %v4272_v11 = vsel %vm2401_vm7, %v4240_v18, %v8073_v16  ;;  %v3594_v57 = vsel %vm825_vm1, %v3592_v25, %v3593_v7  ;;  %v8155_v23 = vsel %vm2401_vm7, %v8091_v22, %v7839_v28  ;;  %v3597_v1 = vsel %vm825_vm1, %v3595_v35, %v3596_v24  ;;  %v9144_v25 = vld [vmem:[#allocation30_spill] sm:$0xff] }
 0x3c4   : > { %v4142_v41 = vsel %vm2435_vm9, %v4110_v10, %v3732_v44  ;;  %v4143_v33 = vsel %vm2435_vm9, %v4112_v54, %v3732_v44  ;;  %v4078_v18 = vsel %vm2384_vm6, %v6671_v47, %v3685_v37  ;;  %v4294_v7 = vsel %vm2435_vm9, %v4270_v14, %v9144_v25 }
 0x3c5   : > { %v8157_v48 = vpop.permute.xlu0 %3608  ;;  %v4166_v58 = vsel %vm2469_vm11, %v4142_v41, %v9143_v0  ;;  %v4168_v39 = vsel %vm2469_vm11, %v4143_v33, %v7387_v50  ;;  %v3530_v0 = vrot.slane %v3528_v51, 1  ;;  %v3287_v50 = vshrl.u32 %v8091_v22, 16 }
 0x3c6   : > { %v4198_v28 = vsel %vm2486_vm12, %v4166_v58, %v8089_v34  ;;  %3799 = vrot.lane.b32.xlu1 %v3594_v57, %s5874_s29  ;;  %3801 = vrot.lane.b32.xlu0 %v3597_v1, %s5874_s29  ;;  %v3294_v30 = vshll.u32 %v8095_v3, 16  ;;  %v4446_v47 = vsel %vm2401_vm7, %v8095_v3, %v7845_v8  ;;  %v4518_v37 = vrot.slane %v8155_v23, 1 }
 0x3c7   : > { %v3892_v41 = vpop.permute.xlu1 %3891  ;;  %4848 = vmatprep.mubr.bf16.mxu1 %v4198_v28  ;;  %v4200_v35 = vsel %vm2486_vm12, %v4168_v39, %v8089_v34  ;;  %v4519_v24 = vrot.slane %v4446_v47, 1  ;;  %v8184_v51 = vsel %vm2401_vm7, %v8091_v22, %v7860_v40  ;;  %v3292_v8 = vor.u32 %v3291_v21, %v3287_v50 }
 0x3c8   : > { %v4326_v10 = vsel %vm2452_vm10, %v4294_v7, %v3892_v41  ;;  %4849 = vmatmul.mubr.bf16.vlgmr.msra.gmra.mrb[16].mxu1 %v4029_v62  ;;  %v4448_v14 = vsel %vm2401_vm7, %v8095_v3, %v7864_v20  ;;  %v4521_v62 = vrot.slane %v8184_v51, 1  ;;  %v8195_v40 = vsel %vm568_vm2, %v3526_v6, %v3530_v0 }
 0x3c9   : > { %v4350_v44 = vsel %vm2486_vm12, %v4326_v10, %v7324_v12  ;;  %4856 = vmatprep.mubr.bf16.mxu1 %v4200_v35  ;;  %v3337_v54 = vpop.permute.xlu0 %3336  ;;  %v4522_v22 = vrot.slane %v4448_v14, 1  ;;  %v8200_v12 = vsel %vm2401_vm7, %v8119_v19, %v7879_v56  ;;  %v4296_v33 = vsel %vm2435_vm9, %v4272_v11, %v7408_v49 }
 0x3ca   : > { %v3974_v34 = vsel %vm2418_vm8, %v3942_v59, %v3337_v54  ;;  %5010 = vmatmul.mubr.bf16.vlgmr.msra.gmra.mrb[32].mxu0 %v4350_v44  ;;  %3614 = vrot.lane.b32.xlu1 %v3594_v57, %s5872_s27  ;;  %v4114_v3 = vsel %vm2418_vm8, %v4076_v52, %v7422_v32  ;;  %v3296_v6 = vrot.slane %v3294_v30, 1  ;;  %v8210_v59 = vsel %vm825_vm1, %v4518_v37, %v4519_v24 }
 0x3cb   : > { %v3894_v20 = vpop.permute.xlu1 %3893  ;;  %5486 = vmatprep.mubr.msk.bf16.mxu0 %vm2418_vm8, %v7800_v42  ;;  %3616 = vrot.lane.b32.xlu0 %v3597_v1, %s5872_s27  ;;  %v4242_v56 = vsel %vm2384_vm6, %v8127_v45, %v7471_v63  ;;  %v4116_v49 = vsel %vm2418_vm8, %v4078_v18, %v7489_v17  ;;  %v3999_v11 = vsel %vm2452_vm10, %v3974_v34, %v7394_v5  ;;  %v3301_v42 = vshll.u32 %v8119_v19, 16 }
 0x3cc   : > { %v8221_v32 = vsel %vm568_vm2, %v3292_v8, %v3296_v6  ;;  %v8224_v52 = vsel %vm825_vm1, %v4521_v62, %v4522_v22  ;;  %v4450_v58 = vsel %vm2401_vm7, %v8123_v9, %v7895_v15  ;;  %v4524_v63 = vrot.slane %v8200_v12, 1  ;;  %v9145_v8 = vld [vmem:[#allocation49_spill] sm:$0xff] }
 0x3cd   : > { %v3734_v57 = vpop.permute.xlu0 %3733  ;;  %v4328_v17 = vsel %vm2452_vm10, %v4296_v33, %v3894_v20  ;;  %v4525_v5 = vrot.slane %v4450_v58, 1  ;;  %v8237_v1 = vsel %vm2401_vm7, %v8119_v19, %v7946_v38  ;;  %v4032_v18 = vsel %vm2469_vm11, %v3999_v11, %v8115_v53 }
 0x3ce   : > { %v4145_v39 = vsel %vm2435_vm9, %v4114_v3, %v3734_v57  ;;  %3933 = vrot.lane.b32.xlu1 %v8195_v40, %s5874_s29  ;;  %v4527_v25 = vrot.slane %v8237_v1, 1  ;;  %v4452_v7 = vsel %vm2401_vm7, %v8123_v9, %v7976_v29  ;;  %v3975_v38 = vsel %vm2418_vm8, %v7726_v26, %v3337_v54  ;;  %v9147_v3 = vld [vmem:[#allocation11_spill] sm:$0xff] }
 0x3cf   : > { %v3339_v21 = vpop.permute.xlu1 %3338  ;;  %v4170_v15 = vsel %vm2469_vm11, %v4145_v39, %v7457_v55  ;;  %3899 = vrot.lane.b32.xlu0 %v8221_v32, %s5877_s13  ;;  %v3303_v55 = vrot.slane %v3301_v42, 1  ;;  %v4353_v41 = vsel %vm2486_vm12, %v4328_v17, %v7418_v46  ;;  %v8260_v29 = vsel %vm825_vm1, %v4524_v63, %v4525_v5 }
 0x3d0   : > { %v3978_v28 = vsel %vm2418_vm8, %v7785_v36, %v3339_v21  ;;  %4857 = vmatmul.mubr.bf16.gmra.mrb[20].mxu1 %v4032_v18  ;;  %v4203_v0 = vsel %vm2486_vm12, %v4170_v15, %v8127_v45  ;;  %v4528_v30 = vrot.slane %v4452_v7, 1  ;;  %v4273_v26 = vsel %vm2401_vm7, %v4242_v56, %v8073_v16 }
 0x3d1   : > { %4864 = vmatprep.mubr.bf16.mxu1 %v4203_v0  ;;  %v4005_v50 = vsel %vm2452_vm10, %v3978_v28, %v7527_v13  ;;  %v4146_v36 = vsel %vm2435_vm9, %v4116_v49, %v3734_v57  ;;  %v3977_v46 = vsel %vm2418_vm8, %v7763_v27, %v3339_v21  ;;  %v3299_v13 = vshrl.u32 %v8119_v19, 16  ;;  %v5853_v19 = vld [vmem:[%s8911_s4] ss:$0 sm:$0xff] }
 0x3d2   : > { %5018 = vmatmul.mubr.bf16.gmra.mrb[36].mxu0 %v4353_v41  ;;  %3739 = vrot.lane.b32.xlu1 %v8221_v32, %s5878_s16  ;;  %v8269_v47 = vsel %vm2469_vm11, %v4005_v50, %v8157_v48  ;;  %v3306_v16 = vshll.u32 %v8123_v9, 16  ;;  %v8280_v37 = vsel %vm825_vm1, %v4527_v25, %v4528_v30  ;;  %v4001_v10 = vsel %vm2452_vm10, %v3975_v38, %v7463_v2  ;;  %v9146_v2 = vld [vmem:[#allocation12_spill] sm:$0xff] }
 0x3d3   : > { %5487 = vmatprep.mubr.msk.bf16.mxu0 %vm2418_vm8, %v7807_v61  ;;  %3727 = vrot.lane.b32.xlu0 %v7225_v43, %s5876_s12  ;;  %v4298_v35 = vsel %vm2435_vm9, %v4273_v26, %v7479_v60  ;;  %v4172_v61 = vsel %vm2469_vm11, %v4146_v36, %v7495_v31  ;;  %v3304_v24 = vor.u32 %v3303_v55, %v3299_v13 }
 0x3d4   : > { %v2688_v27 = vpop.f32.mrb[12].mxu1  ;;  %v4329_v44 = vsel %vm2452_vm10, %v4298_v35, %v3894_v20  ;;  %v4003_v14 = vsel %vm2452_vm10, %v3977_v46, %v9146_v2  ;;  %v4034_v62 = vsel %vm2469_vm11, %v4001_v10, %v8115_v53  ;;  %v3308_v31 = vrot.slane %v3306_v16, 1 }
 0x3d5   : > { %v2689_v9 = vadd.f32 %v5853_v19, %v2688_v27  ;;  %v2690_v54 = vpop.f32.mrb[13].mxu1  ;;  %v4205_v20 = vsel %vm2486_vm12, %v4172_v61, %v8127_v45  ;;  %v4356_v6 = vsel %vm2486_vm12, %v4329_v44, %v9147_v3  ;;  %v4037_v53 = vsel %vm2469_vm11, %v4003_v14, %v8157_v48 }
 0x3d6   : > { %3560 = vrot.lane.b32.xlu1 %v9145_v8, %s5877_s13  ;;  %v2691_v60 = vpop.f32.mrb[14].mxu1  ;;  %v3309_v56 = vsel %vm568_vm2, %v3304_v24, %v3308_v31 }
 0x3d7   : > { %3787 = vrot.lane.b32.xlu0 %v8195_v40, %s5872_s27  ;;  %v2701_v34 = vmax.f32 %v2689_v9, 0.0  ;;  %v2692_v22 = vadd.f32 %v5853_v19, %v2691_v60  ;;  %v2693_v33 = vpop.f32.mrb[15].mxu1 }
 0x3d8   : > { %4865 = vmatmul.mubr.bf16.gmra.mrb[24].mxu1 %v4034_v62 }
 0x3d9   : > { %4872 = vmatprep.mubr.bf16.mxu1 %v4205_v20  ;;  %v2717_v49 = vrot.slane %v2701_v34, 7  ;;  %v2702_v11 = vmax.f32 %v2692_v22, 0.0  ;;  %v2733_v42 = vrot.slane %v2701_v34, 6  ;;  %v2749_v57 = vrot.slane %v2701_v34, 5 }
 0x3da   : > { %5026 = vmatmul.mubr.bf16.gmra.mrb[40].mxu0 %v4356_v6  ;;  %3901 = vrot.lane.b32.xlu1 %v3309_v56, %s5877_s13  ;;  %v2765_v58 = vrot.slane %v2701_v34, 4  ;;  %v2781_v63 = vrot.slane %v2701_v34, 3  ;;  %v2797_v17 = vrot.slane %v2701_v34, 2  ;;  %v2813_v39 = vrot.slane %v2701_v34, 1 }
 0x3db   : > { %5488 = vmatprep.mubr.msk.bf16.mxu0 %vm2418_vm8, %v7961_v4  ;;  %3344 = vrot.lane.b32.xlu0 %v8221_v32, %s5876_s12  ;;  %v2718_v5 = vrot.slane %v2702_v11, 7  ;;  %v2829_v48 = vsel %vm399_vm0, %v2701_v34, %v2717_v49  ;;  %v2734_v21 = vrot.slane %v2702_v11, 6  ;;  %v2750_v18 = vrot.slane %v2702_v11, 5 }
 0x3dc   : > { %v2837_v15 = vsel %vm2034_vm14, %v2829_v48, %v2717_v49  ;;  %v2885_v25 = vsel %vm399_vm0, %v2765_v58, %v2781_v63  ;;  %v2766_v7 = vrot.slane %v2702_v11, 4  ;;  %v2782_v38 = vrot.slane %v2702_v11, 3 }
 0x3dd   : > { %v2845_v4 = vsel %vm2051_vm15, %v2837_v15, %v2733_v42  ;;  %v2893_v32 = vsel %vm2034_vm14, %v2885_v25, %v2781_v63  ;;  %v2798_v28 = vrot.slane %v2702_v11, 2  ;;  %v2814_v0 = vrot.slane %v2702_v11, 1  ;;  %v9149_v25 = vld [vmem:[#allocation94_spill] sm:$0xff] }
 0x3de   : > { %3346 = vrot.lane.b32.xlu1 %v3309_v56, %s5876_s12  ;;  %v2853_v55 = vsel %vm2068_vm5, %v2845_v4, %v2733_v42  ;;  %v2901_v41 = vsel %vm2051_vm15, %v2893_v32, %v2797_v17  ;;  %v2830_v50 = vsel %vm399_vm0, %v2702_v11, %v2718_v5  ;;  %v2886_v30 = vsel %vm399_vm0, %v2766_v7, %v2782_v38 }
 0x3df   : > { %3741 = vrot.lane.b32.xlu0 %v3309_v56, %s5878_s16  ;;  %v2861_v26 = vsel %vm1434_vm3, %v2853_v55, %v2749_v57  ;;  %v2909_v36 = vsel %vm2068_vm5, %v2901_v41, %v2797_v17  ;;  %v2838_v46 = vsel %vm2034_vm14, %v2830_v50, %v2718_v5  ;;  %v2894_v13 = vsel %vm2034_vm14, %v2886_v30, %v2782_v38  ;;  %v9150_v38 = vld [vmem:[#allocation99_spill] sm:$0xff]  ;;  %v9151_v30 = vld [vmem:[#allocation101_spill] sm:$0xff] }
 0x3e0   : > { %4873 = vmatmul.mubr.bf16.gmra.mrb[28].mxu1 %v4037_v53  ;;  %v2869_v16 = vsel %vm1435_vm4, %v2861_v26, %v2749_v57  ;;  %v2917_v10 = vsel %vm1434_vm3, %v2909_v36, %v2813_v39  ;;  %v2846_v35 = vsel %vm2051_vm15, %v2838_v46, %v2734_v21  ;;  %v2902_v27 = vsel %vm2051_vm15, %v2894_v13, %v2798_v28 }
 0x3e1   : > { %v2877_v61 = vsel %vm825_vm1, %v2869_v16, %v2765_v58  ;;  %v2925_v24 = vsel %vm1435_vm4, %v2917_v10, %v2813_v39  ;;  %v2854_v44 = vsel %vm2068_vm5, %v2846_v35, %v2734_v21  ;;  %v2910_v19 = vsel %vm2068_vm5, %v2902_v27, %v2798_v28  ;;  %v9148_v39 = vld [vmem:[#allocation92_spill] sm:$0xff] }
 0x3e2   : > { %v2933_v9 = vsel %vm825_vm1, %v2925_v24, %v2701_v34  ;;  %v2969_v54 = vrot.slane %v2877_v61, 7  ;;  %v2862_v8 = vsel %vm1434_vm3, %v2854_v44, %v2750_v18  ;;  %v2918_v2 = vsel %vm1434_vm3, %v2910_v19, %v2814_v0 }
 0x3e3   : > { %v2970_v14 = vrot.slane %v2933_v9, 7  ;;  %v2870_v60 = vsel %vm1435_vm4, %v2862_v8, %v2750_v18  ;;  %v2926_v62 = vsel %vm1435_vm4, %v2918_v2, %v2814_v0  ;;  %v3679_v8 = vrot.slane %v7225_v43, 1  ;;  %v9152_v2 = vld [vmem:[#allocation90_spill] sm:$0xff] }
 0x3e4   : > { %v3005_v31 = vsel %vm399_vm0, 0.0, %v2969_v54  ;;  %v2878_v22 = vsel %vm825_vm1, %v2870_v60, %v2766_v7  ;;  %v2934_v33 = vsel %vm825_vm1, %v2926_v62, %v2702_v11  ;;  %v9153_v60 = vld [vmem:[#allocation50_spill] sm:$0xff]  ;;  %v9154_v62 = vld [vmem:[#allocation15_spill] sm:$0xff] }
 0x3e5   : > { %v2971_v20 = vsel %vm399_vm0, %v2969_v54, %v2970_v14  ;;  %v2972_v3 = vrot.slane %v2878_v22, 7  ;;  %v2973_v34 = vrot.slane %v2934_v33, 7  ;;  %v3013_v6 = vsel %vm399_vm0, %v2970_v14, 0.0 }
 0x3e6   : > { %v3027_v56 = vpack.c.bf16 %v2971_v20, %v3005_v31  ;;  %v3028_v42 = vpack.c.bf16 %v3013_v6, %v3013_v6  ;;  %v3680_v14 = vrot.slane %v9152_v2, 1  ;;  %v4244_v31 = vsel %vm2384_vm6, %v8127_v45, %v9154_v62  ;;  %v9167_v62 = vld [vmem:[#allocation20_spill] sm:$0xff] }
 0x3e7   : > { %v2974_v53 = vsel %vm399_vm0, %v2972_v3, %v2973_v34  ;;  %v3006_v49 = vsel %vm399_vm0, 0.0, %v2972_v3  ;;  %v3014_v57 = vsel %vm399_vm0, %v2973_v34, 0.0  ;;  %v9155_v34 = vld [vmem:[#allocation24_spill] sm:$0xff]  ;;  %vm8840_vm0 = vmpackc.low %vm2384_vm6, %vm2384_vm6 }
 0x3e8   : > { %3694 = vrot.lane.b32.xlu1 %v3027_v56, %s5873_s28  ;;  %3855 = vrot.lane.b32.xlu0 %v3027_v56, %s5875_s11  ;;  %v8350_v58 = vpack.c.bf16 %v2974_v53, %v3006_v49  ;;  %v8352_v11 = vpack.c.bf16 %v3014_v57, %v3014_v57  ;;  %v3313_v63 = vshll.u32 %v3027_v56, 16  ;;  %v3598_v17 = vrot.slane %v3027_v56, 1 }
 0x3e9   : > { %v8356_v5 = vsel %vm2401_vm7, %v3027_v56, %v9148_v39  ;;  %v3599_v48 = vrot.slane %v3028_v42, 1  ;;  %v4454_v7 = vsel %vm2401_vm7, %v3028_v42, %v9149_v25  ;;  %v8368_v4 = vsel %vm2401_vm7, %v3027_v56, %v9150_v38 }
 0x3ea   : > { %v3601_v21 = vrot.slane %v8350_v58, 1  ;;  %v3602_v18 = vrot.slane %v8352_v11, 1  ;;  %v3315_v15 = vrot.slane %v3313_v63, 1  ;;  %v3311_v32 = vshrl.u32 %v3027_v56, 16  ;;  %v9156_v56 = vld [vmem:[#allocation22_spill] sm:$0xff]  ;;  %v9158_v63 = vld [vmem:[#allocation9_spill] sm:$0xff] }
 0x3eb   : > { %v3318_v28 = vshll.u32 %v3028_v42, 16  ;;  %v4530_v0 = vrot.slane %v8356_v5, 1  ;;  %v4531_v55 = vrot.slane %v4454_v7, 1  ;;  %v4456_v26 = vsel %vm2401_vm7, %v3028_v42, %v9151_v30  ;;  %v9157_v42 = vld [vmem:[#allocation8_spill] sm:$0xff]  ;;  %v9163_v30 = vld [vmem:[#allocation31_spill] sm:$0xff] }
 0x3ec   : > { %3857 = vrot.lane.b32.xlu1 %v8350_v58, %s5875_s11  ;;  %3696 = vrot.lane.b32.xlu0 %v8350_v58, %s5873_s28  ;;  %v4533_v36 = vrot.slane %v8368_v4, 1  ;;  %v3600_v46 = vsel %vm825_vm1, %v3598_v17, %v3599_v48  ;;  %v8376_v13 = vsel %vm825_vm1, %v3601_v21, %v3602_v18  ;;  %v3316_v16 = vor.u32 %v3315_v15, %v3311_v32  ;;  %v9159_v21 = vld [vmem:[#allocation51_spill] sm:$0xff]  ;;  %v9161_v32 = vld [vmem:[#allocation108_spill] sm:$0xff] }
 0x3ed   : > { %v4534_v10 = vrot.slane %v4456_v26, 1  ;;  %v3320_v35 = vrot.slane %v3318_v28, 1  ;;  %v8382_v27 = vsel %vm825_vm1, %v4530_v0, %v4531_v55  ;;  %v8410_v3 = vsel %vm825_vm1, %v3679_v8, %v3680_v14  ;;  %v9160_v18 = vld [vmem:[#allocation23_spill] sm:$0xff]  ;;  %v9162_v0 = vld [vmem:[#allocation28_spill] sm:$0xff]  ;;  %v9166_v8 = vld [vmem:[#allocation45_spill] sm:$0xff] }
 0x3ee   : > { %v3325_v43 = vshll.u32 %v8350_v58, 16  ;;  %v3323_v7 = vshrl.u32 %v8350_v58, 16  ;;  %v3330_v38 = vshll.u32 %v8352_v11, 16  ;;  %v8439_v28 = vsel %vm2401_vm7, %v8350_v58, %v9161_v32 }
 0x3ef   : > { %v8389_v44 = vsel %vm825_vm1, %v4533_v36, %v4534_v10  ;;  %v3321_v19 = vsel %vm568_vm2, %v3316_v16, %v3320_v35  ;;  %v9164_v36 = vld [vmem:[#allocation83_spill] sm:$0xff] }
 0x3f0   : > { %v3687_v41 = vpop.permute.xlu1 %3686  ;;  %v3848_v50 = vpop.permute.xlu0 %3847  ;;  %3803 = vrot.lane.b32.xlu1 %v3600_v46, %s5874_s29  ;;  %3805 = vrot.lane.b32.xlu0 %v8376_v13, %s5874_s29  ;;  %v3327_v48 = vrot.slane %v3325_v43, 1 }
 0x3f1   : > { %v4275_v20 = vsel %vm2401_vm7, %v4244_v31, %v3848_v50  ;;  %v4081_v57 = vsel %vm2384_vm6, %v9157_v42, %v3687_v41  ;;  %v4083_v17 = vsel %vm2384_vm6, %v9158_v63, %v3687_v41 }
 0x3f2   : > { %v4300_v53 = vsel %vm2435_vm9, %v4275_v20, %v9156_v56  ;;  %v4118_v55 = vsel %vm2418_vm8, %v4081_v57, %v9162_v0  ;;  %v4120_v26 = vsel %vm2418_vm8, %v4083_v17, %v9163_v30  ;;  %v4536_v20 = vrot.slane %v8439_v28, 1  ;;  %v9168_v56 = vld [vmem:[#allocation17_spill] sm:$0xff]  ;;  %v9173_v0 = vld [vmem:[#allocation84_spill] sm:$0xff] }
 0x3f3   : > { %v9175_v30 = vld [vmem:[#allocation80_spill] sm:$0xff] }
 0x3f4   : > { %v8384_v61 = vpop.permute.xlu1 %3849  ;;  %v8386_v24 = vpop.permute.xlu0 %3688  ;;  %3618 = vrot.lane.b32.xlu1 %v3600_v46, %s5872_s27  ;;  %3903 = vrot.lane.b32.xlu0 %v3321_v19, %s5877_s13  ;;  %v3328_v46 = vor.u32 %v3327_v48, %v3323_v7 }
 0x3f8   : > { %v3796_v9 = vpop.permute.xlu1 %3795  ;;  %v8394_v54 = vpop.permute.xlu0 %3797  ;;  %3743 = vrot.lane.b32.xlu1 %v3321_v19, %s5878_s16  ;;  %4425 = vrot.lane.b32.xlu0 %v9153_v60, %s5875_s11 }
 0x3f9   : > { %v4246_v45 = vsel %vm2384_vm6, %v3796_v9, %v9155_v34  ;;  %v3332_v34 = vrot.slane %v3330_v38, 1 }
 0x3fa   : > { %v4276_v25 = vsel %vm2401_vm7, %v4246_v45, %v3848_v50 }
 0x3fb   : > { %v4302_v2 = vsel %vm2435_vm9, %v4276_v25, %v9166_v8  ;;  %v9172_v25 = vld [vmem:[#allocation16_spill] sm:$0xff] }
 0x3fc   : > { %v8404_v22 = vpop.permute.xlu1 %3610  ;;  %v8406_v33 = vpop.permute.xlu0 %3612  ;;  %3839 = vrot.lane.b32.xlu1 %v8410_v3, %s5873_s28  ;;  %3887 = vrot.lane.b32.xlu0 %v9153_v60, %s5878_s16 }
 0x400   : > { %v8419_v6 = vpop.permute.xlu1 %3885  ;;  %v3896_v49 = vpop.permute.xlu0 %3895  ;;  %4427 = vrot.lane.b32.xlu1 %v9159_v21, %s5875_s11  ;;  %3348 = vrot.lane.b32.xlu0 %v3321_v19, %s5876_s12  ;;  %v9165_v19 = vld [vmem:[#allocation53_spill] sm:$0xff]  ;;  %v9171_v21 = vld [vmem:[#allocation76_spill] sm:$0xff] }
 0x401   : > { %v4331_v39 = vsel %vm2452_vm10, %v4300_v53, %v3896_v49  ;;  %v4332_v43 = vsel %vm2452_vm10, %v4302_v2, %v3896_v49  ;;  %v9169_v53 = vld [vmem:[#allocation40_spill] sm:$0xff]  ;;  %v3333_v49 = vsel %vm568_vm2, %v3328_v46, %v3332_v34  ;;  %v9177_v46 = vld [vmem:[#allocation43_spill] sm:$0xff] }
 0x402   : > { %v4359_v15 = vsel %vm2486_vm12, %v4331_v39, %v9160_v18  ;;  %v4248_v42 = vsel %vm2384_vm6, %v3796_v9, %v9169_v53  ;;  %v9170_v39 = vld [vmem:[#allocation10_spill] sm:$0xff]  ;;  %v4362_v7 = vsel %vm2486_vm12, %v4332_v43, %v9172_v25  ;;  %v9179_v2 = vld [vmem:[#allocation63_spill] sm:$0xff] }
 0x403   : > { %5034 = vmatmul.mubr.bf16.gmra.mrb[44].mxu0 %v4359_v15  ;;  %v4086_v48 = vsel %vm2384_vm6, %v9170_v39, %v8386_v24  ;;  %v4278_v38 = vsel %vm2401_vm7, %v4248_v42, %v8384_v61  ;;  %v9182_v34 = vld [vmem:[#allocation79_spill] sm:$0xff]  ;;  %v9184_v42 = vld [vmem:[#allocation56_spill] sm:$0xff] }
 0x404   : > { %v3736_v41 = vpop.permute.xlu1 %3735  ;;  %5489 = vmatprep.mubr.msk.bf16.mxu0 %vm2418_vm8, %v9164_v36  ;;  %v4424_v50 = vpop.permute.xlu0 %4423  ;;  %3729 = vrot.lane.b32.xlu1 %v9153_v60, %s5876_s12  ;;  %v9176_v36 = vld [vmem:[#allocation39_spill] sm:$0xff] }
 0x405   : > { %v4148_v16 = vsel %vm2435_vm9, %v4118_v55, %v3736_v41  ;;  %v4149_v10 = vsel %vm2435_vm9, %v4120_v26, %v3736_v41  ;;  %v4458_v35 = vsel %vm2401_vm7, %v8352_v11, %v4424_v50  ;;  %3935 = vrot.lane.b32.xlu0 %v9165_v19, %s5874_s29 }
 0x406   : > { %v4537_v14 = vrot.slane %v4458_v35, 1  ;;  %v4174_v31 = vsel %vm2469_vm11, %v4148_v16, %v9167_v62  ;;  %v4176_v60 = vsel %vm2469_vm11, %v4149_v10, %v9168_v56  ;;  %v4304_v16 = vsel %vm2435_vm9, %v4278_v38, %v9177_v46  ;;  %v9178_v35 = vld [vmem:[#allocation46_spill] sm:$0xff]  ;;  %v9180_v62 = vld [vmem:[#allocation13_spill] sm:$0xff] }
 0x407   : > { %v4208_v45 = vsel %vm2486_vm12, %v4174_v31, %v3796_v9  ;;  %v4210_v15 = vsel %vm2486_vm12, %v4176_v60, %v3796_v9  ;;  %v4088_v31 = vsel %vm2384_vm6, %v9180_v62, %v8386_v24  ;;  %v9183_v56 = vld [vmem:[#allocation41_spill] sm:$0xff] }
 0x408   : > { %v3898_v57 = vpop.permute.xlu1 %3897  ;;  %4880 = vmatprep.mubr.bf16.mxu1 %v4208_v45  ;;  %v3341_v63 = vpop.permute.xlu0 %3340  ;;  %v8467_v17 = vsel %vm825_vm1, %v4536_v20, %v4537_v14  ;;  %3905 = vrot.lane.b32.xlu1 %v3333_v49, %s5877_s13  ;;  %v9181_v20 = vld [vmem:[#allocation25_spill] sm:$0xff]  ;;  %v4124_v39 = vsel %vm2418_vm8, %v4088_v31, %v9184_v42 }
 0x409   : > { %4881 = vmatmul.mubr.bf16.gmra.mrb[32].mxu1 %v8269_v47  ;;  %3745 = vrot.lane.b32.xlu0 %v3333_v49, %s5878_s16  ;;  %v3980_v18 = vsel %vm2418_vm8, %v9171_v21, %v3341_v63  ;;  %v9174_v47 = vld [vmem:[#allocation38_spill] sm:$0xff]  ;;  %v4334_v10 = vsel %vm2452_vm10, %v4304_v16, %v3898_v57  ;;  %v3981_v45 = vsel %vm2418_vm8, %v9182_v34, %v3341_v63  ;;  %v9201_v42 = vld [vmem:[#allocation61_spill] sm:$0xff] }
 0x40a   : > { %4888 = vmatprep.mubr.bf16.mxu1 %v4210_v15  ;;  %v4122_v55 = vsel %vm2418_vm8, %v4086_v48, %v9174_v47  ;;  %v4007_v50 = vsel %vm2452_vm10, %v3980_v18, %v9176_v36  ;;  %v4365_v60 = vsel %vm2486_vm12, %v4334_v10, %v9183_v56  ;;  %v9185_v48 = vld [vmem:[#allocation85_spill] sm:$0xff]  ;;  %v9187_v21 = vld [vmem:[#allocation54_spill] sm:$0xff]  ;;  %v9188_v15 = vld [vmem:[#allocation52_spill] sm:$0xff] }
 0x40b   : > { %5042 = vmatmul.mubr.bf16.gmra.mrb[48].mxu0 %v4362_v7  ;;  %v9190_v7 = vld [vmem:[#allocation57_spill] sm:$0xff]  ;;  %v9200_v56 = vld [vmem:[#allocation60_spill] sm:$0xff] }
 0x40c   : > { %v3343_v32 = vpop.permute.xlu1 %3342  ;;  %5490 = vmatprep.mubr.msk.bf16.mxu0 %vm2418_vm8, %v9173_v0  ;;  %v3738_v41 = vpop.permute.xlu0 %3737  ;;  %3562 = vrot.lane.b32.xlu1 %v8195_v40, %s5877_s13  ;;  %v4250_v40 = vsel %vm2384_vm6, %v8394_v54, %v9181_v20  ;;  %v9191_v47 = vld [vmem:[#allocation81_spill] sm:$0xff] }
 0x40d   : > { %v3984_v26 = vsel %vm2418_vm8, %v9175_v30, %v3343_v32  ;;  %v4151_v9 = vsel %vm2435_vm9, %v4122_v55, %v3738_v41  ;;  %3789 = vrot.lane.b32.xlu0 %v9165_v19, %s5872_s27  ;;  %v4042_v19 = vsel %vm2469_vm11, %v4007_v50, %v8404_v22  ;;  %v4279_v53 = vsel %vm2401_vm7, %v4250_v40, %v8384_v61  ;;  %v9189_v61 = vld [vmem:[#allocation3_spill] sm:$0xff]  ;;  %v9193_v30 = vld [vmem:[#allocation5_spill] sm:$0xff] }
 0x40e   : > { %v4178_v8 = vsel %vm2469_vm11, %v4151_v9, %v9178_v35  ;;  %v4013_v14 = vsel %vm2452_vm10, %v3984_v26, %v9179_v2  ;;  %v4152_v63 = vsel %vm2435_vm9, %v4124_v39, %v3738_v41  ;;  %v4306_v18 = vsel %vm2435_vm9, %v4279_v53, %v9187_v21  ;;  %v9192_v41 = vld [vmem:[#allocation2_spill] sm:$0xff]  ;;  %v9203_v21 = vld [vmem:[#allocation67_spill] sm:$0xff] }
 0x40f   : > { %v8513_v43 = vsel %vm2469_vm11, %v4013_v14, %v8406_v33  ;;  %v4213_v24 = vsel %vm2486_vm12, %v4178_v8, %v8394_v54  ;;  %v4335_v25 = vsel %vm2452_vm10, %v4306_v18, %v3898_v57  ;;  %v4180_v38 = vsel %vm2469_vm11, %v4152_v63, %v9190_v7  ;;  %v9194_v57 = vld [vmem:[#allocation55_spill] sm:$0xff] }
 0x410   : > { %3350 = vrot.lane.b32.xlu1 %v3333_v49, %s5876_s12  ;;  %v3983_v55 = vsel %vm2418_vm8, %v9191_v47, %v3343_v32  ;;  %v4215_v26 = vsel %vm2486_vm12, %v4180_v38, %v8394_v54  ;;  %v4368_v9 = vsel %vm2486_vm12, %v4335_v25, %v9194_v57  ;;  %v9196_v14 = vld [vmem:[#allocation59_spill] sm:$0xff]  ;;  %v9204_v38 = vld [vmem:[#allocation64_spill] sm:$0xff]  ;;  %v9205_v47 = vld [vmem:[#allocation70_spill] sm:$0xff] }
 0x411   : > { %4889 = vmatmul.mubr.bf16.gmra.mrb[36].mxu1 %v4042_v19  ;;  %3620 = vrot.lane.b32.xlu0 %v8376_v13, %s5872_s27  ;;  %v9186_v13 = vld [vmem:[#allocation19_spill] sm:$0xff]  ;;  %v9198_v19 = vld [vmem:[#allocation26_spill] sm:$0xff] }
 0x412   : > { %4896 = vmatprep.mubr.bf16.mxu1 %v4213_v24  ;;  %v4009_v49 = vsel %vm2452_vm10, %v3981_v45, %v9186_v13  ;;  %v9199_v45 = vld [vmem:[#allocation65_spill] sm:$0xff] }
 0x413   : > { %5050 = vmatmul.mubr.bf16.gmra.mrb[52].mxu0 %v4365_v60  ;;  %v4044_v0 = vsel %vm2469_vm11, %v4009_v49, %v8404_v22  ;;  %v9195_v22 = vld [vmem:[#allocation58_spill] sm:$0xff] }
 0x414   : > { %5491 = vmatprep.mubr.msk.bf16.mxu0 %vm2418_vm8, %v9185_v48  ;;  %3841 = vrot.lane.b32.xlu1 %v9188_v15, %s5873_s28  ;;  %v4011_v32 = vsel %vm2452_vm10, %v3983_v55, %v9195_v22  ;;  %v9202_v48 = vld [vmem:[#allocation62_spill] sm:$0xff]  ;;  %v9207_v22 = vld [vmem:[#allocation71_spill] sm:$0xff] }
 0x415   : > { %4429 = vrot.lane.b32.xlu0 %v9189_v61, %s5875_s11  ;;  %v4047_v36 = vsel %vm2469_vm11, %v4011_v32, %v8406_v33  ;;  %v9197_v33 = vld [vmem:[#allocation14_spill] sm:$0xff] }
 0x418   : > { %3889 = vrot.lane.b32.xlu1 %v9192_v41, %s5878_s16  ;;  %v9206_v41 = vld [vmem:[#allocation66_spill] sm:$0xff]  ;;  %s5537_s16 = sshll.u32 %s9245_s10, 3 }
 0x419   : > { %4897 = vmatmul.mubr.bf16.gmra.mrb[40].mxu1 %v4044_v0  ;;  %3937 = vrot.lane.b32.xlu0 %v9193_v30, %s5874_s29  ;;  %s332_s25 = scalar_lea.vmem %s8916_s9, %s5537_s16 }
 0x41a   : > { %4904 = vmatprep.mubr.bf16.mxu1 %v4215_v26 }
 0x41b   : > { %5058 = vmatmul.mubr.bf16.gmra.mrb[56].mxu0 %v4368_v9 }
 0x41c   : > { %5492 = vmatprep.mubr.msk.bf16.mxu0 %vm2418_vm8, %v8210_v59  ;;  %v4252_v59 = vsel %vm2384_vm6, %v8394_v54, %v9196_v14 }
 0x421   : > { %4905 = vmatmul.mubr.bf16.gmra.mrb[44].mxu1 %v4047_v36 }
 0x430   : > { %v3691_v50 = vpop.permute.xlu1 %3690  ;;  %v3852_v46 = vpop.permute.xlu0 %3851 }
 0x431   : > { %v4281_v31 = vsel %vm2401_vm7, %v4252_v59, %v3852_v46  ;;  %v4091_v40 = vsel %vm2384_vm6, %v9197_v33, %v3691_v50  ;;  %v4093_v34 = vsel %vm2384_vm6, %v9198_v19, %v3691_v50  ;;  %v9208_v50 = vld [vmem:[#allocation68_spill] sm:$0xff]  ;;  %v9209_v33 = vld [vmem:[#allocation29_spill] sm:$0xff]  ;;  %v9210_v19 = vld [vmem:[#allocation42_spill] sm:$0xff] }
 0x432   : > { %v4308_v60 = vsel %vm2435_vm9, %v4281_v31, %v9200_v56  ;;  %v4126_v13 = vsel %vm2418_vm8, %v4091_v40, %v9202_v48  ;;  %v4128_v18 = vsel %vm2418_vm8, %v4093_v34, %v9203_v21  ;;  %v9211_v34 = vld [vmem:[#allocation72_spill] sm:$0xff]  ;;  %v9216_v21 = vld [vmem:[#allocation74_spill] sm:$0xff] }
 0x434   : > { %v3854_v16 = vpop.permute.xlu1 %3853  ;;  %v3693_v10 = vpop.permute.xlu0 %3692 }
 0x435   : > { %v4096_v40 = vsel %vm2384_vm6, %v9209_v33, %v3693_v10 }
 0x438   : > { %v3800_v35 = vpop.permute.xlu1 %3799  ;;  %v8560_v8 = vpop.permute.xlu0 %3801 }
 0x439   : > { %v4254_v24 = vsel %vm2384_vm6, %v3800_v35, %v9199_v45 }
 0x43a   : > { %v4282_v63 = vsel %vm2401_vm7, %v4254_v24, %v3852_v46  ;;  %v9212_v24 = vld [vmem:[#allocation69_spill] sm:$0xff] }
 0x43b   : > { %v4310_v30 = vsel %vm2435_vm9, %v4282_v63, %v9206_v41  ;;  %v9215_v63 = vld [vmem:[#allocation87_spill] sm:$0xff]  ;;  %v9219_v41 = vld [vmem:[#allocation88_spill] sm:$0xff] }
 0x43c   : > { %v8562_v2 = vpop.permute.xlu1 %3614 }
 0x43d   : > { %v8567_v62 = vpop.permute.xlu0 %3616 }
 0x440   : > { %v8570_v20 = vpop.permute.xlu1 %3933 }
 0x441   : > { %v3900_v53 = vpop.permute.xlu0 %3899 }
 0x442   : > { %v4337_v54 = vsel %vm2452_vm10, %v4308_v60, %v3900_v53  ;;  %v4338_v57 = vsel %vm2452_vm10, %v4310_v30, %v3900_v53  ;;  %v9213_v53 = vld [vmem:[#allocation78_spill] sm:$0xff] }
 0x443   : > { %v4371_v39 = vsel %vm2486_vm12, %v4337_v54, %v9201_v42  ;;  %v4374_v46 = vsel %vm2486_vm12, %v4338_v57, %v9208_v50  ;;  %v4258_v54 = vsel %vm2384_vm6, %v8560_v8, %v9213_v53  ;;  %v9214_v42 = vld [vmem:[#allocation73_spill] sm:$0xff]  ;;  %v9226_v53 = vld [vmem:[#allocation44_spill] sm:$0xff] }
 0x444   : > { %5066 = vmatmul.mubr.bf16.gmra.mrb[60].mxu0 %v4371_v39  ;;  %v3740_v49 = vpop.permute.xlu1 %3739 }
 0x445   : > { %v4154_v15 = vsel %vm2435_vm9, %v4126_v13, %v3740_v49  ;;  %v4155_v25 = vsel %vm2435_vm9, %v4128_v18, %v3740_v49  ;;  %5493 = vmatprep.mubr.msk.bf16.mxu0 %vm2418_vm8, %v8224_v52  ;;  %v8592_v7 = vpop.permute.xlu0 %3727  ;;  %v4256_v52 = vsel %vm2384_vm6, %v3800_v35, %v9207_v22 }
 0x446   : > { %v4182_v0 = vsel %vm2469_vm11, %v4154_v15, %v9204_v38  ;;  %v4184_v55 = vsel %vm2469_vm11, %v4155_v25, %v9205_v47  ;;  %v4284_v14 = vsel %vm2401_vm7, %v4256_v52, %v3854_v16  ;;  %v9217_v15 = vld [vmem:[#allocation75_spill] sm:$0xff]  ;;  %v4285_v38 = vsel %vm2401_vm7, %v4258_v54, %v3854_v16  ;;  %v9218_v47 = vld [vmem:[#allocation77_spill] sm:$0xff] }
 0x447   : > { %v4218_v26 = vsel %vm2486_vm12, %v4182_v0, %v3800_v35  ;;  %v4220_v36 = vsel %vm2486_vm12, %v4184_v55, %v3800_v35  ;;  %v4098_v35 = vsel %vm2384_vm6, %v9210_v19, %v3693_v10  ;;  %v4312_v45 = vsel %vm2435_vm9, %v4284_v14, %v9211_v34  ;;  %v9224_v34 = vld [vmem:[#allocation100_spill] sm:$0xff] }
 0x448   : > { %v8602_v9 = vpop.permute.xlu1 %3560  ;;  %4912 = vmatprep.mubr.bf16.mxu1 %v4218_v26  ;;  %v4132_v48 = vsel %vm2418_vm8, %v4098_v35, %v9215_v63  ;;  %v9220_v26 = vld [vmem:[#allocation82_spill] sm:$0xff]  ;;  %v9228_v63 = vld [vmem:[#allocation95_spill] sm:$0xff] }
 0x449   : > { %v8606_v32 = vpop.permute.xlu0 %3787  ;;  %4913 = vmatmul.mubr.bf16.gmra.mrb[48].mxu1 %v8513_v43  ;;  %v4314_v57 = vsel %vm2435_vm9, %v4285_v38, %v9220_v26  ;;  %v9234_v26 = vld [vmem:[#allocation107_spill] sm:$0xff] }
 0x44a   : > { %4920 = vmatprep.mubr.bf16.mxu1 %v4220_v36 }
 0x44c   : > { %5074 = vmatmul.mubr.bf16.gmra.mrb[64].mxu0 %v4374_v46  ;;  %v3902_v59 = vpop.permute.xlu1 %3901  ;;  %v9221_v46 = vld [vmem:[#allocation86_spill] sm:$0xff] }
 0x44d   : > { %5494 = vmatprep.mubr.msk.bf16.mxu0 %vm2418_vm8, %v8260_v29  ;;  %v3345_v31 = vpop.permute.xlu0 %3344  ;;  %v4340_v60 = vsel %vm2452_vm10, %v4312_v45, %v3902_v59  ;;  %v4341_v16 = vsel %vm2452_vm10, %v4314_v57, %v3902_v59  ;;  %v9222_v59 = vld [vmem:[#allocation89_spill] sm:$0xff] }
 0x44e   : > { %v3986_v43 = vsel %vm2418_vm8, %v8155_v23, %v3345_v31  ;;  %v4130_v23 = vsel %vm2418_vm8, %v4096_v40, %v9214_v42  ;;  %v3987_v10 = vsel %vm2418_vm8, %v8184_v51, %v3345_v31  ;;  %v4377_v18 = vsel %vm2486_vm12, %v4340_v60, %v9216_v21  ;;  %v9223_v40 = vld [vmem:[#allocation91_spill] sm:$0xff]  ;;  %v9230_v21 = vld [vmem:[#allocation96_spill] sm:$0xff] }
 0x44f   : > { %v4015_v56 = vsel %vm2452_vm10, %v3986_v43, %v9212_v24  ;;  %v4017_v55 = vsel %vm2452_vm10, %v3987_v10, %v9218_v47  ;;  %v4380_v14 = vsel %vm2486_vm12, %v4341_v16, %v9221_v46  ;;  %v4260_v43 = vsel %vm2384_vm6, %v8560_v8, %v9223_v40  ;;  %v9227_v42 = vld [vmem:[#allocation47_spill] sm:$0xff]  ;;  %v9232_v47 = vld [vmem:[#allocation97_spill] sm:$0xff] }
 0x450   : > { %v4052_v29 = vsel %vm2469_vm11, %v4015_v56, %v8562_v2  ;;  %v3347_v51 = vpop.permute.xlu1 %3346  ;;  %v4054_v22 = vsel %vm2469_vm11, %v4017_v55, %v8562_v2  ;;  %v9225_v56 = vld [vmem:[#allocation93_spill] sm:$0xff] }
 0x451   : > { %v3742_v39 = vpop.permute.xlu0 %3741  ;;  %4921 = vmatmul.mubr.bf16.gmra.mrb[52].mxu1 %v4052_v29  ;;  %v3990_v10 = vsel %vm2418_vm8, %v8237_v1, %v3347_v51 }
 0x452   : > { %v4157_v13 = vsel %vm2435_vm9, %v4130_v23, %v3742_v39  ;;  %v4158_v49 = vsel %vm2435_vm9, %v4132_v48, %v3742_v39  ;;  %v4021_v55 = vsel %vm2452_vm10, %v3990_v10, %v9232_v47 }
 0x453   : > { %v4186_v25 = vsel %vm2469_vm11, %v4157_v13, %v9217_v15  ;;  %v4188_v30 = vsel %vm2469_vm11, %v4158_v49, %v9219_v41  ;;  %v9229_v13 = vld [vmem:[#allocation102_spill] sm:$0xff] }
 0x454   : > { %5082 = vmatmul.mubr.bf16.gmra.mrb[68].mxu0 %v4377_v18  ;;  %v4223_v0 = vsel %vm2486_vm12, %v4186_v25, %v8560_v8  ;;  %v4225_v52 = vsel %vm2486_vm12, %v4188_v30, %v8560_v8  ;;  %v9231_v25 = vld [vmem:[#allocation103_spill] sm:$0xff]  ;;  %v9233_v41 = vld [vmem:[#allocation98_spill] sm:$0xff] }
 0x455   : > { %4928 = vmatprep.mubr.bf16.mxu1 %v4223_v0  ;;  %5495 = vmatprep.mubr.msk.bf16.mxu0 %vm2418_vm8, %v8280_v37  ;;  %v3989_v37 = vsel %vm2418_vm8, %v8200_v12, %v3347_v51 }
 0x456   : > { %v4019_v2 = vsel %vm2452_vm10, %v3989_v37, %v9222_v59  ;;  %v4059_v37 = vsel %vm2469_vm11, %v4021_v55, %v8567_v62 }
 0x457   : > { %v4057_v12 = vsel %vm2469_vm11, %v4019_v2, %v8567_v62  ;;  %v9237_v62 = vld [vmem:[#allocation105_spill] sm:$0xff] }
 0x459   : > { %4929 = vmatmul.mubr.bf16.gmra.mrb[56].mxu1 %v4054_v22 }
 0x45a   : > { %4936 = vmatprep.mubr.bf16.mxu1 %v4225_v52  ;;  %v3695_v36 = vpop.permute.xlu1 %3694  ;;  %v3856_v50 = vpop.permute.xlu0 %3855 }
 0x45b   : > { %v4101_v54 = vsel %vm2384_vm6, %v9226_v53, %v3695_v36  ;;  %v4103_v8 = vsel %vm2384_vm6, %v9227_v42, %v3695_v36 }
 0x45c   : > { %5090 = vmatmul.mubr.bf16.gmra.mrb[72].mxu0 %v4380_v14  ;;  %v4134_v18 = vsel %vm2418_vm8, %v4101_v54, %v9230_v21  ;;  %v4136_v38 = vsel %vm2418_vm8, %v4103_v8, %v9231_v25 }
 0x45d   : > { %5496 = vmatprep.mubr.msk.bf16.mxu0 %vm2418_vm8, %v8382_v27  ;;  %v4287_v27 = vsel %vm2401_vm7, %v4260_v43, %v3856_v50 }
 0x45e   : > { %v8667_v31 = vpop.permute.xlu1 %3857  ;;  %v8669_v33 = vpop.permute.xlu0 %3696  ;;  %v4316_v60 = vsel %vm2435_vm9, %v4287_v27, %v9225_v56 }
 0x461   : > { %4937 = vmatmul.mubr.bf16.gmra.mrb[60].mxu1 %v4057_v12  ;;  %v9236_v12 = vld [vmem:[#allocation109_spill] sm:$0xff] }
 0x462   : > { %v3804_v19 = vpop.permute.xlu1 %3803  ;;  %v8676_v35 = vpop.permute.xlu0 %3805 }
 0x463   : > { %v4262_v45 = vsel %vm2384_vm6, %v3804_v19, %v9224_v34  ;;  %v4264_v40 = vsel %vm2384_vm6, %v3804_v19, %v9236_v12 }
 0x464   : > { %v4288_v23 = vsel %vm2401_vm7, %v4262_v45, %v3856_v50  ;;  %v9235_v50 = vld [vmem:[#allocation104_spill] sm:$0xff] }
 0x465   : > { %v4318_v49 = vsel %vm2435_vm9, %v4288_v23, %v9229_v13 }
 0x466   : > { %v8681_v24 = vpop.permute.xlu1 %3618  ;;  %v3904_v29 = vpop.permute.xlu0 %3903 }
 0x467   : > { %v4343_v39 = vsel %vm2452_vm10, %v4316_v60, %v3904_v29  ;;  %v4344_v16 = vsel %vm2452_vm10, %v4318_v49, %v3904_v29 }
 0x468   : > { %v4383_v48 = vsel %vm2486_vm12, %v4343_v39, %v9228_v63  ;;  %v4386_v46 = vsel %vm2486_vm12, %v4344_v16, %v9235_v50  ;;  %v4108_v63 = vsel %vm2384_vm6, %v8410_v3, %v8669_v33  ;;  %v9241_v50 = vld [vmem:[#allocation27_spill] sm:$0xff] }
 0x469   : > { %5098 = vmatmul.mubr.bf16.gmra.mrb[76].mxu0 %v4383_v48 }
 0x46a   : > { %v3744_v15 = vpop.permute.xlu1 %3743  ;;  %5497 = vmatprep.mubr.msk.bf16.mxu0 %vm2418_vm8, %v8389_v44  ;;  %v4426_v0 = vpop.permute.xlu0 %4425 }
 0x46b   : > { %v4160_v1 = vsel %vm2435_vm9, %v4134_v18, %v3744_v15  ;;  %v4161_v51 = vsel %vm2435_vm9, %v4136_v38, %v3744_v15 }
 0x46c   : > { %v4190_v30 = vsel %vm2469_vm11, %v4160_v1, %v9233_v41  ;;  %v4192_v57 = vsel %vm2469_vm11, %v4161_v51, %v9234_v26  ;;  %v9239_v26 = vld [vmem:[#allocation106_spill] sm:$0xff] }
 0x46d   : > { %v4228_v22 = vsel %vm2486_vm12, %v4190_v30, %v3804_v19  ;;  %v4230_v36 = vsel %vm2486_vm12, %v4192_v57, %v3804_v19  ;;  %v4460_v19 = vsel %vm2401_vm7, %v8350_v58, %v4426_v0  ;;  %v4542_v57 = vrot.slane %v9239_v26, 1 }
 0x46e   : > { %v3840_v52 = vpop.permute.xlu1 %3839  ;;  %4944 = vmatprep.mubr.bf16.mxu1 %v4228_v22  ;;  %v3888_v44 = vpop.permute.xlu0 %3887  ;;  %v4539_v39 = vrot.slane %v4460_v19, 1  ;;  %v9240_v22 = vld [vmem:[#allocation18_spill] sm:$0xff] }
 0x46f   : > { %4945 = vmatmul.mubr.bf16.gmra.mrb[64].mxu1 %v4059_v37 }
 0x470   : > { %4952 = vmatprep.mubr.bf16.mxu1 %v4230_v36 }
 0x471   : > { %5106 = vmatmul.mubr.bf16.gmra.mrb[80].mxu0 %v4386_v46 }
 0x472   : > { %v4428_v14 = vpop.permute.xlu1 %4427  ;;  %5498 = vmatprep.mubr.msk.bf16.mxu0 %vm2418_vm8, %v8467_v17  ;;  %v3349_v59 = vpop.permute.xlu0 %3348  ;;  %v9238_v17 = vld [vmem:[#allocation48_spill] sm:$0xff] }
 0x473   : > { %v3992_v2 = vsel %vm2418_vm8, %v8356_v5, %v3349_v59  ;;  %v4462_v34 = vsel %vm2401_vm7, %v8352_v11, %v4428_v14  ;;  %v4106_v60 = vsel %vm2384_vm6, %v9238_v17, %v8669_v33  ;;  %v4290_v5 = vsel %vm2401_vm7, %v4264_v40, %v8667_v31 }
 0x474   : > { %v4023_v43 = vsel %vm2452_vm10, %v3992_v2, %v9237_v62  ;;  %v3993_v29 = vsel %vm2418_vm8, %v8368_v4, %v3349_v59  ;;  %v4540_v53 = vrot.slane %v4462_v34, 1  ;;  %v4266_v11 = vsel %vm2384_vm6, %v8676_v35, %v3840_v52  ;;  %v8792_v59 = vld [vmem:[%s8913_s6] ss:$0 sm:$0xff] }
 0x475   : > { %v4062_v27 = vsel %vm2469_vm11, %v4023_v43, %v8681_v24  ;;  %v4320_v54 = vsel %vm2435_vm9, %v4290_v5, %v8419_v6  ;;  %v4138_v8 = vsel %vm2418_vm8, %v4106_v60, %v8592_v7  ;;  %v4025_v4 = vsel %vm2452_vm10, %v3993_v29, %v8602_v9 }
 0x476   : > { %v3730_v45 = vpop.permute.xlu1 %3729  ;;  %v4291_v7 = vsel %vm2401_vm7, %v4266_v11, %v8667_v31  ;;  %v4541_v9 = vsel %vm825_vm1, %v4539_v39, %v4540_v53 }
 0x477   : > { %v3936_v56 = vpop.permute.xlu0 %3935  ;;  %4953 = vmatmul.mubr.bf16.gmra.mrb[68].mxu1 %v4062_v27  ;;  %v4140_v13 = vsel %vm2418_vm8, %v4108_v63, %v3730_v45  ;;  %v4322_v33 = vsel %vm2435_vm9, %v4291_v7, %v3888_v44 }
 0x47a   : > { %v3906_v42 = vpop.permute.xlu1 %3905 }
 0x47b   : > { %v3746_v23 = vpop.permute.xlu0 %3745  ;;  %v4346_v10 = vsel %vm2452_vm10, %v4320_v54, %v3906_v42  ;;  %v4347_v15 = vsel %vm2452_vm10, %v4322_v33, %v3906_v42 }
 0x47c   : > { %v4163_v58 = vsel %vm2435_vm9, %v4138_v8, %v3746_v23  ;;  %v4389_v6 = vsel %vm2486_vm12, %v4346_v10, %v8570_v20  ;;  %v4164_v21 = vsel %vm2435_vm9, %v4140_v13, %v3746_v23  ;;  %v4392_v1 = vsel %vm2486_vm12, %v4347_v15, %v3936_v56 }
 0x47d   : > { %v4194_v48 = vsel %vm2469_vm11, %v4163_v58, %v8606_v32  ;;  %5114 = vmatmul.mubr.bf16.gmra.mrb[84].mxu0 %v4389_v6  ;;  %v4064_v32 = vsel %vm2469_vm11, %v4025_v4, %v8681_v24 }
 0x47e   : > { %v4233_v49 = vsel %vm2486_vm12, %v4194_v48, %v8676_v35  ;;  %v3563_v3 = vpop.permute.xlu1 %3562  ;;  %5499 = vmatprep.mubr.msk.bf16.mxu0 %vm2418_vm8, %v4541_v9 }
 0x47f   : > { %4960 = vmatprep.mubr.bf16.mxu1 %v4233_v49  ;;  %v3790_v20 = vpop.permute.xlu0 %3789 }
 0x480   : > { %v4196_v31 = vsel %vm2469_vm11, %v4164_v21, %v3790_v20  ;;  %4961 = vmatmul.mubr.bf16.gmra.mrb[72].mxu1 %v4064_v32 }
 0x481   : > { %v4235_v18 = vsel %vm2486_vm12, %v4196_v31, %v8676_v35 }
 0x482   : > { %4968 = vmatprep.mubr.bf16.mxu1 %v4235_v18  ;;  %v3351_v25 = vpop.permute.xlu1 %3350 }
 0x483   : > { %v3621_v38 = vpop.permute.xlu0 %3620  ;;  %v3995_v0 = vsel %vm2418_vm8, %v8439_v28, %v3351_v25 }
 0x484   : > { %v4027_v24 = vsel %vm2452_vm10, %v3995_v0, %v3563_v3 }
 0x485   : > { %5122 = vmatmul.mubr.bf16.gmra.mrb[88].mxu0 %v4392_v1  ;;  %v4067_v51 = vsel %vm2469_vm11, %v4027_v24, %v3621_v38 }
 0x486   : > { %v3842_v47 = vpop.permute.xlu1 %3841 }
 0x487   : > { %v4430_v55 = vpop.permute.xlu0 %4429  ;;  %v4268_v41 = vsel %vm2384_vm6, %v8676_v35, %v3842_v47 }
 0x488   : > { %v4464_v30 = vsel %vm2401_vm7, %v9189_v61, %v4430_v55  ;;  %4969 = vmatmul.mubr.bf16.gmra.mrb[76].mxu1 %v4067_v51  ;;  %v4292_v52 = vsel %vm2401_vm7, %v4268_v41, %v9240_v22 }
 0x489   : > { %v4543_v16 = vrot.slane %v4464_v30, 1 }
 0x48a   : > { %v3890_v28 = vpop.permute.xlu1 %3889 }
 0x48b   : > { %v4544_v44 = vsel %vm825_vm1, %v4542_v57, %v4543_v16  ;;  %v3938_v37 = vpop.permute.xlu0 %3937  ;;  %v4324_v36 = vsel %vm2435_vm9, %v4292_v52, %v3890_v28 }
 0x48c   : > { %5500 = vmatprep.mubr.msk.bf16.mxu0 %vm2418_vm8, %v4544_v44  ;;  %v4348_v35 = vsel %vm2452_vm10, %v4324_v36, %v9241_v50 }
 0x48d   : > { %v4395_v61 = vsel %vm2486_vm12, %v4348_v35, %v3938_v37 }
 0x48e   : > { %5130 = vmatmul.mubr.bf16.gmra.mrb[92].mxu0 %v4395_v61 }
 0x49b   : > { %v5572_v46 = vpop.f32.mrb[16].mxu1 }
 0x49c   : > { %v5573_v14 = vpop.f32.mrb[17].mxu1 }
 0x49d   : > { %v5574_v2 = vadd.f32 %v5573_v14, %v5572_v46  ;;  %v5575_v12 = vpop.f32.mrb[18].mxu1  ;;  %v5011_v40 = vpop.f32.mrb[32].mxu0 }
 0x49e   : > { %v5576_v62 = vpop.f32.mrb[19].mxu1  ;;  %v5013_v43 = vpop.f32.mrb[33].mxu0 }
 0x49f   : > { %v4851_v27 = vadd.f32 %v5574_v2, %v8792_v59  ;;  %v5577_v34 = vadd.f32 %v5576_v62, %v5575_v12  ;;  %v5014_v45 = vpop.f32.mrb[34].mxu0 }
 0x4a0   : > { %v5016_v56 = vpop.f32.mrb[35].mxu0 }
 0x4a1   : > { %v5012_v17 = vadd.f32 %v5011_v40, %v4851_v27  ;;  %v4854_v60 = vadd.f32 %v5577_v34, %v8792_v59 }
 0x4a3   : > { %v5015_v5 = vadd.f32 %v5014_v45, %v4854_v60  ;;  %v5578_v19 = vpop.f32.mrb[20].mxu1  ;;  %v5138_v53 = vmax.f32 %v5012_v17, 0.0 }
 0x4a4   : > { %v5579_v29 = vpop.f32.mrb[21].mxu1 }
 0x4a5   : > { %v5139_v11 = vmax.f32 %v5015_v5, 0.0  ;;  %v5580_v54 = vadd.f32 %v5579_v29, %v5578_v19  ;;  %v5581_v42 = vpop.f32.mrb[22].mxu1  ;;  %v5019_v8 = vpop.f32.mrb[36].mxu0 }
 0x4a6   : > { %v5582_v23 = vpop.f32.mrb[23].mxu1  ;;  %v5021_v39 = vpop.f32.mrb[37].mxu0 }
 0x4a7   : > { %v8796_v10 = vpack.c.bf16 %v5139_v11, %v5138_v53  ;;  %v4859_v58 = vadd.f32 %v5580_v54, %v8792_v59  ;;  %v5583_v4 = vadd.f32 %v5582_v23, %v5581_v42  ;;  %v5022_v63 = vpop.f32.mrb[38].mxu0 }
 0x4a8   : > { %v5024_v6 = vpop.f32.mrb[39].mxu0 }
 0x4a9   : > { %v5020_v48 = vadd.f32 %v5019_v8, %v4859_v58  ;;  %v4862_v7 = vadd.f32 %v5583_v4, %v8792_v59 }
 0x4ab   : > { %v5023_v13 = vadd.f32 %v5022_v63, %v4862_v7  ;;  %v5584_v49 = vpop.f32.mrb[24].mxu1  ;;  %v5140_v21 = vmax.f32 %v5020_v48, 0.0 }
 0x4ac   : > { %v5585_v9 = vpop.f32.mrb[25].mxu1 }
 0x4ad   : > { %v5141_v3 = vmax.f32 %v5023_v13, 0.0  ;;  %v5586_v20 = vadd.f32 %v5585_v9, %v5584_v49  ;;  %v5587_v32 = vpop.f32.mrb[26].mxu1  ;;  %v5027_v31 = vpop.f32.mrb[40].mxu0 }
 0x4ae   : > { %v5588_v33 = vpop.f32.mrb[27].mxu1  ;;  %v5029_v18 = vpop.f32.mrb[41].mxu0 }
 0x4af   : > { %v8800_v15 = vpack.c.bf16 %v5141_v3, %v5140_v21  ;;  %v4867_v25 = vadd.f32 %v5586_v20, %v8792_v59  ;;  %v5589_v38 = vadd.f32 %v5588_v33, %v5587_v32  ;;  %v5030_v0 = vpop.f32.mrb[42].mxu0  ;;  %v8819_v18 = vld [vmem:[%s8914_s7] sm:$0xf] }
 0x4b0   : > { %v5032_v1 = vpop.f32.mrb[43].mxu0  ;;  %5700 = vmatprep.mubr.msk.f32.mxu1 %vm2384_vm6, %v8819_v18 }
 0x4b1   : > { %v5028_v24 = vadd.f32 %v5027_v31, %v4867_v25  ;;  %v4870_v51 = vadd.f32 %v5589_v38, %v8792_v59 }
 0x4b3   : > { %v5031_v47 = vadd.f32 %v5030_v0, %v4870_v51  ;;  %v5590_v55 = vpop.f32.mrb[28].mxu1  ;;  %v5142_v30 = vmax.f32 %v5028_v24, 0.0 }
 0x4b4   : > { %v5591_v41 = vpop.f32.mrb[29].mxu1 }
 0x4b5   : > { %v5143_v26 = vmax.f32 %v5031_v47, 0.0  ;;  %v5592_v57 = vadd.f32 %v5591_v41, %v5590_v55  ;;  %v5593_v16 = vpop.f32.mrb[30].mxu1 }
 0x4b6   : > { %v5594_v28 = vpop.f32.mrb[31].mxu1 }
 0x4b7   : > { %v8804_v22 = vpack.c.bf16 %v5143_v26, %v5142_v30  ;;  %v5595_v52 = vadd.f32 %v5594_v28, %v5593_v16  ;;  %v4875_v44 = vadd.f32 %v5592_v57, %v8792_v59 }
 0x4b9   : > { %v4878_v35 = vadd.f32 %v5595_v52, %v8792_v59 }
 0x4d6   : > { %v5035_v37 = vpop.f32.mrb[44].mxu0 }
 0x4d7   : > { %v5036_v36 = vadd.f32 %v5035_v37, %v4875_v44  ;;  %v5037_v50 = vpop.f32.mrb[45].mxu0  ;;  %v5171_v37 = vld [vmem:[%s8915_s8] sm:$0xf] }
 0x4d8   : > { %v5038_v61 = vpop.f32.mrb[46].mxu0  ;;  %5174 = vperm.xlu1 %5812, %v5171_v37  }
 0x4d9   : > { %v5039_v46 = vadd.f32 %v5038_v61, %v4878_v35  ;;  %v5040_v14 = vpop.f32.mrb[47].mxu0  ;;  %v5144_v2 = vmax.f32 %v5036_v36, 0.0 }
 0x4db   : > { %v5145_v12 = vmax.f32 %v5039_v46, 0.0 }
 0x4dc   : > { %v5596_v40 = vpop.f32.mrb[32].mxu1 }
 0x4dd   : > { %v8808_v62 = vpack.c.bf16 %v5145_v12, %v5144_v2  ;;  %v5597_v43 = vpop.f32.mrb[33].mxu1 }
 0x4de   : > { %v5598_v27 = vadd.f32 %v5597_v43, %v5596_v40  ;;  %v5599_v34 = vpop.f32.mrb[34].mxu1  ;;  %v5043_v45 = vpop.f32.mrb[48].mxu0 }
 0x4df   : > { %v5600_v56 = vpop.f32.mrb[35].mxu1  ;;  %v5045_v17 = vpop.f32.mrb[49].mxu0 }
 0x4e0   : > { %v4883_v60 = vadd.f32 %v5598_v27, %v8792_v59  ;;  %v5601_v5 = vadd.f32 %v5600_v56, %v5599_v34  ;;  %v5046_v19 = vpop.f32.mrb[50].mxu0 }
 0x4e1   : > { %v5048_v29 = vpop.f32.mrb[51].mxu0 }
 0x4e2   : > { %v5044_v53 = vadd.f32 %v5043_v45, %v4883_v60  ;;  %v4886_v11 = vadd.f32 %v5601_v5, %v8792_v59 }
 0x4e4   : > { %v5047_v54 = vadd.f32 %v5046_v19, %v4886_v11  ;;  %v5602_v42 = vpop.f32.mrb[36].mxu1  ;;  %v5146_v23 = vmax.f32 %v5044_v53, 0.0 }
 0x4e5   : > { %v5603_v8 = vpop.f32.mrb[37].mxu1 }
 0x4e6   : > { %v5147_v39 = vmax.f32 %v5047_v54, 0.0  ;;  %v5604_v58 = vadd.f32 %v5603_v8, %v5602_v42  ;;  %v5605_v4 = vpop.f32.mrb[38].mxu1  ;;  %v5051_v63 = vpop.f32.mrb[52].mxu0 }
 0x4e7   : > { %v5606_v6 = vpop.f32.mrb[39].mxu1  ;;  %v5053_v48 = vpop.f32.mrb[53].mxu0 }
 0x4e8   : > { %v8812_v7 = vpack.c.bf16 %v5147_v39, %v5146_v23  ;;  %v4891_v13 = vadd.f32 %v5604_v58, %v8792_v59  ;;  %v5607_v49 = vadd.f32 %v5606_v6, %v5605_v4  ;;  %v5054_v9 = vpop.f32.mrb[54].mxu0 }
 0x4e9   : > { %v5056_v21 = vpop.f32.mrb[55].mxu0 }
 0x4ea   : > { %v5052_v3 = vadd.f32 %v5051_v63, %v4891_v13  ;;  %v4894_v20 = vadd.f32 %v5607_v49, %v8792_v59 }
 0x4ec   : > { %v5055_v32 = vadd.f32 %v5054_v9, %v4894_v20  ;;  %v5608_v31 = vpop.f32.mrb[40].mxu1  ;;  %v5148_v25 = vmax.f32 %v5052_v3, 0.0 }
 0x4ed   : > { %v5609_v33 = vpop.f32.mrb[41].mxu1 }
 0x4ee   : > { %v5149_v38 = vmax.f32 %v5055_v32, 0.0  ;;  %v5610_v0 = vadd.f32 %v5609_v33, %v5608_v31  ;;  %v5611_v1 = vpop.f32.mrb[42].mxu1  ;;  %v5059_v24 = vpop.f32.mrb[56].mxu0 }
 0x4ef   : > { %v5612_v51 = vpop.f32.mrb[43].mxu1  ;;  %v5061_v47 = vpop.f32.mrb[57].mxu0 }
 0x4f0   : > { %v8823_v55 = vpack.c.bf16 %v5149_v38, %v5148_v25  ;;  %v4899_v41 = vadd.f32 %v5610_v0, %v8792_v59  ;;  %v5613_v30 = vadd.f32 %v5612_v51, %v5611_v1  ;;  %v5062_v26 = vpop.f32.mrb[58].mxu0 }
 0x4f1   : > { %v5064_v57 = vpop.f32.mrb[59].mxu0 }
 0x4f2   : > { %v5060_v16 = vadd.f32 %v5059_v24, %v4899_v41  ;;  %v4902_v28 = vadd.f32 %v5613_v30, %v8792_v59 }
 0x4f4   : > { %v5063_v52 = vadd.f32 %v5062_v26, %v4902_v28  ;;  %v5614_v44 = vpop.f32.mrb[44].mxu1  ;;  %v5150_v50 = vmax.f32 %v5060_v16, 0.0 }
 0x4f5   : > { %v5615_v36 = vpop.f32.mrb[45].mxu1 }
 0x4f6   : > { %v5151_v35 = vmax.f32 %v5063_v52, 0.0  ;;  %v5616_v61 = vadd.f32 %v5615_v36, %v5614_v44  ;;  %v5617_v46 = vpop.f32.mrb[46].mxu1 }
 0x4f7   : > { %v5618_v14 = vpop.f32.mrb[47].mxu1 }
 0x4f8   : > { %v8830_v2 = vpack.c.bf16 %v5151_v35, %v5150_v50  ;;  %v5619_v12 = vadd.f32 %v5618_v14, %v5617_v46  ;;  %v4907_v40 = vadd.f32 %v5616_v61, %v8792_v59 }
 0x4fa   : > { %v4910_v45 = vadd.f32 %v5619_v12, %v8792_v59 }
 0x517   : > { %v5067_v43 = vpop.f32.mrb[60].mxu0 }
 0x518   : > { %v5068_v27 = vadd.f32 %v5067_v43, %v4907_v40  ;;  %v5069_v34 = vpop.f32.mrb[61].mxu0 }
 0x519   : > { %v5070_v56 = vpop.f32.mrb[62].mxu0 }
 0x51a   : > { %v5071_v17 = vadd.f32 %v5070_v56, %v4910_v45  ;;  %v5072_v60 = vpop.f32.mrb[63].mxu0  ;;  %v5152_v5 = vmax.f32 %v5068_v27, 0.0 }
 0x51c   : > { %v5153_v19 = vmax.f32 %v5071_v17, 0.0  ;;  %v5620_v29 = vpop.f32.mrb[48].mxu1 }
 0x51d   : > { %v5621_v53 = vpop.f32.mrb[49].mxu1 }
 0x51e   : > { %v8834_v11 = vpack.c.bf16 %v5153_v19, %v5152_v5  ;;  %v5622_v54 = vadd.f32 %v5621_v53, %v5620_v29  ;;  %v5623_v42 = vpop.f32.mrb[50].mxu1 }
 0x51f   : > { %v5075_v8 = vpop.f32.mrb[64].mxu0  ;;  %v5624_v23 = vpop.f32.mrb[51].mxu1 }
 0x520   : > { %v4915_v39 = vadd.f32 %v5622_v54, %v8792_v59  ;;  %v5625_v58 = vadd.f32 %v5624_v23, %v5623_v42  ;;  %v5077_v4 = vpop.f32.mrb[65].mxu0 }
 0x521   : > { %v5078_v63 = vpop.f32.mrb[66].mxu0 }
 0x522   : > { %v5076_v6 = vadd.f32 %v5075_v8, %v4915_v39  ;;  %v4918_v48 = vadd.f32 %v5625_v58, %v8792_v59  ;;  %v5080_v13 = vpop.f32.mrb[67].mxu0 }
 0x524   : > { %v5079_v49 = vadd.f32 %v5078_v63, %v4918_v48  ;;  %v5626_v9 = vpop.f32.mrb[52].mxu1  ;;  %v5154_v3 = vmax.f32 %v5076_v6, 0.0 }
 0x525   : > { %v5627_v21 = vpop.f32.mrb[53].mxu1 }
 0x526   : > { %v5155_v20 = vmax.f32 %v5079_v49, 0.0  ;;  %v5628_v32 = vadd.f32 %v5627_v21, %v5626_v9  ;;  %v5629_v31 = vpop.f32.mrb[54].mxu1 }
 0x527   : > { %v5083_v33 = vpop.f32.mrb[68].mxu0  ;;  %v5630_v25 = vpop.f32.mrb[55].mxu1 }
 0x528   : > { %v5738_v0 = vpack.c.bf16 %v5155_v20, %v5154_v3  ;;  %v4923_v1 = vadd.f32 %v5628_v32, %v8792_v59  ;;  %v5631_v24 = vadd.f32 %v5630_v25, %v5629_v31  ;;  %v5085_v51 = vpop.f32.mrb[69].mxu0 }
 0x529   : > { %v5086_v47 = vpop.f32.mrb[70].mxu0 }
 0x52a   : > { %v5084_v41 = vadd.f32 %v5083_v33, %v4923_v1  ;;  %v4926_v30 = vadd.f32 %v5631_v24, %v8792_v59  ;;  %v5088_v26 = vpop.f32.mrb[71].mxu0  ;;  %5740 = vmatprep.subr.msk.bf16.mxu1 %vm8840_vm0, %v5738_v0 }
 0x52b   : > { %5743 = vmatpush3.bf16.xpose.msk.msra.mxu1 %vm8840_vm0, %v8796_v10 }
 0x52c   : > { %v5087_v57 = vadd.f32 %v5086_v47, %v4926_v30  ;;  %v5632_v16 = vpop.f32.mrb[56].mxu1  ;;  %v5156_v52 = vmax.f32 %v5084_v41, 0.0 }
 0x52d   : > { %v5633_v28 = vpop.f32.mrb[57].mxu1 }
 0x52e   : > { %v5157_v44 = vmax.f32 %v5087_v57, 0.0  ;;  %v5634_v37 = vadd.f32 %v5633_v28, %v5632_v16  ;;  %v5635_v36 = vpop.f32.mrb[58].mxu1 }
 0x52f   : > { %v5091_v50 = vpop.f32.mrb[72].mxu0  ;;  %v5636_v35 = vpop.f32.mrb[59].mxu1 }
 0x530   : > { %v5744_v61 = vpack.c.bf16 %v5157_v44, %v5156_v52  ;;  %v4931_v46 = vadd.f32 %v5634_v37, %v8792_v59  ;;  %v5637_v14 = vadd.f32 %v5636_v35, %v5635_v36  ;;  %v5093_v12 = vpop.f32.mrb[73].mxu0 }
 0x531   : > { %v5094_v40 = vpop.f32.mrb[74].mxu0 }
 0x532   : > { %v5092_v43 = vadd.f32 %v5091_v50, %v4931_v46  ;;  %v4934_v27 = vadd.f32 %v5637_v14, %v8792_v59  ;;  %v5096_v34 = vpop.f32.mrb[75].mxu0  ;;  %5746 = vmatprep.subr.msk.bf16.mxu1 %vm8840_vm0, %v5744_v61 }
 0x533   : > { %5749 = vmatpush3.bf16.xpose.msk.msra.mxu1 %vm8840_vm0, %v8800_v15 }
 0x534   : > { %v5095_v10 = vadd.f32 %v5094_v40, %v4934_v27  ;;  %v5638_v45 = vpop.f32.mrb[60].mxu1  ;;  %v5158_v17 = vmax.f32 %v5092_v43, 0.0 }
 0x535   : > { %v5639_v56 = vpop.f32.mrb[61].mxu1 }
 0x536   : > { %v5159_v60 = vmax.f32 %v5095_v10, 0.0  ;;  %v5640_v5 = vadd.f32 %v5639_v56, %v5638_v45  ;;  %v5641_v19 = vpop.f32.mrb[62].mxu1 }
 0x537   : > { %v5642_v29 = vpop.f32.mrb[63].mxu1 }
 0x538   : > { %v5750_v53 = vpack.c.bf16 %v5159_v60, %v5158_v17  ;;  %v5643_v54 = vadd.f32 %v5642_v29, %v5641_v19  ;;  %v4939_v42 = vadd.f32 %v5640_v5, %v8792_v59 }
 0x53a   : > { %5752 = vmatprep.subr.msk.bf16.mxu1 %vm8840_vm0, %v5750_v53  ;;  %v4942_v15 = vadd.f32 %v5643_v54, %v8792_v59 }
 0x53b   : > { %5755 = vmatpush3.bf16.xpose.msk.msra.mxu1 %vm8840_vm0, %v8804_v22 }
 0x53c   : > { %v5099_v8 = vpop.f32.mrb[76].mxu0 }
 0x53d   : > { %v5100_v23 = vadd.f32 %v5099_v8, %v4939_v42  ;;  %v5101_v39 = vpop.f32.mrb[77].mxu0 }
 0x53e   : > { %v5102_v58 = vpop.f32.mrb[78].mxu0 }
 0x53f   : > { %v5103_v4 = vadd.f32 %v5102_v58, %v4942_v15  ;;  %v5104_v63 = vpop.f32.mrb[79].mxu0  ;;  %v5160_v6 = vmax.f32 %v5100_v23, 0.0 }
 0x541   : > { %v5161_v48 = vmax.f32 %v5103_v4, 0.0 }
 0x542   : > { %v5644_v13 = vpop.f32.mrb[64].mxu1 }
 0x543   : > { %v5756_v49 = vpack.c.bf16 %v5161_v48, %v5160_v6  ;;  %v5645_v9 = vpop.f32.mrb[65].mxu1 }
 0x544   : > { %v5646_v21 = vadd.f32 %v5645_v9, %v5644_v13  ;;  %v5647_v3 = vpop.f32.mrb[66].mxu1  ;;  %v5107_v20 = vpop.f32.mrb[80].mxu0 }
 0x545   : > { %v5648_v32 = vpop.f32.mrb[67].mxu1  ;;  %v5109_v31 = vpop.f32.mrb[81].mxu0  ;;  %5758 = vmatprep.subr.msk.bf16.mxu1 %vm8840_vm0, %v5756_v49 }
 0x546   : > { %v4947_v22 = vadd.f32 %v5646_v21, %v8792_v59  ;;  %v5649_v33 = vadd.f32 %v5648_v32, %v5647_v3  ;;  %v5110_v25 = vpop.f32.mrb[82].mxu0  ;;  %5761 = vmatpush3.bf16.xpose.msk.msra.mxu1 %vm8840_vm0, %v8808_v62 }
 0x547   : > { %v5112_v0 = vpop.f32.mrb[83].mxu0 }
 0x548   : > { %v5108_v1 = vadd.f32 %v5107_v20, %v4947_v22  ;;  %v4950_v24 = vadd.f32 %v5649_v33, %v8792_v59 }
 0x54a   : > { %v5111_v51 = vadd.f32 %v5110_v25, %v4950_v24  ;;  %v5650_v47 = vpop.f32.mrb[68].mxu1  ;;  %v5162_v30 = vmax.f32 %v5108_v1, 0.0 }
 0x54b   : > { %v5651_v41 = vpop.f32.mrb[69].mxu1 }
 0x54c   : > { %v5163_v26 = vmax.f32 %v5111_v51, 0.0  ;;  %v5652_v57 = vadd.f32 %v5651_v41, %v5650_v47  ;;  %v5653_v16 = vpop.f32.mrb[70].mxu1 }
 0x54d   : > { %v5654_v28 = vpop.f32.mrb[71].mxu1 }
 0x54e   : > { %v5762_v52 = vpack.c.bf16 %v5163_v26, %v5162_v30  ;;  %v5655_v44 = vadd.f32 %v5654_v28, %v5653_v16  ;;  %v4955_v37 = vadd.f32 %v5652_v57, %v8792_v59 }
 0x550   : > { %v5115_v36 = vpop.f32.mrb[84].mxu0  ;;  %5764 = vmatprep.subr.msk.bf16.mxu1 %vm8840_vm0, %v5762_v52  ;;  %v4958_v62 = vadd.f32 %v5655_v44, %v8792_v59 }
 0x551   : > { %v5116_v50 = vadd.f32 %v5115_v36, %v4955_v37  ;;  %v5117_v35 = vpop.f32.mrb[85].mxu0  ;;  %5767 = vmatpush3.bf16.xpose.msk.msra.mxu1 %vm8840_vm0, %v8812_v7 }
 0x552   : > { %v5118_v46 = vpop.f32.mrb[86].mxu0 }
 0x553   : > { %v5656_v61 = vpop.f32.mrb[72].mxu1  ;;  %v5119_v14 = vadd.f32 %v5118_v46, %v4958_v62  ;;  %v5120_v40 = vpop.f32.mrb[87].mxu0  ;;  %v5164_v34 = vmax.f32 %v5116_v50, 0.0 }
 0x554   : > { %v5657_v12 = vpop.f32.mrb[73].mxu1 }
 0x555   : > { %v5658_v43 = vadd.f32 %v5657_v12, %v5656_v61  ;;  %v5659_v27 = vpop.f32.mrb[74].mxu1  ;;  %v5165_v10 = vmax.f32 %v5119_v14, 0.0 }
 0x556   : > { %v5660_v45 = vpop.f32.mrb[75].mxu1 }
 0x557   : > { %v5661_v56 = vadd.f32 %v5660_v45, %v5659_v27  ;;  %v4963_v17 = vadd.f32 %v5658_v43, %v8792_v59  ;;  %v5768_v60 = vpack.c.bf16 %v5165_v10, %v5164_v34  ;;  %v5175_v25 = vpop.permute.xlu1 %5174 }
 0x558   : > { %v5123_v5 = vpop.f32.mrb[88].mxu0 }
 0x559   : > { %v4966_v19 = vadd.f32 %v5661_v56, %v8792_v59  ;;  %v5124_v29 = vadd.f32 %v5123_v5, %v4963_v17  ;;  %v5125_v53 = vpop.f32.mrb[89].mxu0  ;;  %5770 = vmatprep.subr.msk.bf16.mxu1 %vm8840_vm0, %v5768_v60 }
 0x55a   : > { %v5126_v54 = vpop.f32.mrb[90].mxu0  ;;  %5773 = vmatpush3.bf16.xpose.msk.msra.mxu1 %vm8840_vm0, %v8823_v55 }
 0x55b   : > { %v5662_v7 = vpop.f32.mrb[76].mxu1  ;;  %v5127_v42 = vadd.f32 %v5126_v54, %v4966_v19  ;;  %v5128_v8 = vpop.f32.mrb[91].mxu0  ;;  %v5166_v58 = vmax.f32 %v5124_v29, 0.0 }
 0x55c   : > { %v5663_v15 = vpop.f32.mrb[77].mxu1 }
 0x55d   : > { %v5664_v23 = vadd.f32 %v5663_v15, %v5662_v7  ;;  %v5665_v39 = vpop.f32.mrb[78].mxu1  ;;  %v5167_v4 = vmax.f32 %v5127_v42, 0.0 }
 0x55e   : > { %v5666_v63 = vpop.f32.mrb[79].mxu1 }
 0x55f   : > { %v5667_v6 = vadd.f32 %v5666_v63, %v5665_v39  ;;  %v5774_v48 = vpack.c.bf16 %v5167_v4, %v5166_v58  ;;  %v4971_v13 = vadd.f32 %v5664_v23, %v8792_v59 }
 0x561   : > { %v5131_v49 = vpop.f32.mrb[92].mxu0  ;;  %5776 = vmatprep.subr.msk.bf16.mxu1 %vm8840_vm0, %v5774_v48  ;;  %v4974_v55 = vadd.f32 %v5667_v6, %v8792_v59 }
 0x562   : > { %v5132_v9 = vadd.f32 %v5131_v49, %v4971_v13  ;;  %v5133_v21 = vpop.f32.mrb[93].mxu0  ;;  %5779 = vmatpush3.bf16.xpose.msk.msra.mxu1 %vm8840_vm0, %v8830_v2 }
 0x563   : > { %v5134_v3 = vpop.f32.mrb[94].mxu0 }
 0x564   : > { %v5135_v20 = vadd.f32 %v5134_v3, %v4974_v55  ;;  %v5136_v32 = vpop.f32.mrb[95].mxu0  ;;  %v5168_v31 = vmax.f32 %v5132_v9, 0.0 }
 0x566   : > { %v5169_v22 = vmax.f32 %v5135_v20, 0.0 }
 0x568   : > { %v5780_v33 = vpack.c.bf16 %v5169_v22, %v5168_v31 }
 0x56a   : > { %5782 = vmatprep.subr.msk.bf16.mxu1 %vm8840_vm0, %v5780_v33 }
 0x56b   : > { %5785 = vmatpush3.bf16.xpose.msk.msra.mxu1 %vm8840_vm0, %v8834_v11 }
 0x572   : > { %5701 = vmatmul.mubr.msk.f32.vlgmr.msra.gmra.mrb[80].mxu1 %vm2384_vm6, %v8819_v18 }
 0x645   : > { %v5342_v2 = vpop.f32.mrb[80].mxu1 }
 0x646   : > { %v5343_v59 = vadd.f32 %v5342_v2, %v5175_v25  ;;  %v5344_v0 = vpop.f32.mrb[81].mxu1 }
 0x647   : > { %v5345_v1 = vadd.f32 %v5344_v0, %v5175_v25 }
 0x649   : > { %v5349_v24 = vcombine.low %v5343_v59, %v5345_v1 }
 0x64b   : > { %5351 = vst [vmem:[%s332_s25] sm:$0xff] %v5349_v24 }
 0x64c PF: > { %s19_s30 = sadd.s32 1, %s5860_s30  }
 0x64d   : > { %p16_p4 = scmp.ge.s32.totalorder %s19_s30, 4  }
 0x64f   :  { %18 = sbr.rel (!%p16_p4) target bundleno = 1 (0x1), region = 86 }

</bundles_post_ra>
